<compile_context>
chip_gen: v7x
topology: tpu7x:2x2x1
jax: 0.10.0
libtpu: 0.0.40
codegen_flags: <defaults>
</compile_context>

<pallas_src>
import math
from functools import partial

import jax
import jax.numpy as jnp
from jax.experimental import pallas as pl
from jax.experimental.pallas import tpu as pltpu


VMEM_LIMIT_BYTES = 48 * 1024 * 1024  # comfortable on v5e/v6e (128 MiB); re-budget Nt for v7x (64 MiB)


def _round_up(a, b):
    return ((a + b - 1) // b) * b


def _layernorm(x, w, b, eps=1e-5):
    mu = jnp.mean(x, axis=-1, keepdims=True)
    var = jnp.mean(jnp.square(x - mu), axis=-1, keepdims=True)
    return (x - mu) * jax.lax.rsqrt(var + eps) * w + b


# ---------------------------------------------------------------------------
# Shared body of one nn.TransformerEncoderLayer (post-norm, relu), operating on
# a (Nt, S, D) f32 block.  Attention is per patch index (batched over Nt).
# ---------------------------------------------------------------------------
def _encoder_layer_body(x, refs, n_heads, scale):
    (wqkv_ref, bqkv_ref, wo_ref, bo_ref, ln1w_ref, ln1b_ref,
     w1_ref, b1_ref, w2_ref, b2_ref, ln2w_ref, ln2b_ref) = refs
    Nt, S, D = x.shape
    R = Nt * S
    H = n_heads
    hd = D // H

    xr = x.reshape(R, D)
    xb = xr.astype(jnp.bfloat16)

    # fused QKV projection: one (R, D) x (D, 3D) MXU dot
    qkv = jnp.dot(xb, wqkv_ref[...], preferred_element_type=jnp.float32) + bqkv_ref[...]

    ctx_heads = []
    for h in range(H):                                   # H is small & static
        q = (qkv[:, h * hd:(h + 1) * hd] * scale).astype(jnp.bfloat16).reshape(Nt, S, hd)
        k = qkv[:, D + h * hd:D + (h + 1) * hd].astype(jnp.bfloat16).reshape(Nt, S, hd)
        v = qkv[:, 2 * D + h * hd:2 * D + (h + 1) * hd].astype(jnp.bfloat16).reshape(Nt, S, hd)
        # patch-batched q @ k^T  -> (Nt, S, S)
        s = jax.lax.dot_general(q, k, (((2,), (2,)), ((0,), (0,))),
                                preferred_element_type=jnp.float32)
        s = s - jnp.max(s, axis=-1, keepdims=True)
        p = jnp.exp(s)
        p = p * pl.reciprocal(jnp.sum(p, axis=-1, keepdims=True), approx=True)
        # patch-batched p @ v    -> (Nt, S, hd)
        ctx = jax.lax.dot_general(p.astype(jnp.bfloat16), v, (((2,), (1,)), ((0,), (0,))),
                                  preferred_element_type=jnp.float32)
        ctx_heads.append(ctx.reshape(R, hd))
    ctx = jnp.concatenate(ctx_heads, axis=-1)            # (R, D) = (R, H*hd)

    attn = jnp.dot(ctx.astype(jnp.bfloat16), wo_ref[...],
                   preferred_element_type=jnp.float32) + bo_ref[...]

    x1 = _layernorm(xr + attn, ln1w_ref[...], ln1b_ref[...])

    f = jnp.dot(x1.astype(jnp.bfloat16), w1_ref[...],
                preferred_element_type=jnp.float32) + b1_ref[...]
    f = jnp.maximum(f, 0.0)
    f = jnp.dot(f.astype(jnp.bfloat16), w2_ref[...],
                preferred_element_type=jnp.float32) + b2_ref[...]

    out = _layernorm(x1 + f, ln2w_ref[...], ln2b_ref[...])
    return out.reshape(Nt, S, D)


def encoder_layer_kernel(x_ref, *refs, n_heads, scale):
    o_ref = refs[-1]
    x = x_ref[...].astype(jnp.float32)                   # (Nt, S, D)
    out = _encoder_layer_body(x, refs[:-1], n_heads, scale)
    o_ref[...] = out.astype(o_ref.dtype)


def embed_encoder_layer_kernel(x_ref, wp_ref, pe_bp_ref, *refs, n_heads, scale):
    # W_P projection + (PE + W_P bias) fused in front of encoder layer 0.
    o_ref = refs[-1]
    Nt, S, P = x_ref.shape
    D = wp_ref.shape[1]
    xp = x_ref[...].reshape(Nt * S, P).astype(jnp.bfloat16)
    emb = jnp.dot(xp, wp_ref[...], preferred_element_type=jnp.float32)
    x = emb.reshape(Nt, S, D) + pe_bp_ref[...]
    out = _encoder_layer_body(x, refs[:-1], n_heads, scale)
    o_ref[...] = out.astype(o_ref.dtype)


# ---------------------------------------------------------------------------
# Flatten_Head + fc collapsed into one lane-dense matmul:
#   y_T (O*P, Mt) = W_all (O*P, C*D) @ xT (C*D, Mt) + b_all (O*P, 1)
# ---------------------------------------------------------------------------
def head_fc_kernel(xT_ref, w_ref, b_ref, o_ref):
    y = jnp.dot(w_ref[...], xT_ref[...], preferred_element_type=jnp.float32)
    o_ref[...] = y + b_ref[...]


# ---------------------------------------------------------------------------
# Parameters (deterministic synthetic init; shapes mirror the PyTorch module;
# matmul weights stored pre-transposed, QKV fused, bf16 MXU operands).
# ---------------------------------------------------------------------------
def init_params(key, *, C, patch_len, d_model, n_heads, n_layers, dff, output_size):
    D = d_model

    def w(k, shape, scl=0.05, dtype=jnp.float32):
        return (jax.random.normal(k, shape, jnp.float32) * scl).astype(dtype)

    keys = jax.random.split(key, 4 + n_layers)
    params = {
        "wp": w(keys[0], (patch_len, D), dtype=jnp.bfloat16),     # Linear(patch_len, d_model)
        "bp": jnp.zeros((1, D), jnp.float32),
        "head_w": w(keys[1], (C, D, patch_len)),                  # per-channel Linear(d_model, patch_len)
        "head_b": jnp.zeros((C, patch_len), jnp.float32),
        "fc_w": w(keys[2], (C, output_size)),                     # Linear(input_size, output_size)
        "fc_b": jnp.zeros((output_size,), jnp.float32),
        "layers": [],
    }
    for li in range(n_layers):
        lk = jax.random.split(keys[3 + li], 4)
        params["layers"].append({
            "wqkv": w(lk[0], (D, 3 * D), dtype=jnp.bfloat16),     # fused q|k|v, heads hd-contiguous
            "bqkv": jnp.zeros((1, 3 * D), jnp.float32),
            "wo": w(lk[1], (D, D), dtype=jnp.bfloat16),
            "bo": jnp.zeros((1, D), jnp.float32),
            "ln1w": jnp.ones((1, D), jnp.float32),
            "ln1b": jnp.zeros((1, D), jnp.float32),
            "w1": w(lk[2], (D, dff), dtype=jnp.bfloat16),
            "b1": jnp.zeros((1, dff), jnp.float32),
            "w2": w(lk[3], (dff, D), dtype=jnp.bfloat16),
            "b2": jnp.zeros((1, D), jnp.float32),
            "ln2w": jnp.ones((1, D), jnp.float32),
            "ln2b": jnp.zeros((1, D), jnp.float32),
        })
    return params


# ---------------------------------------------------------------------------
# Forward pass.  Cheap layout glue (patchify, small transposes, weight folding)
# stays in XLA; all compute-carrying paths are Pallas kernels.
# ---------------------------------------------------------------------------
def patchtst_forward(x, params, *, patch_len, stride, n_heads):
    B, L, C = x.shape
    D = params["wp"].shape[1]
    dff = params["layers"][0]["w1"].shape[1]
    H = n_heads
    hd = D // H
    scale = 1.0 / math.sqrt(hd)
    n_out = params["fc_w"].shape[1]

    # --- patchify: ReplicationPad1d((0, stride)) + unfold -----------------------
    xc = jnp.transpose(x, (0, 2, 1))                                  # (B, C, L)
    xpad = jnp.concatenate([xc, jnp.repeat(xc[:, :, -1:], stride, axis=-1)], axis=-1)
    N = (L + stride - patch_len) // stride + 1
    idx = jnp.arange(N)[:, None] * stride + jnp.arange(patch_len)[None, :]
    patches = xpad[:, :, idx]                                         # (B, C, N, P)
    S = B * C                                                         # transformer sequence axis
    x_nsp = jnp.transpose(patches, (2, 0, 1, 3)).reshape(N, S, patch_len)

    # --- sinusoidal PE over the B*C axis, W_P bias folded in -------------------
    pos = jnp.arange(S, dtype=jnp.float32)[:, None]
    div = jnp.exp(jnp.arange(0, D, 2, dtype=jnp.float32) * (-math.log(10000.0) / D))
    pe = jnp.zeros((S, D), jnp.float32)
    pe = pe.at[:, 0::2].set(jnp.sin(pos * div))
    pe = pe.at[:, 1::2].set(jnp.cos(pos * div))
    pe_bp = pe + params["bp"]

    # --- chunk the patch axis: Nt patches (= Nt*S matmul rows) per grid step ---
    rows_target = 512
    Nt = max(1, min(N, max(1, rows_target // S)))
    if N >= 2 and Nt >= N:
        Nt = (N + 1) // 2            # keep >= 2 grid steps (v7x has 2 TensorCores)
    N_pad = _round_up(N, Nt)
    if N_pad != N:
        x_nsp = jnp.concatenate(
            [x_nsp, jnp.zeros((N_pad - N, S, patch_len), x_nsp.dtype)], axis=0)
    n_steps = N_pad // Nt

    cparams = pltpu.CompilerParams(dimension_semantics=("parallel",),
                                   vmem_limit_bytes=VMEM_LIMIT_BYTES)

    def full(shp):   # whole array, constant block index -> resident across grid steps
        return pl.BlockSpec(shp, lambda i, _n=len(shp): (0,) * _n)

    def chunk(shp):  # (Nt, *shp) block along the gridded N axis
        return pl.BlockSpec((Nt,) + shp, lambda i: (i, 0, 0))

    layer_specs = [
        full((D, 3 * D)), full((1, 3 * D)),
        full((D, D)), full((1, D)),
        full((1, D)), full((1, D)),
        full((D, dff)), full((1, dff)), full((dff, D)), full((1, D)),
        full((1, D)), full((1, D)),
    ]

    def layer_args(lp):
        return (lp["wqkv"], lp["bqkv"], lp["wo"], lp["bo"], lp["ln1w"], lp["ln1b"],
                lp["w1"], lp["b1"], lp["w2"], lp["b2"], lp["ln2w"], lp["ln2b"])

    # advisory cost estimate for XLA scheduling around the encoder calls
    R_tot = N_pad * S
    layer_flops = (2 * R_tot * D * 3 * D + 2 * R_tot * D * D + 4 * R_tot * D * dff
                   + 4 * N_pad * H * S * S * hd)
    layer_bytes = R_tot * D * 4 + 2 * (D * 3 * D + D * D + 2 * D * dff)
    cost = pl.CostEstimate(flops=layer_flops,
                           transcendentals=N_pad * H * S * S + 2 * R_tot,
                           bytes_accessed=layer_bytes)

    out_shape = jax.ShapeDtypeStruct((N_pad, S, D), jnp.bfloat16)  # inter-layer acts in bf16
    out_spec = chunk((S, D))

    # --- layer 0: W_P + PE fused into the first encoder layer -------------------
    lp0 = params["layers"][0]
    u = pl.pallas_call(
        partial(embed_encoder_layer_kernel, n_heads=H, scale=scale),
        out_shape=out_shape,
        grid=(n_steps,),
        in_specs=[chunk((S, patch_len)), full((patch_len, D)), full((S, D))] + layer_specs,
        out_specs=out_spec,
        compiler_params=cparams,
        cost_estimate=cost,
    )(x_nsp, params["wp"], pe_bp, *layer_args(lp0))

    # --- remaining fused encoder layers -----------------------------------------
    for lp in params["layers"][1:]:
        u = pl.pallas_call(
            partial(encoder_layer_kernel, n_heads=H, scale=scale),
            out_shape=out_shape,
            grid=(n_steps,),
            in_specs=[chunk((S, D))] + layer_specs,
            out_specs=out_spec,
            compiler_params=cparams,
            cost_estimate=cost,
        )(u, *layer_args(lp))

    # --- Flatten_Head + fc: fold fc into the head weights, one lane-dense matmul -
    u = u[:N]                                                        # drop N padding
    M = B * N
    OP = n_out * patch_len
    # xT[c*D+d, b*N+n] = u[n, b*C+c, d]
    xhT = jnp.transpose(u.reshape(N, B, C, D), (2, 3, 1, 0)).reshape(C * D, M)
    # W_all[o*P+p, c*D+d] = fc_w[c,o] * head_w[c,d,p]
    w_all = jnp.einsum("cdp,co->opcd", params["head_w"], params["fc_w"]) \
               .reshape(OP, C * D).astype(jnp.bfloat16)
    # b_all[o*P+p] = sum_c fc_w[c,o]*head_b[c,p] + fc_b[o]
    b_all = (jnp.einsum("cp,co->op", params["head_b"], params["fc_w"])
             + params["fc_b"][:, None]).reshape(OP, 1)

    Mt = min(512, _round_up(M, 128))
    M_pad = _round_up(M, Mt)
    if M_pad != M:
        xhT = jnp.concatenate([xhT, jnp.zeros((C * D, M_pad - M), xhT.dtype)], axis=1)

    y = pl.pallas_call(
        head_fc_kernel,
        out_shape=jax.ShapeDtypeStruct((OP, M_pad), jnp.float32),
        grid=(M_pad // Mt,),
        in_specs=[pl.BlockSpec((C * D, Mt), lambda i: (0, i)),
                  full((OP, C * D)), full((OP, 1))],
        out_specs=pl.BlockSpec((OP, Mt), lambda i: (0, i)),
        compiler_params=pltpu.CompilerParams(dimension_semantics=("parallel",),
                                             vmem_limit_bytes=VMEM_LIMIT_BYTES),
    )(xhT, w_all, b_all)

    # (O*P, M) -> (B, N*P, O) -> crop to L, as in the PyTorch forward
    y = y[:, :M]
    y = jnp.transpose(y.reshape(n_out, patch_len, B, N), (2, 3, 1, 0))
    y = y.reshape(B, N * patch_len, n_out)
    return y[:, :L, :]


# ---------------------------------------------------------------------------
if __name__ == "__main__":
    # small, forward-consistent shapes
    B, L, C = 2, 16, 4            # batch, length, input_size
    patch_len, stride = 8, 4
    d_model, n_heads, n_layers = 32, 4, 2
    dff = 2048                    # nn.TransformerEncoderLayer default dim_feedforward
    output_size = 2

    assert d_model % n_heads == 0 and d_model % 2 == 0

    key = jax.random.PRNGKey(0)
    kx, kp = jax.random.split(key)
    x = jax.random.normal(kx, (B, L, C), jnp.float32)
    params = init_params(kp, C=C, patch_len=patch_len, d_model=d_model,
                         n_heads=n_heads, n_layers=n_layers, dff=dff,
                         output_size=output_size)

    fwd = jax.jit(partial(patchtst_forward, patch_len=patch_len, stride=stride,
                          n_heads=n_heads))
    y = fwd(x, params)
    jax.block_until_ready(y)
    assert y.shape == (B, L, output_size), y.shape
    assert bool(jnp.all(jnp.isfinite(y)))
    print("KERNEL_OK")
</pallas_src>

<mosaic_0001>
module attributes {stable_mosaic.version = 11 : i64} {
  func.func @embed_encoder_layer_kernel(%arg0: i32, %arg1: memref<2x8x8xf32, #tpu.memory_space<vmem>>, %arg2: memref<8x32xbf16, #tpu.memory_space<vmem>>, %arg3: memref<8x32xf32, #tpu.memory_space<vmem>>, %arg4: memref<32x96xbf16, #tpu.memory_space<vmem>>, %arg5: memref<1x96xf32, #tpu.memory_space<vmem>>, %arg6: memref<32x32xbf16, #tpu.memory_space<vmem>>, %arg7: memref<1x32xf32, #tpu.memory_space<vmem>>, %arg8: memref<1x32xf32, #tpu.memory_space<vmem>>, %arg9: memref<1x32xf32, #tpu.memory_space<vmem>>, %arg10: memref<32x2048xbf16, #tpu.memory_space<vmem>>, %arg11: memref<1x2048xf32, #tpu.memory_space<vmem>>, %arg12: memref<2048x32xbf16, #tpu.memory_space<vmem>>, %arg13: memref<1x32xf32, #tpu.memory_space<vmem>>, %arg14: memref<1x32xf32, #tpu.memory_space<vmem>>, %arg15: memref<1x32xf32, #tpu.memory_space<vmem>>, %arg16: memref<2x8x32xbf16, #tpu.memory_space<vmem>>) attributes {dimension_semantics = [#tpu.dimension_semantics<parallel>], iteration_bounds = array<i64: 2>, scalar_prefetch = 0 : i64, scratch_operands = 0 : i64, tpu.core_type = #tpu.core_type<tc>, window_params = [{transform_indices = @transform_0, window_bounds = array<i64: 2, 8, 8>}, {pipeline_mode = #tpu.pipeline_mode<synchronous>, transform_indices = @transform_1, window_bounds = array<i64: 8, 32>}, {pipeline_mode = #tpu.pipeline_mode<synchronous>, transform_indices = @transform_2, window_bounds = array<i64: 8, 32>}, {pipeline_mode = #tpu.pipeline_mode<synchronous>, transform_indices = @transform_3, window_bounds = array<i64: 32, 96>}, {pipeline_mode = #tpu.pipeline_mode<synchronous>, transform_indices = @transform_4, window_bounds = array<i64: 1, 96>}, {pipeline_mode = #tpu.pipeline_mode<synchronous>, transform_indices = @transform_5, window_bounds = array<i64: 32, 32>}, {pipeline_mode = #tpu.pipeline_mode<synchronous>, transform_indices = @transform_6, window_bounds = array<i64: 1, 32>}, {pipeline_mode = #tpu.pipeline_mode<synchronous>, transform_indices = @transform_7, window_bounds = array<i64: 1, 32>}, {pipeline_mode = #tpu.pipeline_mode<synchronous>, transform_indices = @transform_8, window_bounds = array<i64: 1, 32>}, {pipeline_mode = #tpu.pipeline_mode<synchronous>, transform_indices = @transform_9, window_bounds = array<i64: 32, 2048>}, {pipeline_mode = #tpu.pipeline_mode<synchronous>, transform_indices = @transform_10, window_bounds = array<i64: 1, 2048>}, {pipeline_mode = #tpu.pipeline_mode<synchronous>, transform_indices = @transform_11, window_bounds = array<i64: 2048, 32>}, {pipeline_mode = #tpu.pipeline_mode<synchronous>, transform_indices = @transform_12, window_bounds = array<i64: 1, 32>}, {pipeline_mode = #tpu.pipeline_mode<synchronous>, transform_indices = @transform_13, window_bounds = array<i64: 1, 32>}, {pipeline_mode = #tpu.pipeline_mode<synchronous>, transform_indices = @transform_14, window_bounds = array<i64: 1, 32>}, {transform_indices = @transform_15, window_bounds = array<i64: 2, 8, 32>}]} {
    %c0 = arith.constant 0 : index
    %c0_0 = arith.constant 0 : index
    %c0_1 = arith.constant 0 : index
    %0 = vector.load %arg1[%c0, %c0_0, %c0_1] : memref<2x8x8xf32, #tpu.memory_space<vmem>>, vector<2x8x8xf32>
    %1 = vector.shape_cast %0 : vector<2x8x8xf32> to vector<16x8xf32>
    %2 = arith.truncf %1 : vector<16x8xf32> to vector<16x8xbf16>
    %c0_2 = arith.constant 0 : index
    %c0_3 = arith.constant 0 : index
    %3 = vector.load %arg2[%c0_2, %c0_3] : memref<8x32xbf16, #tpu.memory_space<vmem>>, vector<8x32xbf16>
    %cst = arith.constant dense<0.000000e+00> : vector<16x32xf32>
    %4 = tpu.matmul %2, %3, %cst {dimension_numbers = #tpu.dot_dimension_numbers<[1], [0], [0], [1], [0, 0, 1, 1], [], []>} : vector<16x8xbf16>, vector<8x32xbf16>, vector<16x32xf32> -> vector<16x32xf32>
    %5 = vector.shape_cast %4 : vector<16x32xf32> to vector<2x8x32xf32>
    %c0_4 = arith.constant 0 : index
    %c0_5 = arith.constant 0 : index
    %6 = vector.load %arg3[%c0_4, %c0_5] : memref<8x32xf32, #tpu.memory_space<vmem>>, vector<8x32xf32>
    %7 = vector.shape_cast %6 : vector<8x32xf32> to vector<1x8x32xf32>
    %8 = vector.broadcast %7 : vector<1x8x32xf32> to vector<2x8x32xf32>
    %9 = arith.addf %5, %8 : vector<2x8x32xf32>
    %10 = vector.shape_cast %9 : vector<2x8x32xf32> to vector<16x32xf32>
    %11 = arith.truncf %10 : vector<16x32xf32> to vector<16x32xbf16>
    %c0_6 = arith.constant 0 : index
    %c0_7 = arith.constant 0 : index
    %12 = vector.load %arg4[%c0_6, %c0_7] : memref<32x96xbf16, #tpu.memory_space<vmem>>, vector<32x96xbf16>
    %cst_8 = arith.constant dense<0.000000e+00> : vector<16x96xf32>
    %13 = tpu.matmul %11, %12, %cst_8 {dimension_numbers = #tpu.dot_dimension_numbers<[1], [0], [0], [1], [0, 0, 1, 1], [], []>} : vector<16x32xbf16>, vector<32x96xbf16>, vector<16x96xf32> -> vector<16x96xf32>
    %c0_9 = arith.constant 0 : index
    %c0_10 = arith.constant 0 : index
    %14 = vector.load %arg5[%c0_9, %c0_10] : memref<1x96xf32, #tpu.memory_space<vmem>>, vector<1x96xf32>
    %15 = vector.broadcast %14 : vector<1x96xf32> to vector<16x96xf32>
    %16 = arith.addf %13, %15 : vector<16x96xf32>
    %17 = vector.extract_strided_slice %16 {offsets = [0, 0], sizes = [16, 8], strides = [1, 1]} : vector<16x96xf32> to vector<16x8xf32>
    %cst_11 = arith.constant 0.353553385 : f32
    %18 = vector.broadcast %cst_11 : f32 to vector<16x8xf32>
    %19 = arith.mulf %17, %18 : vector<16x8xf32>
    %20 = arith.truncf %19 : vector<16x8xf32> to vector<16x8xbf16>
    %21 = vector.shape_cast %20 : vector<16x8xbf16> to vector<2x8x8xbf16>
    %22 = vector.extract_strided_slice %16 {offsets = [0, 32], sizes = [16, 8], strides = [1, 1]} : vector<16x96xf32> to vector<16x8xf32>
    %23 = arith.truncf %22 : vector<16x8xf32> to vector<16x8xbf16>
    %24 = vector.shape_cast %23 : vector<16x8xbf16> to vector<2x8x8xbf16>
    %25 = vector.extract_strided_slice %16 {offsets = [0, 64], sizes = [16, 8], strides = [1, 1]} : vector<16x96xf32> to vector<16x8xf32>
    %26 = arith.truncf %25 : vector<16x8xf32> to vector<16x8xbf16>
    %27 = vector.shape_cast %26 : vector<16x8xbf16> to vector<2x8x8xbf16>
    %cst_12 = arith.constant dense<0.000000e+00> : vector<2x8x8xf32>
    %28 = tpu.matmul %21, %24, %cst_12 {dimension_numbers = #tpu.dot_dimension_numbers<[2], [2], [1], [1], [0, 0, 0, 1, 1, 1], [0], [0]>} : vector<2x8x8xbf16>, vector<2x8x8xbf16>, vector<2x8x8xf32> -> vector<2x8x8xf32>
    %cst_13 = arith.constant dense<0xFF800000> : vector<2x8xf32>
    %29 = vector.multi_reduction <maximumf>, %28, %cst_13 [2] : vector<2x8x8xf32> to vector<2x8xf32>
    %30 = vector.shape_cast %29 : vector<2x8xf32> to vector<2x8x1xf32>
    %31 = vector.broadcast %30 : vector<2x8x1xf32> to vector<2x8x8xf32>
    %32 = arith.subf %28, %31 : vector<2x8x8xf32>
    %33 = math.exp %32 : vector<2x8x8xf32>
    %cst_14 = arith.constant dense<0.000000e+00> : vector<2x8xf32>
    %34 = vector.multi_reduction <add>, %33, %cst_14 [2] : vector<2x8x8xf32> to vector<2x8xf32>
    %35 = vector.shape_cast %34 : vector<2x8xf32> to vector<2x8x1xf32>
    %36 = tpu.reciprocal %35 {approx = true} : vector<2x8x1xf32> -> vector<2x8x1xf32>
    %37 = vector.broadcast %36 : vector<2x8x1xf32> to vector<2x8x8xf32>
    %38 = arith.mulf %33, %37 : vector<2x8x8xf32>
    %39 = arith.truncf %38 : vector<2x8x8xf32> to vector<2x8x8xbf16>
    %cst_15 = arith.constant dense<0.000000e+00> : vector<2x8x8xf32>
    %40 = tpu.matmul %39, %27, %cst_15 {dimension_numbers = #tpu.dot_dimension_numbers<[2], [1], [1], [2], [0, 0, 0, 1, 1, 2], [0], [0]>} : vector<2x8x8xbf16>, vector<2x8x8xbf16>, vector<2x8x8xf32> -> vector<2x8x8xf32>
    %41 = vector.shape_cast %40 : vector<2x8x8xf32> to vector<16x8xf32>
    %42 = vector.extract_strided_slice %16 {offsets = [0, 8], sizes = [16, 8], strides = [1, 1]} : vector<16x96xf32> to vector<16x8xf32>
    %cst_16 = arith.constant 0.353553385 : f32
    %43 = vector.broadcast %cst_16 : f32 to vector<16x8xf32>
    %44 = arith.mulf %42, %43 : vector<16x8xf32>
    %45 = arith.truncf %44 : vector<16x8xf32> to vector<16x8xbf16>
    %46 = vector.shape_cast %45 : vector<16x8xbf16> to vector<2x8x8xbf16>
    %47 = vector.extract_strided_slice %16 {offsets = [0, 40], sizes = [16, 8], strides = [1, 1]} : vector<16x96xf32> to vector<16x8xf32>
    %48 = arith.truncf %47 : vector<16x8xf32> to vector<16x8xbf16>
    %49 = vector.shape_cast %48 : vector<16x8xbf16> to vector<2x8x8xbf16>
    %50 = vector.extract_strided_slice %16 {offsets = [0, 72], sizes = [16, 8], strides = [1, 1]} : vector<16x96xf32> to vector<16x8xf32>
    %51 = arith.truncf %50 : vector<16x8xf32> to vector<16x8xbf16>
    %52 = vector.shape_cast %51 : vector<16x8xbf16> to vector<2x8x8xbf16>
    %cst_17 = arith.constant dense<0.000000e+00> : vector<2x8x8xf32>
    %53 = tpu.matmul %46, %49, %cst_17 {dimension_numbers = #tpu.dot_dimension_numbers<[2], [2], [1], [1], [0, 0, 0, 1, 1, 1], [0], [0]>} : vector<2x8x8xbf16>, vector<2x8x8xbf16>, vector<2x8x8xf32> -> vector<2x8x8xf32>
    %cst_18 = arith.constant dense<0xFF800000> : vector<2x8xf32>
    %54 = vector.multi_reduction <maximumf>, %53, %cst_18 [2] : vector<2x8x8xf32> to vector<2x8xf32>
    %55 = vector.shape_cast %54 : vector<2x8xf32> to vector<2x8x1xf32>
    %56 = vector.broadcast %55 : vector<2x8x1xf32> to vector<2x8x8xf32>
    %57 = arith.subf %53, %56 : vector<2x8x8xf32>
    %58 = math.exp %57 : vector<2x8x8xf32>
    %cst_19 = arith.constant dense<0.000000e+00> : vector<2x8xf32>
    %59 = vector.multi_reduction <add>, %58, %cst_19 [2] : vector<2x8x8xf32> to vector<2x8xf32>
    %60 = vector.shape_cast %59 : vector<2x8xf32> to vector<2x8x1xf32>
    %61 = tpu.reciprocal %60 {approx = true} : vector<2x8x1xf32> -> vector<2x8x1xf32>
    %62 = vector.broadcast %61 : vector<2x8x1xf32> to vector<2x8x8xf32>
    %63 = arith.mulf %58, %62 : vector<2x8x8xf32>
    %64 = arith.truncf %63 : vector<2x8x8xf32> to vector<2x8x8xbf16>
    %cst_20 = arith.constant dense<0.000000e+00> : vector<2x8x8xf32>
    %65 = tpu.matmul %64, %52, %cst_20 {dimension_numbers = #tpu.dot_dimension_numbers<[2], [1], [1], [2], [0, 0, 0, 1, 1, 2], [0], [0]>} : vector<2x8x8xbf16>, vector<2x8x8xbf16>, vector<2x8x8xf32> -> vector<2x8x8xf32>
    %66 = vector.shape_cast %65 : vector<2x8x8xf32> to vector<16x8xf32>
    %67 = vector.extract_strided_slice %16 {offsets = [0, 16], sizes = [16, 8], strides = [1, 1]} : vector<16x96xf32> to vector<16x8xf32>
    %cst_21 = arith.constant 0.353553385 : f32
    %68 = vector.broadcast %cst_21 : f32 to vector<16x8xf32>
    %69 = arith.mulf %67, %68 : vector<16x8xf32>
    %70 = arith.truncf %69 : vector<16x8xf32> to vector<16x8xbf16>
    %71 = vector.shape_cast %70 : vector<16x8xbf16> to vector<2x8x8xbf16>
    %72 = vector.extract_strided_slice %16 {offsets = [0, 48], sizes = [16, 8], strides = [1, 1]} : vector<16x96xf32> to vector<16x8xf32>
    %73 = arith.truncf %72 : vector<16x8xf32> to vector<16x8xbf16>
    %74 = vector.shape_cast %73 : vector<16x8xbf16> to vector<2x8x8xbf16>
    %75 = vector.extract_strided_slice %16 {offsets = [0, 80], sizes = [16, 8], strides = [1, 1]} : vector<16x96xf32> to vector<16x8xf32>
    %76 = arith.truncf %75 : vector<16x8xf32> to vector<16x8xbf16>
    %77 = vector.shape_cast %76 : vector<16x8xbf16> to vector<2x8x8xbf16>
    %cst_22 = arith.constant dense<0.000000e+00> : vector<2x8x8xf32>
    %78 = tpu.matmul %71, %74, %cst_22 {dimension_numbers = #tpu.dot_dimension_numbers<[2], [2], [1], [1], [0, 0, 0, 1, 1, 1], [0], [0]>} : vector<2x8x8xbf16>, vector<2x8x8xbf16>, vector<2x8x8xf32> -> vector<2x8x8xf32>
    %cst_23 = arith.constant dense<0xFF800000> : vector<2x8xf32>
    %79 = vector.multi_reduction <maximumf>, %78, %cst_23 [2] : vector<2x8x8xf32> to vector<2x8xf32>
    %80 = vector.shape_cast %79 : vector<2x8xf32> to vector<2x8x1xf32>
    %81 = vector.broadcast %80 : vector<2x8x1xf32> to vector<2x8x8xf32>
    %82 = arith.subf %78, %81 : vector<2x8x8xf32>
    %83 = math.exp %82 : vector<2x8x8xf32>
    %cst_24 = arith.constant dense<0.000000e+00> : vector<2x8xf32>
    %84 = vector.multi_reduction <add>, %83, %cst_24 [2] : vector<2x8x8xf32> to vector<2x8xf32>
    %85 = vector.shape_cast %84 : vector<2x8xf32> to vector<2x8x1xf32>
    %86 = tpu.reciprocal %85 {approx = true} : vector<2x8x1xf32> -> vector<2x8x1xf32>
    %87 = vector.broadcast %86 : vector<2x8x1xf32> to vector<2x8x8xf32>
    %88 = arith.mulf %83, %87 : vector<2x8x8xf32>
    %89 = arith.truncf %88 : vector<2x8x8xf32> to vector<2x8x8xbf16>
    %cst_25 = arith.constant dense<0.000000e+00> : vector<2x8x8xf32>
    %90 = tpu.matmul %89, %77, %cst_25 {dimension_numbers = #tpu.dot_dimension_numbers<[2], [1], [1], [2], [0, 0, 0, 1, 1, 2], [0], [0]>} : vector<2x8x8xbf16>, vector<2x8x8xbf16>, vector<2x8x8xf32> -> vector<2x8x8xf32>
    %91 = vector.shape_cast %90 : vector<2x8x8xf32> to vector<16x8xf32>
    %92 = vector.extract_strided_slice %16 {offsets = [0, 24], sizes = [16, 8], strides = [1, 1]} : vector<16x96xf32> to vector<16x8xf32>
    %cst_26 = arith.constant 0.353553385 : f32
    %93 = vector.broadcast %cst_26 : f32 to vector<16x8xf32>
    %94 = arith.mulf %92, %93 : vector<16x8xf32>
    %95 = arith.truncf %94 : vector<16x8xf32> to vector<16x8xbf16>
    %96 = vector.shape_cast %95 : vector<16x8xbf16> to vector<2x8x8xbf16>
    %97 = vector.extract_strided_slice %16 {offsets = [0, 56], sizes = [16, 8], strides = [1, 1]} : vector<16x96xf32> to vector<16x8xf32>
    %98 = arith.truncf %97 : vector<16x8xf32> to vector<16x8xbf16>
    %99 = vector.shape_cast %98 : vector<16x8xbf16> to vector<2x8x8xbf16>
    %100 = vector.extract_strided_slice %16 {offsets = [0, 88], sizes = [16, 8], strides = [1, 1]} : vector<16x96xf32> to vector<16x8xf32>
    %101 = arith.truncf %100 : vector<16x8xf32> to vector<16x8xbf16>
    %102 = vector.shape_cast %101 : vector<16x8xbf16> to vector<2x8x8xbf16>
    %cst_27 = arith.constant dense<0.000000e+00> : vector<2x8x8xf32>
    %103 = tpu.matmul %96, %99, %cst_27 {dimension_numbers = #tpu.dot_dimension_numbers<[2], [2], [1], [1], [0, 0, 0, 1, 1, 1], [0], [0]>} : vector<2x8x8xbf16>, vector<2x8x8xbf16>, vector<2x8x8xf32> -> vector<2x8x8xf32>
    %cst_28 = arith.constant dense<0xFF800000> : vector<2x8xf32>
    %104 = vector.multi_reduction <maximumf>, %103, %cst_28 [2] : vector<2x8x8xf32> to vector<2x8xf32>
    %105 = vector.shape_cast %104 : vector<2x8xf32> to vector<2x8x1xf32>
    %106 = vector.broadcast %105 : vector<2x8x1xf32> to vector<2x8x8xf32>
    %107 = arith.subf %103, %106 : vector<2x8x8xf32>
    %108 = math.exp %107 : vector<2x8x8xf32>
    %cst_29 = arith.constant dense<0.000000e+00> : vector<2x8xf32>
    %109 = vector.multi_reduction <add>, %108, %cst_29 [2] : vector<2x8x8xf32> to vector<2x8xf32>
    %110 = vector.shape_cast %109 : vector<2x8xf32> to vector<2x8x1xf32>
    %111 = tpu.reciprocal %110 {approx = true} : vector<2x8x1xf32> -> vector<2x8x1xf32>
    %112 = vector.broadcast %111 : vector<2x8x1xf32> to vector<2x8x8xf32>
    %113 = arith.mulf %108, %112 : vector<2x8x8xf32>
    %114 = arith.truncf %113 : vector<2x8x8xf32> to vector<2x8x8xbf16>
    %cst_30 = arith.constant dense<0.000000e+00> : vector<2x8x8xf32>
    %115 = tpu.matmul %114, %102, %cst_30 {dimension_numbers = #tpu.dot_dimension_numbers<[2], [1], [1], [2], [0, 0, 0, 1, 1, 2], [0], [0]>} : vector<2x8x8xbf16>, vector<2x8x8xbf16>, vector<2x8x8xf32> -> vector<2x8x8xf32>
    %116 = vector.shape_cast %115 : vector<2x8x8xf32> to vector<16x8xf32>
    %117 = tpu.concatenate %41, %66, %91, %116 in 1 : vector<16x8xf32>, vector<16x8xf32>, vector<16x8xf32>, vector<16x8xf32> -> vector<16x32xf32>
    %118 = arith.truncf %117 : vector<16x32xf32> to vector<16x32xbf16>
    %c0_31 = arith.constant 0 : index
    %c0_32 = arith.constant 0 : index
    %119 = vector.load %arg6[%c0_31, %c0_32] : memref<32x32xbf16, #tpu.memory_space<vmem>>, vector<32x32xbf16>
    %cst_33 = arith.constant dense<0.000000e+00> : vector<16x32xf32>
    %120 = tpu.matmul %118, %119, %cst_33 {dimension_numbers = #tpu.dot_dimension_numbers<[1], [0], [0], [1], [0, 0, 1, 1], [], []>} : vector<16x32xbf16>, vector<32x32xbf16>, vector<16x32xf32> -> vector<16x32xf32>
    %c0_34 = arith.constant 0 : index
    %c0_35 = arith.constant 0 : index
    %121 = vector.load %arg7[%c0_34, %c0_35] : memref<1x32xf32, #tpu.memory_space<vmem>>, vector<1x32xf32>
    %122 = vector.broadcast %121 : vector<1x32xf32> to vector<16x32xf32>
    %123 = arith.addf %120, %122 : vector<16x32xf32>
    %124 = arith.addf %10, %123 : vector<16x32xf32>
    %c0_36 = arith.constant 0 : index
    %c0_37 = arith.constant 0 : index
    %125 = vector.load %arg8[%c0_36, %c0_37] : memref<1x32xf32, #tpu.memory_space<vmem>>, vector<1x32xf32>
    %c0_38 = arith.constant 0 : index
    %c0_39 = arith.constant 0 : index
    %126 = vector.load %arg9[%c0_38, %c0_39] : memref<1x32xf32, #tpu.memory_space<vmem>>, vector<1x32xf32>
    %cst_40 = arith.constant dense<0.000000e+00> : vector<16xf32>
    %127 = vector.multi_reduction <add>, %124, %cst_40 [1] : vector<16x32xf32> to vector<16xf32>
    %128 = vector.shape_cast %127 : vector<16xf32> to vector<16x1xf32>
    %cst_41 = arith.constant 3.200000e+01 : f32
    %129 = vector.broadcast %cst_41 : f32 to vector<16x1xf32>
    %130 = arith.divf %128, %129 : vector<16x1xf32>
    %131 = vector.broadcast %130 : vector<16x1xf32> to vector<16x32xf32>
    %132 = arith.subf %124, %131 : vector<16x32xf32>
    %133 = arith.mulf %132, %132 : vector<16x32xf32>
    %cst_42 = arith.constant dense<0.000000e+00> : vector<16xf32>
    %134 = vector.multi_reduction <add>, %133, %cst_42 [1] : vector<16x32xf32> to vector<16xf32>
    %135 = vector.shape_cast %134 : vector<16xf32> to vector<16x1xf32>
    %cst_43 = arith.constant 3.200000e+01 : f32
    %136 = vector.broadcast %cst_43 : f32 to vector<16x1xf32>
    %137 = arith.divf %135, %136 : vector<16x1xf32>
    %138 = vector.broadcast %130 : vector<16x1xf32> to vector<16x32xf32>
    %139 = arith.subf %124, %138 : vector<16x32xf32>
    %cst_44 = arith.constant 9.99999974E-6 : f32
    %140 = vector.broadcast %cst_44 : f32 to vector<16x1xf32>
    %141 = arith.addf %137, %140 : vector<16x1xf32>
    %142 = math.rsqrt %141 : vector<16x1xf32>
    %143 = vector.broadcast %142 : vector<16x1xf32> to vector<16x32xf32>
    %144 = arith.mulf %139, %143 : vector<16x32xf32>
    %145 = vector.broadcast %125 : vector<1x32xf32> to vector<16x32xf32>
    %146 = arith.mulf %144, %145 : vector<16x32xf32>
    %147 = vector.broadcast %126 : vector<1x32xf32> to vector<16x32xf32>
    %148 = arith.addf %146, %147 : vector<16x32xf32>
    %149 = arith.truncf %148 : vector<16x32xf32> to vector<16x32xbf16>
    %c0_45 = arith.constant 0 : index
    %c0_46 = arith.constant 0 : index
    %150 = vector.load %arg10[%c0_45, %c0_46] : memref<32x2048xbf16, #tpu.memory_space<vmem>>, vector<32x2048xbf16>
    %cst_47 = arith.constant dense<0.000000e+00> : vector<16x2048xf32>
    %151 = tpu.matmul %149, %150, %cst_47 {dimension_numbers = #tpu.dot_dimension_numbers<[1], [0], [0], [1], [0, 0, 1, 1], [], []>} : vector<16x32xbf16>, vector<32x2048xbf16>, vector<16x2048xf32> -> vector<16x2048xf32>
    %c0_48 = arith.constant 0 : index
    %c0_49 = arith.constant 0 : index
    %152 = vector.load %arg11[%c0_48, %c0_49] : memref<1x2048xf32, #tpu.memory_space<vmem>>, vector<1x2048xf32>
    %153 = vector.broadcast %152 : vector<1x2048xf32> to vector<16x2048xf32>
    %154 = arith.addf %151, %153 : vector<16x2048xf32>
    %cst_50 = arith.constant 0.000000e+00 : f32
    %155 = vector.broadcast %cst_50 : f32 to vector<16x2048xf32>
    %156 = arith.maximumf %154, %155 : vector<16x2048xf32>
    %157 = arith.truncf %156 : vector<16x2048xf32> to vector<16x2048xbf16>
    %c0_51 = arith.constant 0 : index
    %c0_52 = arith.constant 0 : index
    %158 = vector.load %arg12[%c0_51, %c0_52] : memref<2048x32xbf16, #tpu.memory_space<vmem>>, vector<2048x32xbf16>
    %cst_53 = arith.constant dense<0.000000e+00> : vector<16x32xf32>
    %159 = tpu.matmul %157, %158, %cst_53 {dimension_numbers = #tpu.dot_dimension_numbers<[1], [0], [0], [1], [0, 0, 1, 1], [], []>} : vector<16x2048xbf16>, vector<2048x32xbf16>, vector<16x32xf32> -> vector<16x32xf32>
    %c0_54 = arith.constant 0 : index
    %c0_55 = arith.constant 0 : index
    %160 = vector.load %arg13[%c0_54, %c0_55] : memref<1x32xf32, #tpu.memory_space<vmem>>, vector<1x32xf32>
    %161 = vector.broadcast %160 : vector<1x32xf32> to vector<16x32xf32>
    %162 = arith.addf %159, %161 : vector<16x32xf32>
    %163 = arith.addf %148, %162 : vector<16x32xf32>
    %c0_56 = arith.constant 0 : index
    %c0_57 = arith.constant 0 : index
    %164 = vector.load %arg14[%c0_56, %c0_57] : memref<1x32xf32, #tpu.memory_space<vmem>>, vector<1x32xf32>
    %c0_58 = arith.constant 0 : index
    %c0_59 = arith.constant 0 : index
    %165 = vector.load %arg15[%c0_58, %c0_59] : memref<1x32xf32, #tpu.memory_space<vmem>>, vector<1x32xf32>
    %cst_60 = arith.constant dense<0.000000e+00> : vector<16xf32>
    %166 = vector.multi_reduction <add>, %163, %cst_60 [1] : vector<16x32xf32> to vector<16xf32>
    %167 = vector.shape_cast %166 : vector<16xf32> to vector<16x1xf32>
    %cst_61 = arith.constant 3.200000e+01 : f32
    %168 = vector.broadcast %cst_61 : f32 to vector<16x1xf32>
    %169 = arith.divf %167, %168 : vector<16x1xf32>
    %170 = vector.broadcast %169 : vector<16x1xf32> to vector<16x32xf32>
    %171 = arith.subf %163, %170 : vector<16x32xf32>
    %172 = arith.mulf %171, %171 : vector<16x32xf32>
    %cst_62 = arith.constant dense<0.000000e+00> : vector<16xf32>
    %173 = vector.multi_reduction <add>, %172, %cst_62 [1] : vector<16x32xf32> to vector<16xf32>
    %174 = vector.shape_cast %173 : vector<16xf32> to vector<16x1xf32>
    %cst_63 = arith.constant 3.200000e+01 : f32
    %175 = vector.broadcast %cst_63 : f32 to vector<16x1xf32>
    %176 = arith.divf %174, %175 : vector<16x1xf32>
    %177 = vector.broadcast %169 : vector<16x1xf32> to vector<16x32xf32>
    %178 = arith.subf %163, %177 : vector<16x32xf32>
    %cst_64 = arith.constant 9.99999974E-6 : f32
    %179 = vector.broadcast %cst_64 : f32 to vector<16x1xf32>
    %180 = arith.addf %176, %179 : vector<16x1xf32>
    %181 = math.rsqrt %180 : vector<16x1xf32>
    %182 = vector.broadcast %181 : vector<16x1xf32> to vector<16x32xf32>
    %183 = arith.mulf %178, %182 : vector<16x32xf32>
    %184 = vector.broadcast %164 : vector<1x32xf32> to vector<16x32xf32>
    %185 = arith.mulf %183, %184 : vector<16x32xf32>
    %186 = vector.broadcast %165 : vector<1x32xf32> to vector<16x32xf32>
    %187 = arith.addf %185, %186 : vector<16x32xf32>
    %188 = vector.shape_cast %187 : vector<16x32xf32> to vector<2x8x32xf32>
    %189 = arith.truncf %188 : vector<2x8x32xf32> to vector<2x8x32xbf16>
    %c0_65 = arith.constant 0 : index
    %c0_66 = arith.constant 0 : index
    %c0_67 = arith.constant 0 : index
    %190 = vector.load %arg16[%c0_65, %c0_66, %c0_67] : memref<2x8x32xbf16, #tpu.memory_space<vmem>>, vector<2x8x32xbf16>
    tpu.vector_store %arg16[%c0_65, %c0_66, %c0_67], %189 {strides = array<i32>} : memref<2x8x32xbf16, #tpu.memory_space<vmem>>, vector<2x8x32xbf16>,
    return
  }
  func.func @transform_0(%arg0: i32) -> (i32, i32, i32) {
    %c0_i32 = arith.constant 0 : i32
    %c0_i32_0 = arith.constant 0 : i32
    %c0_i32_1 = arith.constant 0 : i32
    return %arg0, %c0_i32, %c0_i32_0 : i32, i32, i32
  }
  func.func @transform_1(%arg0: i32) -> (i32, i32) {
    %c0_i32 = arith.constant 0 : i32
    %c0_i32_0 = arith.constant 0 : i32
    %c0_i32_1 = arith.constant 0 : i32
    return %c0_i32, %c0_i32_0 : i32, i32
  }
  func.func @transform_2(%arg0: i32) -> (i32, i32) {
    %c0_i32 = arith.constant 0 : i32
    %c0_i32_0 = arith.constant 0 : i32
    %c0_i32_1 = arith.constant 0 : i32
    return %c0_i32, %c0_i32_0 : i32, i32
  }
  func.func @transform_3(%arg0: i32) -> (i32, i32) {
    %c0_i32 = arith.constant 0 : i32
    %c0_i32_0 = arith.constant 0 : i32
    %c0_i32_1 = arith.constant 0 : i32
    return %c0_i32, %c0_i32_0 : i32, i32
  }
  func.func @transform_4(%arg0: i32) -> (i32, i32) {
    %c0_i32 = arith.constant 0 : i32
    %c0_i32_0 = arith.constant 0 : i32
    %c0_i32_1 = arith.constant 0 : i32
    return %c0_i32, %c0_i32_0 : i32, i32
  }
  func.func @transform_5(%arg0: i32) -> (i32, i32) {
    %c0_i32 = arith.constant 0 : i32
    %c0_i32_0 = arith.constant 0 : i32
    %c0_i32_1 = arith.constant 0 : i32
    return %c0_i32, %c0_i32_0 : i32, i32
  }
  func.func @transform_6(%arg0: i32) -> (i32, i32) {
    %c0_i32 = arith.constant 0 : i32
    %c0_i32_0 = arith.constant 0 : i32
    %c0_i32_1 = arith.constant 0 : i32
    return %c0_i32, %c0_i32_0 : i32, i32
  }
  func.func @transform_7(%arg0: i32) -> (i32, i32) {
    %c0_i32 = arith.constant 0 : i32
    %c0_i32_0 = arith.constant 0 : i32
    %c0_i32_1 = arith.constant 0 : i32
    return %c0_i32, %c0_i32_0 : i32, i32
  }
  func.func @transform_8(%arg0: i32) -> (i32, i32) {
    %c0_i32 = arith.constant 0 : i32
    %c0_i32_0 = arith.constant 0 : i32
    %c0_i32_1 = arith.constant 0 : i32
    return %c0_i32, %c0_i32_0 : i32, i32
  }
  func.func @transform_9(%arg0: i32) -> (i32, i32) {
    %c0_i32 = arith.constant 0 : i32
    %c0_i32_0 = arith.constant 0 : i32
    %c0_i32_1 = arith.constant 0 : i32
    return %c0_i32, %c0_i32_0 : i32, i32
  }
  func.func @transform_10(%arg0: i32) -> (i32, i32) {
    %c0_i32 = arith.constant 0 : i32
    %c0_i32_0 = arith.constant 0 : i32
    %c0_i32_1 = arith.constant 0 : i32
    return %c0_i32, %c0_i32_0 : i32, i32
  }
  func.func @transform_11(%arg0: i32) -> (i32, i32) {
    %c0_i32 = arith.constant 0 : i32
    %c0_i32_0 = arith.constant 0 : i32
    %c0_i32_1 = arith.constant 0 : i32
    return %c0_i32, %c0_i32_0 : i32, i32
  }
  func.func @transform_12(%arg0: i32) -> (i32, i32) {
    %c0_i32 = arith.constant 0 : i32
    %c0_i32_0 = arith.constant 0 : i32
    %c0_i32_1 = arith.constant 0 : i32
    return %c0_i32, %c0_i32_0 : i32, i32
  }
  func.func @transform_13(%arg0: i32) -> (i32, i32) {
    %c0_i32 = arith.constant 0 : i32
    %c0_i32_0 = arith.constant 0 : i32
    %c0_i32_1 = arith.constant 0 : i32
    return %c0_i32, %c0_i32_0 : i32, i32
  }
  func.func @transform_14(%arg0: i32) -> (i32, i32) {
    %c0_i32 = arith.constant 0 : i32
    %c0_i32_0 = arith.constant 0 : i32
    %c0_i32_1 = arith.constant 0 : i32
    return %c0_i32, %c0_i32_0 : i32, i32
  }
  func.func @transform_15(%arg0: i32) -> (i32, i32, i32) {
    %c0_i32 = arith.constant 0 : i32
    %c0_i32_0 = arith.constant 0 : i32
    %c0_i32_1 = arith.constant 0 : i32
    return %arg0, %c0_i32, %c0_i32_0 : i32, i32, i32
  }
}

module attributes {stable_mosaic.version = 11 : i64} {
  func.func @encoder_layer_kernel(%arg0: i32, %arg1: memref<2x8x32xbf16, #tpu.memory_space<vmem>>, %arg2: memref<32x96xbf16, #tpu.memory_space<vmem>>, %arg3: memref<1x96xf32, #tpu.memory_space<vmem>>, %arg4: memref<32x32xbf16, #tpu.memory_space<vmem>>, %arg5: memref<1x32xf32, #tpu.memory_space<vmem>>, %arg6: memref<1x32xf32, #tpu.memory_space<vmem>>, %arg7: memref<1x32xf32, #tpu.memory_space<vmem>>, %arg8: memref<32x2048xbf16, #tpu.memory_space<vmem>>, %arg9: memref<1x2048xf32, #tpu.memory_space<vmem>>, %arg10: memref<2048x32xbf16, #tpu.memory_space<vmem>>, %arg11: memref<1x32xf32, #tpu.memory_space<vmem>>, %arg12: memref<1x32xf32, #tpu.memory_space<vmem>>, %arg13: memref<1x32xf32, #tpu.memory_space<vmem>>, %arg14: memref<2x8x32xbf16, #tpu.memory_space<vmem>>) attributes {dimension_semantics = [#tpu.dimension_semantics<parallel>], iteration_bounds = array<i64: 2>, scalar_prefetch = 0 : i64, scratch_operands = 0 : i64, tpu.core_type = #tpu.core_type<tc>, window_params = [{transform_indices = @transform_0, window_bounds = array<i64: 2, 8, 32>}, {pipeline_mode = #tpu.pipeline_mode<synchronous>, transform_indices = @transform_1, window_bounds = array<i64: 32, 96>}, {pipeline_mode = #tpu.pipeline_mode<synchronous>, transform_indices = @transform_2, window_bounds = array<i64: 1, 96>}, {pipeline_mode = #tpu.pipeline_mode<synchronous>, transform_indices = @transform_3, window_bounds = array<i64: 32, 32>}, {pipeline_mode = #tpu.pipeline_mode<synchronous>, transform_indices = @transform_4, window_bounds = array<i64: 1, 32>}, {pipeline_mode = #tpu.pipeline_mode<synchronous>, transform_indices = @transform_5, window_bounds = array<i64: 1, 32>}, {pipeline_mode = #tpu.pipeline_mode<synchronous>, transform_indices = @transform_6, window_bounds = array<i64: 1, 32>}, {pipeline_mode = #tpu.pipeline_mode<synchronous>, transform_indices = @transform_7, window_bounds = array<i64: 32, 2048>}, {pipeline_mode = #tpu.pipeline_mode<synchronous>, transform_indices = @transform_8, window_bounds = array<i64: 1, 2048>}, {pipeline_mode = #tpu.pipeline_mode<synchronous>, transform_indices = @transform_9, window_bounds = array<i64: 2048, 32>}, {pipeline_mode = #tpu.pipeline_mode<synchronous>, transform_indices = @transform_10, window_bounds = array<i64: 1, 32>}, {pipeline_mode = #tpu.pipeline_mode<synchronous>, transform_indices = @transform_11, window_bounds = array<i64: 1, 32>}, {pipeline_mode = #tpu.pipeline_mode<synchronous>, transform_indices = @transform_12, window_bounds = array<i64: 1, 32>}, {transform_indices = @transform_13, window_bounds = array<i64: 2, 8, 32>}]} {
    %c0 = arith.constant 0 : index
    %c0_0 = arith.constant 0 : index
    %c0_1 = arith.constant 0 : index
    %0 = vector.load %arg1[%c0, %c0_0, %c0_1] : memref<2x8x32xbf16, #tpu.memory_space<vmem>>, vector<2x8x32xbf16>
    %1 = arith.extf %0 : vector<2x8x32xbf16> to vector<2x8x32xf32>
    %2 = vector.shape_cast %1 : vector<2x8x32xf32> to vector<16x32xf32>
    %3 = arith.truncf %2 : vector<16x32xf32> to vector<16x32xbf16>
    %c0_2 = arith.constant 0 : index
    %c0_3 = arith.constant 0 : index
    %4 = vector.load %arg2[%c0_2, %c0_3] : memref<32x96xbf16, #tpu.memory_space<vmem>>, vector<32x96xbf16>
    %cst = arith.constant dense<0.000000e+00> : vector<16x96xf32>
    %5 = tpu.matmul %3, %4, %cst {dimension_numbers = #tpu.dot_dimension_numbers<[1], [0], [0], [1], [0, 0, 1, 1], [], []>} : vector<16x32xbf16>, vector<32x96xbf16>, vector<16x96xf32> -> vector<16x96xf32>
    %c0_4 = arith.constant 0 : index
    %c0_5 = arith.constant 0 : index
    %6 = vector.load %arg3[%c0_4, %c0_5] : memref<1x96xf32, #tpu.memory_space<vmem>>, vector<1x96xf32>
    %7 = vector.broadcast %6 : vector<1x96xf32> to vector<16x96xf32>
    %8 = arith.addf %5, %7 : vector<16x96xf32>
    %9 = vector.extract_strided_slice %8 {offsets = [0, 0], sizes = [16, 8], strides = [1, 1]} : vector<16x96xf32> to vector<16x8xf32>
    %cst_6 = arith.constant 0.353553385 : f32
    %10 = vector.broadcast %cst_6 : f32 to vector<16x8xf32>
    %11 = arith.mulf %9, %10 : vector<16x8xf32>
    %12 = arith.truncf %11 : vector<16x8xf32> to vector<16x8xbf16>
    %13 = vector.shape_cast %12 : vector<16x8xbf16> to vector<2x8x8xbf16>
    %14 = vector.extract_strided_slice %8 {offsets = [0, 32], sizes = [16, 8], strides = [1, 1]} : vector<16x96xf32> to vector<16x8xf32>
    %15 = arith.truncf %14 : vector<16x8xf32> to vector<16x8xbf16>
    %16 = vector.shape_cast %15 : vector<16x8xbf16> to vector<2x8x8xbf16>
    %17 = vector.extract_strided_slice %8 {offsets = [0, 64], sizes = [16, 8], strides = [1, 1]} : vector<16x96xf32> to vector<16x8xf32>
    %18 = arith.truncf %17 : vector<16x8xf32> to vector<16x8xbf16>
    %19 = vector.shape_cast %18 : vector<16x8xbf16> to vector<2x8x8xbf16>
    %cst_7 = arith.constant dense<0.000000e+00> : vector<2x8x8xf32>
    %20 = tpu.matmul %13, %16, %cst_7 {dimension_numbers = #tpu.dot_dimension_numbers<[2], [2], [1], [1], [0, 0, 0, 1, 1, 1], [0], [0]>} : vector<2x8x8xbf16>, vector<2x8x8xbf16>, vector<2x8x8xf32> -> vector<2x8x8xf32>
    %cst_8 = arith.constant dense<0xFF800000> : vector<2x8xf32>
    %21 = vector.multi_reduction <maximumf>, %20, %cst_8 [2] : vector<2x8x8xf32> to vector<2x8xf32>
    %22 = vector.shape_cast %21 : vector<2x8xf32> to vector<2x8x1xf32>
    %23 = vector.broadcast %22 : vector<2x8x1xf32> to vector<2x8x8xf32>
    %24 = arith.subf %20, %23 : vector<2x8x8xf32>
    %25 = math.exp %24 : vector<2x8x8xf32>
    %cst_9 = arith.constant dense<0.000000e+00> : vector<2x8xf32>
    %26 = vector.multi_reduction <add>, %25, %cst_9 [2] : vector<2x8x8xf32> to vector<2x8xf32>
    %27 = vector.shape_cast %26 : vector<2x8xf32> to vector<2x8x1xf32>
    %28 = tpu.reciprocal %27 {approx = true} : vector<2x8x1xf32> -> vector<2x8x1xf32>
    %29 = vector.broadcast %28 : vector<2x8x1xf32> to vector<2x8x8xf32>
    %30 = arith.mulf %25, %29 : vector<2x8x8xf32>
    %31 = arith.truncf %30 : vector<2x8x8xf32> to vector<2x8x8xbf16>
    %cst_10 = arith.constant dense<0.000000e+00> : vector<2x8x8xf32>
    %32 = tpu.matmul %31, %19, %cst_10 {dimension_numbers = #tpu.dot_dimension_numbers<[2], [1], [1], [2], [0, 0, 0, 1, 1, 2], [0], [0]>} : vector<2x8x8xbf16>, vector<2x8x8xbf16>, vector<2x8x8xf32> -> vector<2x8x8xf32>
    %33 = vector.shape_cast %32 : vector<2x8x8xf32> to vector<16x8xf32>
    %34 = vector.extract_strided_slice %8 {offsets = [0, 8], sizes = [16, 8], strides = [1, 1]} : vector<16x96xf32> to vector<16x8xf32>
    %cst_11 = arith.constant 0.353553385 : f32
    %35 = vector.broadcast %cst_11 : f32 to vector<16x8xf32>
    %36 = arith.mulf %34, %35 : vector<16x8xf32>
    %37 = arith.truncf %36 : vector<16x8xf32> to vector<16x8xbf16>
    %38 = vector.shape_cast %37 : vector<16x8xbf16> to vector<2x8x8xbf16>
    %39 = vector.extract_strided_slice %8 {offsets = [0, 40], sizes = [16, 8], strides = [1, 1]} : vector<16x96xf32> to vector<16x8xf32>
    %40 = arith.truncf %39 : vector<16x8xf32> to vector<16x8xbf16>
    %41 = vector.shape_cast %40 : vector<16x8xbf16> to vector<2x8x8xbf16>
    %42 = vector.extract_strided_slice %8 {offsets = [0, 72], sizes = [16, 8], strides = [1, 1]} : vector<16x96xf32> to vector<16x8xf32>
    %43 = arith.truncf %42 : vector<16x8xf32> to vector<16x8xbf16>
    %44 = vector.shape_cast %43 : vector<16x8xbf16> to vector<2x8x8xbf16>
    %cst_12 = arith.constant dense<0.000000e+00> : vector<2x8x8xf32>
    %45 = tpu.matmul %38, %41, %cst_12 {dimension_numbers = #tpu.dot_dimension_numbers<[2], [2], [1], [1], [0, 0, 0, 1, 1, 1], [0], [0]>} : vector<2x8x8xbf16>, vector<2x8x8xbf16>, vector<2x8x8xf32> -> vector<2x8x8xf32>
    %cst_13 = arith.constant dense<0xFF800000> : vector<2x8xf32>
    %46 = vector.multi_reduction <maximumf>, %45, %cst_13 [2] : vector<2x8x8xf32> to vector<2x8xf32>
    %47 = vector.shape_cast %46 : vector<2x8xf32> to vector<2x8x1xf32>
    %48 = vector.broadcast %47 : vector<2x8x1xf32> to vector<2x8x8xf32>
    %49 = arith.subf %45, %48 : vector<2x8x8xf32>
    %50 = math.exp %49 : vector<2x8x8xf32>
    %cst_14 = arith.constant dense<0.000000e+00> : vector<2x8xf32>
    %51 = vector.multi_reduction <add>, %50, %cst_14 [2] : vector<2x8x8xf32> to vector<2x8xf32>
    %52 = vector.shape_cast %51 : vector<2x8xf32> to vector<2x8x1xf32>
    %53 = tpu.reciprocal %52 {approx = true} : vector<2x8x1xf32> -> vector<2x8x1xf32>
    %54 = vector.broadcast %53 : vector<2x8x1xf32> to vector<2x8x8xf32>
    %55 = arith.mulf %50, %54 : vector<2x8x8xf32>
    %56 = arith.truncf %55 : vector<2x8x8xf32> to vector<2x8x8xbf16>
    %cst_15 = arith.constant dense<0.000000e+00> : vector<2x8x8xf32>
    %57 = tpu.matmul %56, %44, %cst_15 {dimension_numbers = #tpu.dot_dimension_numbers<[2], [1], [1], [2], [0, 0, 0, 1, 1, 2], [0], [0]>} : vector<2x8x8xbf16>, vector<2x8x8xbf16>, vector<2x8x8xf32> -> vector<2x8x8xf32>
    %58 = vector.shape_cast %57 : vector<2x8x8xf32> to vector<16x8xf32>
    %59 = vector.extract_strided_slice %8 {offsets = [0, 16], sizes = [16, 8], strides = [1, 1]} : vector<16x96xf32> to vector<16x8xf32>
    %cst_16 = arith.constant 0.353553385 : f32
    %60 = vector.broadcast %cst_16 : f32 to vector<16x8xf32>
    %61 = arith.mulf %59, %60 : vector<16x8xf32>
    %62 = arith.truncf %61 : vector<16x8xf32> to vector<16x8xbf16>
    %63 = vector.shape_cast %62 : vector<16x8xbf16> to vector<2x8x8xbf16>
    %64 = vector.extract_strided_slice %8 {offsets = [0, 48], sizes = [16, 8], strides = [1, 1]} : vector<16x96xf32> to vector<16x8xf32>
    %65 = arith.truncf %64 : vector<16x8xf32> to vector<16x8xbf16>
    %66 = vector.shape_cast %65 : vector<16x8xbf16> to vector<2x8x8xbf16>
    %67 = vector.extract_strided_slice %8 {offsets = [0, 80], sizes = [16, 8], strides = [1, 1]} : vector<16x96xf32> to vector<16x8xf32>
    %68 = arith.truncf %67 : vector<16x8xf32> to vector<16x8xbf16>
    %69 = vector.shape_cast %68 : vector<16x8xbf16> to vector<2x8x8xbf16>
    %cst_17 = arith.constant dense<0.000000e+00> : vector<2x8x8xf32>
    %70 = tpu.matmul %63, %66, %cst_17 {dimension_numbers = #tpu.dot_dimension_numbers<[2], [2], [1], [1], [0, 0, 0, 1, 1, 1], [0], [0]>} : vector<2x8x8xbf16>, vector<2x8x8xbf16>, vector<2x8x8xf32> -> vector<2x8x8xf32>
    %cst_18 = arith.constant dense<0xFF800000> : vector<2x8xf32>
    %71 = vector.multi_reduction <maximumf>, %70, %cst_18 [2] : vector<2x8x8xf32> to vector<2x8xf32>
    %72 = vector.shape_cast %71 : vector<2x8xf32> to vector<2x8x1xf32>
    %73 = vector.broadcast %72 : vector<2x8x1xf32> to vector<2x8x8xf32>
    %74 = arith.subf %70, %73 : vector<2x8x8xf32>
    %75 = math.exp %74 : vector<2x8x8xf32>
    %cst_19 = arith.constant dense<0.000000e+00> : vector<2x8xf32>
    %76 = vector.multi_reduction <add>, %75, %cst_19 [2] : vector<2x8x8xf32> to vector<2x8xf32>
    %77 = vector.shape_cast %76 : vector<2x8xf32> to vector<2x8x1xf32>
    %78 = tpu.reciprocal %77 {approx = true} : vector<2x8x1xf32> -> vector<2x8x1xf32>
    %79 = vector.broadcast %78 : vector<2x8x1xf32> to vector<2x8x8xf32>
    %80 = arith.mulf %75, %79 : vector<2x8x8xf32>
    %81 = arith.truncf %80 : vector<2x8x8xf32> to vector<2x8x8xbf16>
    %cst_20 = arith.constant dense<0.000000e+00> : vector<2x8x8xf32>
    %82 = tpu.matmul %81, %69, %cst_20 {dimension_numbers = #tpu.dot_dimension_numbers<[2], [1], [1], [2], [0, 0, 0, 1, 1, 2], [0], [0]>} : vector<2x8x8xbf16>, vector<2x8x8xbf16>, vector<2x8x8xf32> -> vector<2x8x8xf32>
    %83 = vector.shape_cast %82 : vector<2x8x8xf32> to vector<16x8xf32>
    %84 = vector.extract_strided_slice %8 {offsets = [0, 24], sizes = [16, 8], strides = [1, 1]} : vector<16x96xf32> to vector<16x8xf32>
    %cst_21 = arith.constant 0.353553385 : f32
    %85 = vector.broadcast %cst_21 : f32 to vector<16x8xf32>
    %86 = arith.mulf %84, %85 : vector<16x8xf32>
    %87 = arith.truncf %86 : vector<16x8xf32> to vector<16x8xbf16>
    %88 = vector.shape_cast %87 : vector<16x8xbf16> to vector<2x8x8xbf16>
    %89 = vector.extract_strided_slice %8 {offsets = [0, 56], sizes = [16, 8], strides = [1, 1]} : vector<16x96xf32> to vector<16x8xf32>
    %90 = arith.truncf %89 : vector<16x8xf32> to vector<16x8xbf16>
    %91 = vector.shape_cast %90 : vector<16x8xbf16> to vector<2x8x8xbf16>
    %92 = vector.extract_strided_slice %8 {offsets = [0, 88], sizes = [16, 8], strides = [1, 1]} : vector<16x96xf32> to vector<16x8xf32>
    %93 = arith.truncf %92 : vector<16x8xf32> to vector<16x8xbf16>
    %94 = vector.shape_cast %93 : vector<16x8xbf16> to vector<2x8x8xbf16>
    %cst_22 = arith.constant dense<0.000000e+00> : vector<2x8x8xf32>
    %95 = tpu.matmul %88, %91, %cst_22 {dimension_numbers = #tpu.dot_dimension_numbers<[2], [2], [1], [1], [0, 0, 0, 1, 1, 1], [0], [0]>} : vector<2x8x8xbf16>, vector<2x8x8xbf16>, vector<2x8x8xf32> -> vector<2x8x8xf32>
    %cst_23 = arith.constant dense<0xFF800000> : vector<2x8xf32>
    %96 = vector.multi_reduction <maximumf>, %95, %cst_23 [2] : vector<2x8x8xf32> to vector<2x8xf32>
    %97 = vector.shape_cast %96 : vector<2x8xf32> to vector<2x8x1xf32>
    %98 = vector.broadcast %97 : vector<2x8x1xf32> to vector<2x8x8xf32>
    %99 = arith.subf %95, %98 : vector<2x8x8xf32>
    %100 = math.exp %99 : vector<2x8x8xf32>
    %cst_24 = arith.constant dense<0.000000e+00> : vector<2x8xf32>
    %101 = vector.multi_reduction <add>, %100, %cst_24 [2] : vector<2x8x8xf32> to vector<2x8xf32>
    %102 = vector.shape_cast %101 : vector<2x8xf32> to vector<2x8x1xf32>
    %103 = tpu.reciprocal %102 {approx = true} : vector<2x8x1xf32> -> vector<2x8x1xf32>
    %104 = vector.broadcast %103 : vector<2x8x1xf32> to vector<2x8x8xf32>
    %105 = arith.mulf %100, %104 : vector<2x8x8xf32>
    %106 = arith.truncf %105 : vector<2x8x8xf32> to vector<2x8x8xbf16>
    %cst_25 = arith.constant dense<0.000000e+00> : vector<2x8x8xf32>
    %107 = tpu.matmul %106, %94, %cst_25 {dimension_numbers = #tpu.dot_dimension_numbers<[2], [1], [1], [2], [0, 0, 0, 1, 1, 2], [0], [0]>} : vector<2x8x8xbf16>, vector<2x8x8xbf16>, vector<2x8x8xf32> -> vector<2x8x8xf32>
    %108 = vector.shape_cast %107 : vector<2x8x8xf32> to vector<16x8xf32>
    %109 = tpu.concatenate %33, %58, %83, %108 in 1 : vector<16x8xf32>, vector<16x8xf32>, vector<16x8xf32>, vector<16x8xf32> -> vector<16x32xf32>
    %110 = arith.truncf %109 : vector<16x32xf32> to vector<16x32xbf16>
    %c0_26 = arith.constant 0 : index
    %c0_27 = arith.constant 0 : index
    %111 = vector.load %arg4[%c0_26, %c0_27] : memref<32x32xbf16, #tpu.memory_space<vmem>>, vector<32x32xbf16>
    %cst_28 = arith.constant dense<0.000000e+00> : vector<16x32xf32>
    %112 = tpu.matmul %110, %111, %cst_28 {dimension_numbers = #tpu.dot_dimension_numbers<[1], [0], [0], [1], [0, 0, 1, 1], [], []>} : vector<16x32xbf16>, vector<32x32xbf16>, vector<16x32xf32> -> vector<16x32xf32>
    %c0_29 = arith.constant 0 : index
    %c0_30 = arith.constant 0 : index
    %113 = vector.load %arg5[%c0_29, %c0_30] : memref<1x32xf32, #tpu.memory_space<vmem>>, vector<1x32xf32>
    %114 = vector.broadcast %113 : vector<1x32xf32> to vector<16x32xf32>
    %115 = arith.addf %112, %114 : vector<16x32xf32>
    %116 = arith.addf %2, %115 : vector<16x32xf32>
    %c0_31 = arith.constant 0 : index
    %c0_32 = arith.constant 0 : index
    %117 = vector.load %arg6[%c0_31, %c0_32] : memref<1x32xf32, #tpu.memory_space<vmem>>, vector<1x32xf32>
    %c0_33 = arith.constant 0 : index
    %c0_34 = arith.constant 0 : index
    %118 = vector.load %arg7[%c0_33, %c0_34] : memref<1x32xf32, #tpu.memory_space<vmem>>, vector<1x32xf32>
    %cst_35 = arith.constant dense<0.000000e+00> : vector<16xf32>
    %119 = vector.multi_reduction <add>, %116, %cst_35 [1] : vector<16x32xf32> to vector<16xf32>
    %120 = vector.shape_cast %119 : vector<16xf32> to vector<16x1xf32>
    %cst_36 = arith.constant 3.200000e+01 : f32
    %121 = vector.broadcast %cst_36 : f32 to vector<16x1xf32>
    %122 = arith.divf %120, %121 : vector<16x1xf32>
    %123 = vector.broadcast %122 : vector<16x1xf32> to vector<16x32xf32>
    %124 = arith.subf %116, %123 : vector<16x32xf32>
    %125 = arith.mulf %124, %124 : vector<16x32xf32>
    %cst_37 = arith.constant dense<0.000000e+00> : vector<16xf32>
    %126 = vector.multi_reduction <add>, %125, %cst_37 [1] : vector<16x32xf32> to vector<16xf32>
    %127 = vector.shape_cast %126 : vector<16xf32> to vector<16x1xf32>
    %cst_38 = arith.constant 3.200000e+01 : f32
    %128 = vector.broadcast %cst_38 : f32 to vector<16x1xf32>
    %129 = arith.divf %127, %128 : vector<16x1xf32>
    %130 = vector.broadcast %122 : vector<16x1xf32> to vector<16x32xf32>
    %131 = arith.subf %116, %130 : vector<16x32xf32>
    %cst_39 = arith.constant 9.99999974E-6 : f32
    %132 = vector.broadcast %cst_39 : f32 to vector<16x1xf32>
    %133 = arith.addf %129, %132 : vector<16x1xf32>
    %134 = math.rsqrt %133 : vector<16x1xf32>
    %135 = vector.broadcast %134 : vector<16x1xf32> to vector<16x32xf32>
    %136 = arith.mulf %131, %135 : vector<16x32xf32>
    %137 = vector.broadcast %117 : vector<1x32xf32> to vector<16x32xf32>
    %138 = arith.mulf %136, %137 : vector<16x32xf32>
    %139 = vector.broadcast %118 : vector<1x32xf32> to vector<16x32xf32>
    %140 = arith.addf %138, %139 : vector<16x32xf32>
    %141 = arith.truncf %140 : vector<16x32xf32> to vector<16x32xbf16>
    %c0_40 = arith.constant 0 : index
    %c0_41 = arith.constant 0 : index
    %142 = vector.load %arg8[%c0_40, %c0_41] : memref<32x2048xbf16, #tpu.memory_space<vmem>>, vector<32x2048xbf16>
    %cst_42 = arith.constant dense<0.000000e+00> : vector<16x2048xf32>
    %143 = tpu.matmul %141, %142, %cst_42 {dimension_numbers = #tpu.dot_dimension_numbers<[1], [0], [0], [1], [0, 0, 1, 1], [], []>} : vector<16x32xbf16>, vector<32x2048xbf16>, vector<16x2048xf32> -> vector<16x2048xf32>
    %c0_43 = arith.constant 0 : index
    %c0_44 = arith.constant 0 : index
    %144 = vector.load %arg9[%c0_43, %c0_44] : memref<1x2048xf32, #tpu.memory_space<vmem>>, vector<1x2048xf32>
    %145 = vector.broadcast %144 : vector<1x2048xf32> to vector<16x2048xf32>
    %146 = arith.addf %143, %145 : vector<16x2048xf32>
    %cst_45 = arith.constant 0.000000e+00 : f32
    %147 = vector.broadcast %cst_45 : f32 to vector<16x2048xf32>
    %148 = arith.maximumf %146, %147 : vector<16x2048xf32>
    %149 = arith.truncf %148 : vector<16x2048xf32> to vector<16x2048xbf16>
    %c0_46 = arith.constant 0 : index
    %c0_47 = arith.constant 0 : index
    %150 = vector.load %arg10[%c0_46, %c0_47] : memref<2048x32xbf16, #tpu.memory_space<vmem>>, vector<2048x32xbf16>
    %cst_48 = arith.constant dense<0.000000e+00> : vector<16x32xf32>
    %151 = tpu.matmul %149, %150, %cst_48 {dimension_numbers = #tpu.dot_dimension_numbers<[1], [0], [0], [1], [0, 0, 1, 1], [], []>} : vector<16x2048xbf16>, vector<2048x32xbf16>, vector<16x32xf32> -> vector<16x32xf32>
    %c0_49 = arith.constant 0 : index
    %c0_50 = arith.constant 0 : index
    %152 = vector.load %arg11[%c0_49, %c0_50] : memref<1x32xf32, #tpu.memory_space<vmem>>, vector<1x32xf32>
    %153 = vector.broadcast %152 : vector<1x32xf32> to vector<16x32xf32>
    %154 = arith.addf %151, %153 : vector<16x32xf32>
    %155 = arith.addf %140, %154 : vector<16x32xf32>
    %c0_51 = arith.constant 0 : index
    %c0_52 = arith.constant 0 : index
    %156 = vector.load %arg12[%c0_51, %c0_52] : memref<1x32xf32, #tpu.memory_space<vmem>>, vector<1x32xf32>
    %c0_53 = arith.constant 0 : index
    %c0_54 = arith.constant 0 : index
    %157 = vector.load %arg13[%c0_53, %c0_54] : memref<1x32xf32, #tpu.memory_space<vmem>>, vector<1x32xf32>
    %cst_55 = arith.constant dense<0.000000e+00> : vector<16xf32>
    %158 = vector.multi_reduction <add>, %155, %cst_55 [1] : vector<16x32xf32> to vector<16xf32>
    %159 = vector.shape_cast %158 : vector<16xf32> to vector<16x1xf32>
    %cst_56 = arith.constant 3.200000e+01 : f32
    %160 = vector.broadcast %cst_56 : f32 to vector<16x1xf32>
    %161 = arith.divf %159, %160 : vector<16x1xf32>
    %162 = vector.broadcast %161 : vector<16x1xf32> to vector<16x32xf32>
    %163 = arith.subf %155, %162 : vector<16x32xf32>
    %164 = arith.mulf %163, %163 : vector<16x32xf32>
    %cst_57 = arith.constant dense<0.000000e+00> : vector<16xf32>
    %165 = vector.multi_reduction <add>, %164, %cst_57 [1] : vector<16x32xf32> to vector<16xf32>
    %166 = vector.shape_cast %165 : vector<16xf32> to vector<16x1xf32>
    %cst_58 = arith.constant 3.200000e+01 : f32
    %167 = vector.broadcast %cst_58 : f32 to vector<16x1xf32>
    %168 = arith.divf %166, %167 : vector<16x1xf32>
    %169 = vector.broadcast %161 : vector<16x1xf32> to vector<16x32xf32>
    %170 = arith.subf %155, %169 : vector<16x32xf32>
    %cst_59 = arith.constant 9.99999974E-6 : f32
    %171 = vector.broadcast %cst_59 : f32 to vector<16x1xf32>
    %172 = arith.addf %168, %171 : vector<16x1xf32>
    %173 = math.rsqrt %172 : vector<16x1xf32>
    %174 = vector.broadcast %173 : vector<16x1xf32> to vector<16x32xf32>
    %175 = arith.mulf %170, %174 : vector<16x32xf32>
    %176 = vector.broadcast %156 : vector<1x32xf32> to vector<16x32xf32>
    %177 = arith.mulf %175, %176 : vector<16x32xf32>
    %178 = vector.broadcast %157 : vector<1x32xf32> to vector<16x32xf32>
    %179 = arith.addf %177, %178 : vector<16x32xf32>
    %180 = vector.shape_cast %179 : vector<16x32xf32> to vector<2x8x32xf32>
    %181 = arith.truncf %180 : vector<2x8x32xf32> to vector<2x8x32xbf16>
    %c0_60 = arith.constant 0 : index
    %c0_61 = arith.constant 0 : index
    %c0_62 = arith.constant 0 : index
    %182 = vector.load %arg14[%c0_60, %c0_61, %c0_62] : memref<2x8x32xbf16, #tpu.memory_space<vmem>>, vector<2x8x32xbf16>
    tpu.vector_store %arg14[%c0_60, %c0_61, %c0_62], %181 {strides = array<i32>} : memref<2x8x32xbf16, #tpu.memory_space<vmem>>, vector<2x8x32xbf16>,
    return
  }
  func.func @transform_0(%arg0: i32) -> (i32, i32, i32) {
    %c0_i32 = arith.constant 0 : i32
    %c0_i32_0 = arith.constant 0 : i32
    %c0_i32_1 = arith.constant 0 : i32
    return %arg0, %c0_i32, %c0_i32_0 : i32, i32, i32
  }
  func.func @transform_1(%arg0: i32) -> (i32, i32) {
    %c0_i32 = arith.constant 0 : i32
    %c0_i32_0 = arith.constant 0 : i32
    %c0_i32_1 = arith.constant 0 : i32
    return %c0_i32, %c0_i32_0 : i32, i32
  }
  func.func @transform_2(%arg0: i32) -> (i32, i32) {
    %c0_i32 = arith.constant 0 : i32
    %c0_i32_0 = arith.constant 0 : i32
    %c0_i32_1 = arith.constant 0 : i32
    return %c0_i32, %c0_i32_0 : i32, i32
  }
  func.func @transform_3(%arg0: i32) -> (i32, i32) {
    %c0_i32 = arith.constant 0 : i32
    %c0_i32_0 = arith.constant 0 : i32
    %c0_i32_1 = arith.constant 0 : i32
    return %c0_i32, %c0_i32_0 : i32, i32
  }
  func.func @transform_4(%arg0: i32) -> (i32, i32) {
    %c0_i32 = arith.constant 0 : i32
    %c0_i32_0 = arith.constant 0 : i32
    %c0_i32_1 = arith.constant 0 : i32
    return %c0_i32, %c0_i32_0 : i32, i32
  }
  func.func @transform_5(%arg0: i32) -> (i32, i32) {
    %c0_i32 = arith.constant 0 : i32
    %c0_i32_0 = arith.constant 0 : i32
    %c0_i32_1 = arith.constant 0 : i32
    return %c0_i32, %c0_i32_0 : i32, i32
  }
  func.func @transform_6(%arg0: i32) -> (i32, i32) {
    %c0_i32 = arith.constant 0 : i32
    %c0_i32_0 = arith.constant 0 : i32
    %c0_i32_1 = arith.constant 0 : i32
    return %c0_i32, %c0_i32_0 : i32, i32
  }
  func.func @transform_7(%arg0: i32) -> (i32, i32) {
    %c0_i32 = arith.constant 0 : i32
    %c0_i32_0 = arith.constant 0 : i32
    %c0_i32_1 = arith.constant 0 : i32
    return %c0_i32, %c0_i32_0 : i32, i32
  }
  func.func @transform_8(%arg0: i32) -> (i32, i32) {
    %c0_i32 = arith.constant 0 : i32
    %c0_i32_0 = arith.constant 0 : i32
    %c0_i32_1 = arith.constant 0 : i32
    return %c0_i32, %c0_i32_0 : i32, i32
  }
  func.func @transform_9(%arg0: i32) -> (i32, i32) {
    %c0_i32 = arith.constant 0 : i32
    %c0_i32_0 = arith.constant 0 : i32
    %c0_i32_1 = arith.constant 0 : i32
    return %c0_i32, %c0_i32_0 : i32, i32
  }
  func.func @transform_10(%arg0: i32) -> (i32, i32) {
    %c0_i32 = arith.constant 0 : i32
    %c0_i32_0 = arith.constant 0 : i32
    %c0_i32_1 = arith.constant 0 : i32
    return %c0_i32, %c0_i32_0 : i32, i32
  }
  func.func @transform_11(%arg0: i32) -> (i32, i32) {
    %c0_i32 = arith.constant 0 : i32
    %c0_i32_0 = arith.constant 0 : i32
    %c0_i32_1 = arith.constant 0 : i32
    return %c0_i32, %c0_i32_0 : i32, i32
  }
  func.func @transform_12(%arg0: i32) -> (i32, i32) {
    %c0_i32 = arith.constant 0 : i32
    %c0_i32_0 = arith.constant 0 : i32
    %c0_i32_1 = arith.constant 0 : i32
    return %c0_i32, %c0_i32_0 : i32, i32
  }
  func.func @transform_13(%arg0: i32) -> (i32, i32, i32) {
    %c0_i32 = arith.constant 0 : i32
    %c0_i32_0 = arith.constant 0 : i32
    %c0_i32_1 = arith.constant 0 : i32
    return %arg0, %c0_i32, %c0_i32_0 : i32, i32, i32
  }
}

module attributes {stable_mosaic.version = 11 : i64} {
  func.func @head_fc_kernel(%arg0: i32, %arg1: memref<128x128xbf16, #tpu.memory_space<vmem>>, %arg2: memref<16x128xbf16, #tpu.memory_space<vmem>>, %arg3: memref<16x1xf32, #tpu.memory_space<vmem>>, %arg4: memref<16x128xf32, #tpu.memory_space<vmem>>) attributes {dimension_semantics = [#tpu.dimension_semantics<parallel>], iteration_bounds = array<i64: 1>, scalar_prefetch = 0 : i64, scratch_operands = 0 : i64, tpu.core_type = #tpu.core_type<tc>, window_params = [{transform_indices = @transform_0, window_bounds = array<i64: 128, 128>}, {pipeline_mode = #tpu.pipeline_mode<synchronous>, transform_indices = @transform_1, window_bounds = array<i64: 16, 128>}, {pipeline_mode = #tpu.pipeline_mode<synchronous>, transform_indices = @transform_2, window_bounds = array<i64: 16, 1>}, {transform_indices = @transform_3, window_bounds = array<i64: 16, 128>}]} {
    %c0 = arith.constant 0 : index
    %c0_0 = arith.constant 0 : index
    %0 = vector.load %arg2[%c0, %c0_0] : memref<16x128xbf16, #tpu.memory_space<vmem>>, vector<16x128xbf16>
    %c0_1 = arith.constant 0 : index
    %c0_2 = arith.constant 0 : index
    %1 = vector.load %arg1[%c0_1, %c0_2] : memref<128x128xbf16, #tpu.memory_space<vmem>>, vector<128x128xbf16>
    %cst = arith.constant dense<0.000000e+00> : vector<16x128xf32>
    %2 = tpu.matmul %0, %1, %cst {dimension_numbers = #tpu.dot_dimension_numbers<[1], [0], [0], [1], [0, 0, 1, 1], [], []>} : vector<16x128xbf16>, vector<128x128xbf16>, vector<16x128xf32> -> vector<16x128xf32>
    %c0_3 = arith.constant 0 : index
    %c0_4 = arith.constant 0 : index
    %3 = vector.load %arg3[%c0_3, %c0_4] : memref<16x1xf32, #tpu.memory_space<vmem>>, vector<16x1xf32>
    %4 = vector.broadcast %3 : vector<16x1xf32> to vector<16x128xf32>
    %5 = arith.addf %2, %4 : vector<16x128xf32>
    %c0_5 = arith.constant 0 : index
    %c0_6 = arith.constant 0 : index
    %6 = vector.load %arg4[%c0_5, %c0_6] : memref<16x128xf32, #tpu.memory_space<vmem>>, vector<16x128xf32>
    tpu.vector_store %arg4[%c0_5, %c0_6], %5 {strides = array<i32>} : memref<16x128xf32, #tpu.memory_space<vmem>>, vector<16x128xf32>,
    return
  }
  func.func @transform_0(%arg0: i32) -> (i32, i32) {
    %c0_i32 = arith.constant 0 : i32
    %c0_i32_0 = arith.constant 0 : i32
    return %c0_i32, %arg0 : i32, i32
  }
  func.func @transform_1(%arg0: i32) -> (i32, i32) {
    %c0_i32 = arith.constant 0 : i32
    %c0_i32_0 = arith.constant 0 : i32
    %c0_i32_1 = arith.constant 0 : i32
    return %c0_i32, %c0_i32_0 : i32, i32
  }
  func.func @transform_2(%arg0: i32) -> (i32, i32) {
    %c0_i32 = arith.constant 0 : i32
    %c0_i32_0 = arith.constant 0 : i32
    %c0_i32_1 = arith.constant 0 : i32
    return %c0_i32, %c0_i32_0 : i32, i32
  }
  func.func @transform_3(%arg0: i32) -> (i32, i32) {
    %c0_i32 = arith.constant 0 : i32
    %c0_i32_0 = arith.constant 0 : i32
    return %c0_i32, %arg0 : i32, i32
  }
}

</mosaic_0001>

<bundles_post_ra>
// kernel: patchtst_forward.5
= control target key start
LH: loop header
LB: loop body
LE: loop exit
PB: predicated region body
PF: predicated region fallthrough
CT: control target
= control target key end

     0   :  { %v197_v0 = vmov 0.0   ;;  %vm198_vm0 = vmmov 0   ;;  %v199_v2 = vmov 0   ;;  %s259_s0 = inlined_call_operand.vmem [shape: bf16[128,128], index: 0, kind: input, shape index: {}]   ;;  %s260_s2 = inlined_call_operand.vmem [shape: f32[16,1], index: 2, kind: input, shape index: {}]   ;;  %s261_s1 = inlined_call_operand.vmem [shape: bf16[16,128], index: 1, kind: input, shape index: {}]   ;;  %s262_s3 = inlined_call_operand.vmem [shape: f32[16,128], index: 3, kind: output, shape index: {}]  }
   0x1   :  { %164 = vmatprep.subr.bf16.mxu0 %v197_v0  ;;  %v188_v1 = vld [vmem:[%s259_s0] sm:$0xff]   ;;  %180 = vmatprep.mubr.msk.bf16.mxu0 %vm198_vm0, %v197_v0  ;;  %v189_v3 = vld [vmem:[%s259_s0 + $0x8] sm:$0xff]   ;;  %v190_v4 = vld [vmem:[%s259_s0 + $0x10] sm:$0xff]  }
   0x2   :  { %187 = vset.pattern.permute.xlu0 %v199_v2  ;;  %165 = vmatpush3.bf16.msra.mxu0 %v188_v1  ;;  %v33_v5 = vld [vmem:[%s260_s2] sm:$0xff]  ;;  %v191_v6 = vld [vmem:[%s259_s0 + $0x18] sm:$0xff]   ;;  %v34_v7 = vld [vmem:[%s260_s2 + $0x8] sm:$0xff] }
   0x3   :  { %166 = vmatprep.subr.bf16.mxu0 %v197_v0  ;;  %37 = vperm.xlu0 %187, %v33_v5   ;;  %v192_v8 = vld [vmem:[%s259_s0 + $0x20] sm:$0xff]   ;;  %v193_v9 = vld [vmem:[%s259_s0 + $0x28] sm:$0xff]   ;;  %v194_v10 = vld [vmem:[%s259_s0 + $0x30] sm:$0xff]  }
   0x4   :  { %v195_v11 = vld [vmem:[%s259_s0 + $0x38] sm:$0xff]   ;;  %v196_v12 = vld [vmem:[%s261_s1] sm:$0xff]  }
   0x6   :  { %167 = vmatpush3.bf16.msra.mxu0 %v189_v3 }
   0x7   :  { %168 = vmatprep.subr.bf16.mxu0 %v197_v0  ;;  %42 = vperm.xlu0 %187, %v34_v7  }
   0xa   :  { %169 = vmatpush3.bf16.msra.mxu0 %v190_v4 }
   0xb   :  { %170 = vmatprep.subr.bf16.mxu0 %v197_v0 }
   0xe   :  { %171 = vmatpush3.bf16.msra.mxu0 %v191_v6 }
   0xf   :  { %172 = vmatprep.subr.bf16.mxu0 %v197_v0 }
  0x12   :  { %173 = vmatpush3.bf16.msra.mxu0 %v192_v8 }
  0x13   :  { %174 = vmatprep.subr.bf16.mxu0 %v197_v0 }
  0x16   :  { %175 = vmatpush3.bf16.msra.mxu0 %v193_v9 }
  0x17   :  { %176 = vmatprep.subr.bf16.mxu0 %v197_v0 }
  0x1a   :  { %177 = vmatpush3.bf16.msra.mxu0 %v194_v10 }
  0x1b   :  { %178 = vmatprep.subr.bf16.mxu0 %v197_v0 }
  0x1e   :  { %179 = vmatpush3.bf16.msra.mxu0 %v195_v11 }
  0x21   :  { %181 = vmatmul.mubr.bf16.vlgmr.msra.gmra.mrb[0].mxu0 %v196_v12 }
  0x82   :  { %v38_v13 = vpop.permute.xlu0 %37 }
  0x86   :  { %v43_v17 = vpop.permute.xlu0 %42 }
  0xf4   :  { %v133_v14 = vpop.f32.mrb[0].mxu0 }
  0xf5   :  { %v134_v15 = vadd.f32 %v133_v14, %v38_v13  ;;  %v182_v16 = vpop.f32.mrb[1].mxu0 }
  0xf6   :  { %v136_v18 = vpop.f32.mrb[2].mxu0 }
  0xf7   :  { %140 = vst [vmem:[%s262_s3] sm:$0xff] %v134_v15  ;;  %v137_v19 = vadd.f32 %v136_v18, %v43_v17  ;;  %v183_v20 = vpop.f32.mrb[3].mxu0 }
  0xf9   :  { %141 = vst [vmem:[%s262_s3 + $0x8] sm:$0xff] %v137_v19 }

// kernel: patchtst_forward.4
= control target key start
LH: loop header
LB: loop body
LE: loop exit
PB: predicated region body
PF: predicated region fallthrough
CT: control target
= control target key end

     0   :  { %s4548_s25 = smov 0   ;;  %s5366_s0 = inlined_call_operand.vmem [shape: bf16[4,8,32], index: 0, kind: input, shape index: {}]   ;;  %s5367_s1 = inlined_call_operand.vmem [shape: bf16[32,96], index: 1, kind: input, shape index: {}]   ;;  %s5368_s2 = inlined_call_operand.vmem [shape: f32[1,96], index: 2, kind: input, shape index: {}]   ;;  %s5369_s3 = inlined_call_operand.vmem [shape: bf16[32,32], index: 3, kind: input, shape index: {}]   ;;  %s5370_s4 = inlined_call_operand.vmem [shape: f32[1,32], index: 4, kind: input, shape index: {}]   ;;  %s5371_s5 = inlined_call_operand.vmem [shape: f32[1,32], index: 5, kind: input, shape index: {}]   ;;  %s5372_s6 = inlined_call_operand.vmem [shape: f32[1,32], index: 6, kind: input, shape index: {}]   ;;  %s5373_s7 = inlined_call_operand.vmem [shape: bf16[32,2048], index: 7, kind: input, shape index: {}]   ;;  %s5374_s8 = inlined_call_operand.vmem [shape: f32[1,2048], index: 8, kind: input, shape index: {}]   ;;  %s5375_s9 = inlined_call_operand.vmem [shape: bf16[2048,32], index: 9, kind: input, shape index: {}]   ;;  %s5376_s10 = inlined_call_operand.vmem [shape: f32[1,32], index: 10, kind: input, shape index: {}]   ;;  %s5377_s11 = inlined_call_operand.vmem [shape: f32[1,32], index: 11, kind: input, shape index: {}]   ;;  %s5378_s12 = inlined_call_operand.vmem [shape: f32[1,32], index: 12, kind: input, shape index: {}]   ;;  %s5379_s13 = inlined_call_operand.vmem [shape: bf16[4,8,32], index: 13, kind: output, shape index: {}]  }
   0x1 LB: > { %s3695_s26 = sadd.s32 4294967295, %s4459_s25   ;;  %p3699_p0 = scmp.ge.s32.totalorder %s4459_s25, 1  ;;  %s4459_s25 = sphi %s4548_s25, %s23_s25  }
   0x2   : > { %p388_p1 = scmp.lt.s32.totalorder %s4459_s25, 3 }
   0x4   : > { %p389_p2 = pnand %p3699_p0, %p388_p1 }
   0x5   : > { %v4278_v0 = vld [vmem:[%s5367_s1] sm:$0xff] (!%p389_p2)   ;;  %v4461_v1 = vmov (!%p389_p2), 0.0   ;;  %v4279_v2 = vld [vmem:[%s5367_s1 + $0x8] sm:$0xff] (!%p389_p2)   ;;  %vm4462_vm0 = vmmov (!%p389_p2), 0   ;;  %s3700_s14 = sshll.u32 (!%p389_p2), %s3695_s26, 1  ;;  %vm473_vm1 = vcmask (!%p389_p2), 261120  }
   0x6   : > { %392 = sbr.rel (%p389_p2) target bundleno = 4220 (0x107c), region = 72  ;;  %4126 = vmatprep.subr.bf16.mxu0 (!%p389_p2), %v4461_v1  ;;  %4134 = vmatprep.subr.bf16.mxu1 (!%p389_p2), %v4461_v1  ;;  %p433_p3 = scmp.lt.s32.totalorder (!%p389_p2), %s3700_s14, 3  ;;  %v3705_v4 = vld [vmem:[%s5368_s2] ss:$0 sm:$0xff] (!%p389_p2)  ;;  %vm533_vm2 = vcmask (!%p389_p2), 64512   ;;  %vm658_vm3 = vcmask (!%p389_p2), 1043456  }
   0x7   : > { %4127 = vmatpush3.bf16.msra.mxu0 (!%p389_p2), %v4278_v0  ;;  %4130 = vmatprep.mubr.msk.bf16.mxu0 (!%p389_p2), %vm4462_vm0, %v4461_v1  ;;  %s4463_s21 = smov (!%p389_p2), 96   ;;  %s4464_s22 = smov (!%p389_p2), 64   ;;  %vm1436_vm4 = vcmask (!%p389_p2), 130048   ;;  %vm1439_vm5 = vcmask (!%p389_p2), 195584   ;;  %vm3636_vm6 = vcmask (!%p389_p2), 257024  }
   0x8   : > { %4128 = vmatprep.subr.bf16.mxu0 (!%p389_p2), %v4461_v1  ;;  %4136 = vmatprep.mubr.msk.bf16.mxu1 (!%p389_p2), %vm4462_vm0, %v4461_v1  ;;  %s4465_s23 = smov (!%p389_p2), 88   ;;  %s4466_s24 = smov (!%p389_p2), 120  }
   0x9   : > { %s4467_s26 = smov (!%p389_p2), 56   ;;  %s4468_s27 = smov (!%p389_p2), 80  }
   0xa   : > { %s4469_s28 = smov (!%p389_p2), 112   ;;  %s4470_s29 = smov (!%p389_p2), 48  }
   0xb   : > { %4129 = vmatpush3.bf16.msra.mxu0 (!%p389_p2), %v4279_v2  ;;  %s4471_s30 = smov (!%p389_p2), 72   ;;  %s4472_s16 = smov (!%p389_p2), 104  }
   0xc   : > { %4140 = vmatprep.subr.bf16.mxu0 (!%p389_p2), %v4461_v1  ;;  %s4473_s17 = smov (!%p389_p2), 40   ;;  %s4474_s19 = smov (!%p389_p2), 8  }
   0xd   : > { %s5381_s14 = smov (!%p433_p3, %s3700_s14), 3  ;;  %s4475_s20 = smov 16  }
   0xe   : > { %s3701_s15 = sshll.u32 %s5381_s14, 2 }
   0xf   : > { %s4578_s18 = scalar_lea.vmem %s5366_s0, %s3701_s15 }
  0x10   : > { %v445_v3 = vld [vmem:[%s4578_s18] sm:$0xff]  }
  0x11   : > { %4131 = vmatmul.mubr.msk.bf16.vlgmr.msra.gmra.mrb[0].mxu0 %vm473_vm1, %v445_v3 }
  0x12   : > { %4142 = vmatprep.mubr.msk.bf16.mxu0 %vm4462_vm0, %v4461_v1 }
  0xe4   : > { %v511_v5 = vpop.f32.mrb[0].mxu0 }
  0xe5   : > { %v512_v6 = vadd.f32 %v3705_v4, %v511_v5  ;;  %v4132_v7 = vpop.f32.mrb[1].mxu0 }
  0xe6   : > { %v514_v8 = vpop.f32.mrb[2].mxu0 }
  0xe7   : > { %v4587_v9 = vpack.c.bf16 %v512_v6, %v512_v6  ;;  %v515_v10 = vadd.f32 %v3705_v4, %v514_v8  ;;  %v4133_v11 = vpop.f32.mrb[3].mxu0  ;;  %v518_v15 = vmul.f32 0.35355338, %v512_v6 }
  0xe9   : > { %531 = vrot.lane.b32.xlu0 %v4587_v9, %s4463_s21  ;;  %v4590_v12 = vpack.c.bf16 %v515_v10, %v515_v10  ;;  %v4596_v18 = vpack.c.bf16 %v518_v15, %v518_v15  ;;  %v519_v19 = vmul.f32 0.35355338, %v515_v10 }
  0xeb   : > { %v4603_v20 = vpack.c.bf16 %v519_v19, %v519_v19 }
  0xed   : > { %581 = vrot.lane.b32.xlu0 %v4590_v12, %s4463_s21 }
 0x15b   : > { %v532_v13 = vpop.permute.xlu0 %531 }
 0x15c   : > { %v538_v14 = vsel %vm533_vm2, %v532_v13, 0 }
 0x15d   : > { %4135 = vmatpush3.bf16.xpose.msra.mxu1 %v538_v14 }
 0x15e   : > { %4146 = vmatprep.subr.bf16.mxu1 %v4461_v1 }
 0x15f   : > { %v582_v16 = vpop.permute.xlu0 %581 }
 0x160   : > { %v587_v17 = vsel %vm533_vm2, %v582_v16, 0 }
 0x161   : > { %4141 = vmatpush3.bf16.xpose.msra.mxu0 %v587_v17 }
 0x162   : > { %4152 = vmatprep.subr.bf16.mxu0 %v4461_v1 }
 0x164   : > { %4137 = vmatmul.mubr.msk.bf16.vlgmr.msra.gmra.mrb[0].mxu1 %vm533_vm2, %v4596_v18 }
 0x165   : > { %4148 = vmatprep.mubr.msk.bf16.mxu1 %vm4462_vm0, %v4461_v1 }
 0x168   : > { %4143 = vmatmul.mubr.msk.bf16.vlgmr.msra.gmra.mrb[4].mxu0 %vm533_vm2, %v4603_v20 }
 0x169   : > { %4154 = vmatprep.mubr.msk.bf16.mxu0 %vm4462_vm0, %v4461_v1 }
 0x237   : > { %v574_v21 = vpop.f32.mrb[0].mxu1 }
 0x238   : > { %v4138_v22 = vpop.f32.mrb[1].mxu1  ;;  %v629_v23 = vsel %vm533_vm2, %v574_v21, -inf }
 0x239   : > { %630 = vmax.xlane.f32.xlu1 %v629_v23  ;;  %v577_v24 = vpop.f32.mrb[2].mxu1 }
 0x23a   : > { %v4139_v25 = vpop.f32.mrb[3].mxu1 }
 0x23b   : > { %v623_v26 = vpop.f32.mrb[4].mxu0 }
 0x23c   : > { %v4144_v27 = vpop.f32.mrb[5].mxu0  ;;  %v632_v28 = vsel %vm533_vm2, %v623_v26, -inf }
 0x23d   : > { %633 = vmax.xlane.f32.xlu1 %v632_v28  ;;  %v626_v29 = vpop.f32.mrb[6].mxu0 }
 0x23e   : > { %v4145_v30 = vpop.f32.mrb[7].mxu0 }
 0x24e   : > { %653 = vrot.lane.b32.xlu1 %v4587_v9, %s4464_s22 }
 0x252   : > { %702 = vrot.lane.b32.xlu1 %v4590_v12, %s4464_s22 }
 0x256   : > { %752 = vrot.lane.b32.xlu1 %v4587_v9, %s4465_s23 }
 0x2c6   : > { %v631_v31 = vpop.xlane.xlu1 %630 }
 0x2c7   : > { %v635_v32 = vsub.f32 %v574_v21, %v631_v31 }
 0x2c9   : > { %v637_v33 = vmul.f32 1.442695, %v635_v32 }
 0x2ca   : > { %v634_v34 = vpop.xlane.xlu1 %633 }
 0x2cb   : > { %4412 = vpow2.f32 %v637_v33  ;;  %v636_v35 = vsub.f32 %v623_v26, %v634_v34 }
 0x2cd   : > { %v639_v36 = vmul.f32 1.442695, %v636_v35 }
 0x2ce   : > { %v654_v37 = vpop.permute.xlu1 %653 }
 0x2cf   : > { %4414 = vpow2.f32 %v639_v36  ;;  %v660_v38 = vsel %vm658_vm3, %v654_v37, 0 }
 0x2d0   : > { %4147 = vmatpush3.bf16.msra.mxu1 %v660_v38 }
 0x2d1   : > { %4158 = vmatprep.subr.bf16.mxu1 %v4461_v1 }
 0x2d2   : > { %v703_v39 = vpop.permute.xlu1 %702 }
 0x2d3   : > { %v708_v40 = vsel %vm658_vm3, %v703_v39, 0 }
 0x2d4   : > { %4153 = vmatpush3.bf16.msra.mxu0 %v708_v40 }
 0x2d5   : > { %v4413_v41 = vpop.eup %4412  ;;  %4164 = vmatprep.subr.bf16.mxu0 %v4461_v1 }
 0x2d6   : > { %v641_v42 = vsel %vm533_vm2, %v4413_v41, 0.0  ;;  %v753_v45 = vpop.permute.xlu1 %752 }
 0x2d7   : > { %642 = vadd.xlane.f32.xlu0 %v641_v42  ;;  %v758_v52 = vsel %vm533_vm2, %v753_v45, 0 }
 0x2d9   : > { %v4415_v43 = vpop.eup %4414 }
 0x2da   : > { %v644_v44 = vsel %vm533_vm2, %v4415_v43, 0.0 }
 0x2db   : > { %645 = vadd.xlane.f32.xlu1 %v644_v44 }
 0x2ec   : > { %802 = vrot.lane.b32.xlu1 %v4590_v12, %s4465_s23 }
 0x2ed   : > { %750 = vrot.lane.b32.xlu0 %v4596_v18, %s4466_s24 }
 0x2f0   : > { %800 = vrot.lane.b32.xlu1 %v4603_v20, %s4466_s24 }
 0x364   : > { %v643_v46 = vpop.xlane.xlu0 %642 }
 0x365   : > { %4416 = vrcp.f32 %v643_v46 }
 0x368   : > { %v646_v47 = vpop.xlane.xlu1 %645  ;;  %v751_v57 = vpop.permute.xlu0 %750 }
 0x369   : > { %4418 = vrcp.f32 %v646_v47 }
 0x36c   : > { %v803_v54 = vpop.permute.xlu1 %802 }
 0x36d   : > { %v808_v56 = vsel %vm533_vm2, %v803_v54, 0 }
 0x36f   : > { %v4417_v48 = vpop.eup %4416 }
 0x370   : > { %v649_v49 = vmul.f32 %v4417_v48, %v4413_v41  ;;  %v801_v58 = vpop.permute.xlu1 %800 }
 0x372   : > { %v651_v50 = vpack.c.bf16 %v649_v49, %v649_v49 }
 0x373   : > { %v4419_v51 = vpop.eup %4418 }
 0x374   : > { %v650_v53 = vmul.f32 %v4419_v51, %v4415_v43  ;;  %4149 = vmatmul.mubr.msk.bf16.vlgmr.msra.gmra.mrb[4].mxu1 %vm533_vm2, %v651_v50 }
 0x375   : > { %4159 = vmatpush3.bf16.xpose.msra.mxu1 %v758_v52  ;;  %4160 = vmatprep.mubr.msk.bf16.mxu1 %vm4462_vm0, %v4461_v1 }
 0x376   : > { %v652_v55 = vpack.c.bf16 %v650_v53, %v650_v53  ;;  %4170 = vmatprep.subr.bf16.mxu1 %v4461_v1 }
 0x378   : > { %4155 = vmatmul.mubr.msk.bf16.vlgmr.msra.gmra.mrb[8].mxu0 %vm533_vm2, %v652_v55 }
 0x379   : > { %4165 = vmatpush3.bf16.xpose.msra.mxu0 %v808_v56  ;;  %4166 = vmatprep.mubr.msk.bf16.mxu0 %vm4462_vm0, %v4461_v1 }
 0x37a   : > { %4176 = vmatprep.subr.bf16.mxu0 %v4461_v1 }
 0x37c   : > { %4161 = vmatmul.mubr.msk.bf16.vlgmr.msra.gmra.mrb[8].mxu1 %vm533_vm2, %v751_v57 }
 0x37d   : > { %4172 = vmatprep.mubr.msk.bf16.mxu1 %vm4462_vm0, %v4461_v1 }
 0x380   : > { %4167 = vmatmul.mubr.msk.bf16.vlgmr.msra.gmra.mrb[12].mxu0 %vm533_vm2, %v801_v58 }
 0x381   : > { %4178 = vmatprep.mubr.msk.bf16.mxu0 %vm4462_vm0, %v4461_v1 }
 0x447   : > { %v4639_v59 = vpop.f32.mrb[4].mxu1 }
 0x448   : > { %v4150_v60 = vpop.f32.mrb[5].mxu1 }
 0x449   : > { %v699_v61 = vpop.f32.mrb[6].mxu1 }
 0x44a   : > { %v4151_v62 = vpop.f32.mrb[7].mxu1 }
 0x44b   : > { %v4641_v63 = vpop.f32.mrb[8].mxu0 }
 0x44c   : > { %v4156_v0 = vpop.f32.mrb[9].mxu0 }
 0x44d   : > { %v747_v2 = vpop.f32.mrb[10].mxu0 }
 0x44e   : > { %v4157_v3 = vpop.f32.mrb[11].mxu0 }
 0x44f   : > { %v794_v4 = vpop.f32.mrb[8].mxu1 }
 0x450   : > { %v4162_v5 = vpop.f32.mrb[9].mxu1  ;;  %v850_v6 = vsel %vm533_vm2, %v794_v4, -inf }
 0x451   : > { %851 = vmax.xlane.f32.xlu1 %v850_v6  ;;  %v797_v7 = vpop.f32.mrb[10].mxu1 }
 0x452   : > { %v4163_v8 = vpop.f32.mrb[11].mxu1 }
 0x453   : > { %v844_v10 = vpop.f32.mrb[12].mxu0 }
 0x454   : > { %v4168_v11 = vpop.f32.mrb[13].mxu0  ;;  %v853_v13 = vsel %vm533_vm2, %v844_v10, -inf }
 0x455   : > { %854 = vmax.xlane.f32.xlu0 %v853_v13  ;;  %v847_v14 = vpop.f32.mrb[14].mxu0 }
 0x456   : > { %v4169_v15 = vpop.f32.mrb[15].mxu0 }
 0x462   : > { %874 = vrot.lane.b32.xlu1 %v4587_v9, %s4467_s26 }
 0x466   : > { %972 = vrot.lane.b32.xlu1 %v4587_v9, %s4468_s27 }
 0x46b   : > { %922 = vrot.lane.b32.xlu0 %v4590_v12, %s4467_s26  ;;  %s4476_s26 = smov 24  }
 0x46f   : > { %970 = vrot.lane.b32.xlu0 %v4596_v18, %s4469_s28 }
 0x4de   : > { %v852_v16 = vpop.xlane.xlu1 %851 }
 0x4df   : > { %v856_v17 = vsub.f32 %v794_v4, %v852_v16 }
 0x4e1   : > { %v858_v19 = vmul.f32 1.442695, %v856_v17 }
 0x4e2   : > { %v875_v21 = vpop.permute.xlu1 %874  ;;  %v855_v22 = vpop.xlane.xlu0 %854 }
 0x4e3   : > { %4420 = vpow2.f32 %v858_v19  ;;  %v880_v23 = vsel %vm658_vm3, %v875_v21, 0  ;;  %v857_v24 = vsub.f32 %v844_v10, %v855_v22 }
 0x4e4   : > { %4171 = vmatpush3.bf16.msra.mxu1 %v880_v23 }
 0x4e5   : > { %v860_v25 = vmul.f32 1.442695, %v857_v24  ;;  %4182 = vmatprep.subr.bf16.mxu1 %v4461_v1 }
 0x4e6   : > { %v923_v26 = vpop.permute.xlu0 %922  ;;  %v973_v32 = vpop.permute.xlu1 %972 }
 0x4e7   : > { %4422 = vpow2.f32 %v860_v25  ;;  %v928_v27 = vsel %vm658_vm3, %v923_v26, 0  ;;  %v978_v39 = vsel %vm533_vm2, %v973_v32, 0 }
 0x4e8   : > { %4177 = vmatpush3.bf16.msra.mxu0 %v928_v27 }
 0x4e9   : > { %4188 = vmatprep.subr.bf16.mxu0 %v4461_v1 }
 0x4ea   : > { %v971_v44 = vpop.permute.xlu0 %970 }
 0x4ed   : > { %v4421_v28 = vpop.eup %4420 }
 0x4ee   : > { %v862_v29 = vsel %vm533_vm2, %v4421_v28, 0.0 }
 0x4ef   : > { %863 = vadd.xlane.f32.xlu1 %v862_v29 }
 0x4f1   : > { %v4423_v30 = vpop.eup %4422 }
 0x4f2   : > { %v865_v31 = vsel %vm533_vm2, %v4423_v30, 0.0 }
 0x4f3   : > { %866 = vadd.xlane.f32.xlu1 %v865_v31 }
 0x504   : > { %1022 = vrot.lane.b32.xlu1 %v4590_v12, %s4468_s27 }
 0x508   : > { %1020 = vrot.lane.b32.xlu1 %v4603_v20, %s4469_s28 }
 0x57c   : > { %v864_v33 = vpop.xlane.xlu1 %863 }
 0x57d   : > { %4424 = vrcp.f32 %v864_v33 }
 0x580   : > { %v867_v34 = vpop.xlane.xlu1 %866 }
 0x581   : > { %4426 = vrcp.f32 %v867_v34 }
 0x584   : > { %v1023_v41 = vpop.permute.xlu1 %1022 }
 0x585   : > { %v1028_v43 = vsel %vm533_vm2, %v1023_v41, 0 }
 0x587   : > { %v4425_v35 = vpop.eup %4424 }
 0x588   : > { %v870_v36 = vmul.f32 %v4425_v35, %v4421_v28  ;;  %v1021_v45 = vpop.permute.xlu1 %1020 }
 0x58a   : > { %v872_v37 = vpack.c.bf16 %v870_v36, %v870_v36 }
 0x58b   : > { %v4427_v38 = vpop.eup %4426 }
 0x58c   : > { %v871_v40 = vmul.f32 %v4427_v38, %v4423_v30  ;;  %4173 = vmatmul.mubr.msk.bf16.vlgmr.msra.gmra.mrb[12].mxu1 %vm533_vm2, %v872_v37 }
 0x58d   : > { %4183 = vmatpush3.bf16.xpose.msra.mxu1 %v978_v39  ;;  %4184 = vmatprep.mubr.msk.bf16.mxu1 %vm4462_vm0, %v4461_v1 }
 0x58e   : > { %v873_v42 = vpack.c.bf16 %v871_v40, %v871_v40  ;;  %4194 = vmatprep.subr.bf16.mxu1 %v4461_v1 }
 0x590   : > { %4179 = vmatmul.mubr.msk.bf16.vlgmr.msra.gmra.mrb[16].mxu0 %vm533_vm2, %v873_v42 }
 0x591   : > { %4189 = vmatpush3.bf16.xpose.msra.mxu0 %v1028_v43  ;;  %4190 = vmatprep.mubr.msk.bf16.mxu0 %vm4462_vm0, %v4461_v1 }
 0x592   : > { %4200 = vmatprep.subr.bf16.mxu0 %v4461_v1 }
 0x594   : > { %4185 = vmatmul.mubr.msk.bf16.vlgmr.msra.gmra.mrb[16].mxu1 %vm533_vm2, %v971_v44 }
 0x595   : > { %4196 = vmatprep.mubr.msk.bf16.mxu1 %vm4462_vm0, %v4461_v1 }
 0x598   : > { %4191 = vmatmul.mubr.msk.bf16.vlgmr.msra.gmra.mrb[20].mxu0 %vm533_vm2, %v1021_v45 }
 0x599   : > { %4202 = vmatprep.mubr.msk.bf16.mxu0 %vm4462_vm0, %v4461_v1 }
 0x65f   : > { %v4673_v46 = vpop.f32.mrb[12].mxu1 }
 0x660   : > { %v4174_v47 = vpop.f32.mrb[13].mxu1 }
 0x661   : > { %v919_v48 = vpop.f32.mrb[14].mxu1 }
 0x662   : > { %v4175_v49 = vpop.f32.mrb[15].mxu1 }
 0x663   : > { %v4675_v50 = vpop.f32.mrb[16].mxu0 }
 0x664   : > { %v4263_v51 = vpack.i.bf16 %v4675_v50, %v4673_v46  ;;  %v4180_v52 = vpop.f32.mrb[17].mxu0 }
 0x665   : > { %v967_v53 = vpop.f32.mrb[18].mxu0 }
 0x666   : > { %v4181_v54 = vpop.f32.mrb[19].mxu0 }
 0x667   : > { %v1014_v55 = vpop.f32.mrb[16].mxu1 }
 0x668   : > { %v4186_v56 = vpop.f32.mrb[17].mxu1  ;;  %v1070_v57 = vsel %vm533_vm2, %v1014_v55, -inf }
 0x669   : > { %1071 = vmax.xlane.f32.xlu0 %v1070_v57  ;;  %v1017_v58 = vpop.f32.mrb[18].mxu1 }
 0x66a   : > { %v4187_v60 = vpop.f32.mrb[19].mxu1 }
 0x66b   : > { %v1064_v61 = vpop.f32.mrb[20].mxu0 }
 0x66c   : > { %v4192_v62 = vpop.f32.mrb[21].mxu0  ;;  %v1073_v0 = vsel %vm533_vm2, %v1064_v61, -inf }
 0x66d   : > { %1074 = vmax.xlane.f32.xlu1 %v1073_v0  ;;  %v1067_v2 = vpop.f32.mrb[22].mxu0 }
 0x66e   : > { %v4193_v3 = vpop.f32.mrb[23].mxu0 }
 0x67e   : > { %1094 = vrot.lane.b32.xlu1 %v4587_v9, %s4470_s29 }
 0x682   : > { %1192 = vrot.lane.b32.xlu1 %v4587_v9, %s4471_s30 }
 0x686   : > { %1242 = vrot.lane.b32.xlu1 %v4590_v12, %s4471_s30 }
 0x68a   : > { %1240 = vrot.lane.b32.xlu1 %v4603_v20, %s4472_s16 }
 0x6f6   : > { %v1072_v4 = vpop.xlane.xlu0 %1071 }
 0x6f7   : > { %v1076_v5 = vsub.f32 %v1014_v55, %v1072_v4 }
 0x6f9   : > { %v1078_v6 = vmul.f32 1.442695, %v1076_v5 }
 0x6fa   : > { %v1075_v7 = vpop.xlane.xlu1 %1074 }
 0x6fb   : > { %4428 = vpow2.f32 %v1078_v6  ;;  %v1077_v8 = vsub.f32 %v1064_v61, %v1075_v7 }
 0x6fd   : > { %v1080_v10 = vmul.f32 1.442695, %v1077_v8 }
 0x6fe   : > { %v1095_v11 = vpop.permute.xlu1 %1094 }
 0x6ff   : > { %4430 = vpow2.f32 %v1080_v10  ;;  %v1100_v13 = vsel %vm658_vm3, %v1095_v11, 0 }
 0x700   : > { %4195 = vmatpush3.bf16.msra.mxu1 %v1100_v13 }
 0x701   : > { %4206 = vmatprep.subr.bf16.mxu1 %v4461_v1 }
 0x702   : > { %v1193_v24 = vpop.permute.xlu1 %1192 }
 0x703   : > { %v1198_v28 = vsel %vm533_vm2, %v1193_v24, 0 }
 0x705   : > { %v4429_v14 = vpop.eup %4428 }
 0x706   : > { %v1082_v15 = vsel %vm533_vm2, %v4429_v14, 0.0 }
 0x707   : > { %1083 = vadd.xlane.f32.xlu0 %v1082_v15  ;;  %v4282_v15 = vld [vmem:[%s5369_s3 + $0x8] sm:$0xff]  }
 0x709   : > { %v4431_v16 = vpop.eup %4430 }
 0x70a   : > { %v1085_v20 = vsel %vm533_vm2, %v4431_v16, 0.0 }
 0x70b   : > { %1086 = vadd.xlane.f32.xlu0 %v1085_v20 }
 0x721   : > { %1142 = vrot.lane.b32.xlu0 %v4590_v12, %s4470_s29 }
 0x725   : > { %1190 = vrot.lane.b32.xlu0 %v4596_v18, %s4472_s16  ;;  %v1243_v18 = vpop.permute.xlu1 %1242 }
 0x726   : > { %v1248_v31 = vsel %vm533_vm2, %v1243_v18, 0 }
 0x729   : > { %v1241_v33 = vpop.permute.xlu1 %1240 }
 0x794   : > { %v1084_v17 = vpop.xlane.xlu0 %1083 }
 0x795   : > { %4432 = vrcp.f32 %v1084_v17 }
 0x798   : > { %v1087_v19 = vpop.xlane.xlu0 %1086 }
 0x799   : > { %4434 = vrcp.f32 %v1087_v19 }
 0x79c   : > { %v1143_v21 = vpop.permute.xlu0 %1142 }
 0x79d   : > { %v1148_v22 = vsel %vm658_vm3, %v1143_v21, 0 }
 0x79e   : > { %4201 = vmatpush3.bf16.msra.mxu0 %v1148_v22 }
 0x79f   : > { %v4433_v23 = vpop.eup %4432  ;;  %4212 = vmatprep.subr.bf16.mxu0 %v4461_v1 }
 0x7a0   : > { %v1090_v25 = vmul.f32 %v4433_v23, %v4429_v14  ;;  %v1191_v32 = vpop.permute.xlu0 %1190 }
 0x7a2   : > { %v1092_v26 = vpack.c.bf16 %v1090_v25, %v1090_v25 }
 0x7a3   : > { %v4435_v27 = vpop.eup %4434 }
 0x7a4   : > { %v1091_v29 = vmul.f32 %v4435_v27, %v4431_v16  ;;  %4197 = vmatmul.mubr.msk.bf16.vlgmr.msra.gmra.mrb[20].mxu1 %vm533_vm2, %v1092_v26 }
 0x7a5   : > { %4207 = vmatpush3.bf16.xpose.msra.mxu1 %v1198_v28  ;;  %4208 = vmatprep.mubr.msk.bf16.mxu1 %vm4462_vm0, %v4461_v1 }
 0x7a6   : > { %v1093_v30 = vpack.c.bf16 %v1091_v29, %v1091_v29  ;;  %4218 = vmatprep.subr.bf16.mxu1 %v4461_v1 }
 0x7a8   : > { %4203 = vmatmul.mubr.msk.bf16.vlgmr.msra.gmra.mrb[24].mxu0 %vm533_vm2, %v1093_v30 }
 0x7a9   : > { %4213 = vmatpush3.bf16.xpose.msra.mxu0 %v1248_v31  ;;  %4214 = vmatprep.mubr.msk.bf16.mxu0 %vm4462_vm0, %v4461_v1 }
 0x7aa   : > { %4224 = vmatprep.subr.bf16.mxu0 %v4461_v1 }
 0x7ac   : > { %4209 = vmatmul.mubr.msk.bf16.vlgmr.msra.gmra.mrb[24].mxu1 %vm533_vm2, %v1191_v32 }
 0x7ad   : > { %4220 = vmatprep.mubr.msk.bf16.mxu1 %vm4462_vm0, %v4461_v1 }
 0x7b0   : > { %4215 = vmatmul.mubr.msk.bf16.vlgmr.msra.gmra.mrb[28].mxu0 %vm533_vm2, %v1241_v33 }
 0x7b1   : > { %4226 = vmatprep.mubr.msk.bf16.mxu0 %vm4462_vm0, %v4461_v1 }
 0x877   : > { %v1136_v34 = vpop.f32.mrb[20].mxu1 }
 0x878   : > { %v4198_v35 = vpop.f32.mrb[21].mxu1 }
 0x879   : > { %v1139_v36 = vpop.f32.mrb[22].mxu1 }
 0x87a   : > { %v4199_v37 = vpop.f32.mrb[23].mxu1 }
 0x87b   : > { %v1184_v38 = vpop.f32.mrb[24].mxu0 }
 0x87c   : > { %v4268_v39 = vpack.i.bf16 %v1184_v38, %v1136_v34  ;;  %v4204_v40 = vpop.f32.mrb[25].mxu0 }
 0x87d   : > { %v1187_v41 = vpop.f32.mrb[26].mxu0  ;;  %v3729_v40 = vld [vmem:[%s5370_s4] ss:$0 sm:$0xff] }
 0x87e   : > { %v4205_v42 = vpop.f32.mrb[27].mxu0  ;;  %v4452_v41 = vld [vmem:[%s4578_s18] sm:$0xff]   ;;  %s442_s18 = scalar_lea.vmem %s5379_s13, %s3701_s15 }
 0x87f   : > { %v1234_v43 = vpop.f32.mrb[24].mxu1  ;;  %v447_v42 = vunpack.c.l.bf16 %v4452_v41 }
 0x880   : > { %v4210_v44 = vpop.f32.mrb[25].mxu1  ;;  %v1290_v45 = vsel %vm533_vm2, %v1234_v43, -inf }
 0x881   : > { %1291 = vmax.xlane.f32.xlu0 %v1290_v45  ;;  %v1237_v47 = vpop.f32.mrb[26].mxu1  ;;  %v448_v45 = vunpack.c.h.bf16 %v4452_v41  ;;  %v1577_v41 = vld [vmem:[%s5373_s7 + $0x98] sm:$0xff] }
 0x882   : > { %v4211_v48 = vpop.f32.mrb[27].mxu1 }
 0x883   : > { %v1284_v49 = vpop.f32.mrb[28].mxu0 }
 0x884   : > { %v4216_v52 = vpop.f32.mrb[29].mxu0  ;;  %v1293_v53 = vsel %vm533_vm2, %v1284_v49, -inf }
 0x885   : > { %1294 = vmax.xlane.f32.xlu1 %v1293_v53  ;;  %v1287_v54 = vpop.f32.mrb[30].mxu0 }
 0x886   : > { %v4217_v55 = vpop.f32.mrb[31].mxu0 }
 0x896   : > { %1314 = vrot.lane.b32.xlu1 %v4587_v9, %s4473_s17 }
 0x89a   : > { %4264 = vrot.lane.b32.xlu1 %v4263_v51, %s4474_s19 }
 0x89e   : > { %4269 = vrot.lane.b32.xlu1 %v4268_v39, %s4475_s20 }
 0x90e   : > { %v1292_v56 = vpop.xlane.xlu0 %1291 }
 0x90f   : > { %v1296_v57 = vsub.f32 %v1234_v43, %v1292_v56 }
 0x911   : > { %v1298_v58 = vmul.f32 1.442695, %v1296_v57 }
 0x912   : > { %v1295_v60 = vpop.xlane.xlu1 %1294 }
 0x913   : > { %4436 = vpow2.f32 %v1298_v58  ;;  %v1297_v61 = vsub.f32 %v1284_v49, %v1295_v60 }
 0x915   : > { %v1300_v62 = vmul.f32 1.442695, %v1297_v61 }
 0x916   : > { %v1315_v0 = vpop.permute.xlu1 %1314 }
 0x917   : > { %4438 = vpow2.f32 %v1300_v62  ;;  %v1320_v2 = vsel %vm658_vm3, %v1315_v0, 0 }
 0x918   : > { %4219 = vmatpush3.bf16.msra.mxu1 %v1320_v2 }
 0x919   : > { %4230 = vmatprep.subr.bf16.mxu1 %v4461_v1 }
 0x91a   : > { %v4265_v26 = vpop.permute.xlu1 %4264 }
 0x91b   : > { %v4267_v28 = vunpack.i.h.bf16 %v4265_v26 }
 0x91d   : > { %v4437_v9 = vpop.eup %4436  ;;  %v1435_v31 = vsel %vm533_vm2, %v4641_v63, %v4267_v28 }
 0x91e   : > { %v1302_v46 = vsel %vm533_vm2, %v4437_v9, 0.0  ;;  %v4270_v27 = vpop.permute.xlu1 %4269 }
 0x91f   : > { %1303 = vadd.xlane.f32.xlu0 %v1302_v46  ;;  %v4272_v29 = vunpack.i.h.bf16 %v4270_v27  ;;  %v4271_v18 = vunpack.i.l.bf16 %v4270_v27  ;;  %v1558_v46 = vld [vmem:[%s5373_s7] sm:$0xff] }
 0x921   : > { %v4439_v50 = vpop.eup %4438  ;;  %v1438_v36 = vsel %vm1436_vm4, %v1435_v31, %v4272_v29 }
 0x922   : > { %v1305_v51 = vsel %vm533_vm2, %v4439_v50, 0.0 }
 0x923   : > { %1306 = vadd.xlane.f32.xlu0 %v1305_v51  ;;  %v1559_v51 = vld [vmem:[%s5373_s7 + $0x8] sm:$0xff] }
 0x939   : > { %1362 = vrot.lane.b32.xlu0 %v4590_v12, %s4473_s17  ;;  %v4281_v12 = vld [vmem:[%s5369_s3] sm:$0xff]  }
 0x9ac   : > { %v1304_v3 = vpop.xlane.xlu0 %1303 }
 0x9ad   : > { %4440 = vrcp.f32 %v1304_v3 }
 0x9b0   : > { %v1307_v4 = vpop.xlane.xlu0 %1306 }
 0x9b1   : > { %4442 = vrcp.f32 %v1307_v4  ;;  %v1567_v4 = vld [vmem:[%s5373_s7 + $0x48] sm:$0xff] }
 0x9b4   : > { %v1363_v5 = vpop.permute.xlu0 %1362 }
 0x9b5   : > { %v1368_v6 = vsel %vm658_vm3, %v1363_v5, 0 }
 0x9b6   : > { %4225 = vmatpush3.bf16.msra.mxu0 %v1368_v6  ;;  %v3737_v6 = vcombine.low %v1559_v51, %v1567_v4 }
 0x9b7   : > { %v4441_v7 = vpop.eup %4440 }
 0x9b8   : > { %v1310_v8 = vmul.f32 %v4441_v7, %v4437_v9  ;;  %v3738_v7 = vcombine.high %v1559_v51, %v1567_v4  ;;  %v1565_v51 = vld [vmem:[%s5373_s7 + $0x38] sm:$0xff] }
 0x9ba   : > { %v1312_v10 = vpack.c.bf16 %v1310_v8, %v1310_v8  ;;  %v1574_v8 = vld [vmem:[%s5373_s7 + $0x80] sm:$0xff] }
 0x9bb   : > { %v4443_v11 = vpop.eup %4442 }
 0x9bc   : > { %v1311_v13 = vmul.f32 %v4443_v11, %v4439_v50  ;;  %4221 = vmatmul.mubr.msk.bf16.vlgmr.msra.gmra.mrb[28].mxu1 %vm533_vm2, %v1312_v10  ;;  %v1566_v50 = vld [vmem:[%s5373_s7 + $0x40] sm:$0xff]  ;;  %v1575_v11 = vld [vmem:[%s5373_s7 + $0x88] sm:$0xff] }
 0x9bd   : > { %4234 = vmatprep.mubr.msk.bf16.mxu1 %vm4462_vm0, %v4461_v1  ;;  %4231 = vmatpush3.bf16.msra.mxu1 %v4281_v12  ;;  %v3736_v3 = vcombine.high %v1558_v46, %v1566_v50  ;;  %v3735_v5 = vcombine.low %v1558_v46, %v1566_v50  ;;  %v1582_v10 = vld [vmem:[%s5373_s7 + $0xc0] sm:$0xff]  ;;  %v1564_v46 = vld [vmem:[%s5373_s7 + $0x30] sm:$0xff] }
 0x9be   : > { %v1313_v14 = vpack.c.bf16 %v1311_v13, %v1311_v13  ;;  %4232 = vmatprep.subr.bf16.mxu1 %v4461_v1  ;;  %v4266_v1 = vunpack.i.l.bf16 %v4265_v26  ;;  %v3752_v13 = vcombine.high %v1574_v8, %v1582_v10  ;;  %v3751_v12 = vcombine.low %v1574_v8, %v1582_v10  ;;  %v1572_v50 = vld [vmem:[%s5373_s7 + $0x70] sm:$0xff] }
 0x9bf   : > { %1837 = vmatprep.subr.bf16.mxu0 %v3736_v3  ;;  %v1573_v3 = vld [vmem:[%s5373_s7 + $0x78] sm:$0xff]  ;;  %v1580_v8 = vld [vmem:[%s5373_s7 + $0xb0] sm:$0xff] }
 0x9c0   : > { %4227 = vmatmul.mubr.msk.bf16.vlgmr.msra.gmra.mrb[32].mxu0 %vm533_vm2, %v1313_v14  ;;  %v1434_v32 = vsel %vm533_vm2, %v4639_v59, %v4266_v1  ;;  %v1583_v14 = vld [vmem:[%s5373_s7 + $0xc8] sm:$0xff]  ;;  %v1588_v10 = vld [vmem:[%s5373_s7 + $0xf0] sm:$0xff] }
 0x9c1   : > { %4233 = vmatpush3.bf16.msra.mxu1 %v4282_v15  ;;  %v1437_v35 = vsel %vm1436_vm4, %v1434_v32, %v4271_v18  ;;  %1838 = vmatpush1.bf16.msra.mxu0 %v3735_v5  ;;  %v3753_v15 = vcombine.low %v1575_v11, %v1583_v14  ;;  %v3733_v32 = vld [vmem:[%s5371_s5] ss:$0 sm:$0xff] }
 0x9c2   : > { %1880 = vmatprep.subr.bf16.mxu1 %v3738_v7  ;;  %1839 = vmatprep.subr.bf16.mxu0 %v3752_v13  ;;  %v3750_v7 = vcombine.high %v1565_v51, %v1573_v3  ;;  %v1589_v13 = vld [vmem:[%s5373_s7 + $0xf8] sm:$0xff] }
 0x9c5   : > { %1840 = vmatpush1.bf16.msra.mxu0 %v3751_v12  ;;  %v3749_v12 = vcombine.low %v1565_v51, %v1573_v3 }
 0xa8f   : > { %v1356_v16 = vpop.f32.mrb[28].mxu1 }
 0xa90   : > { %v4222_v20 = vpop.f32.mrb[29].mxu1 }
 0xa91   : > { %v1359_v17 = vpop.f32.mrb[30].mxu1  ;;  %v1560_v20 = vld [vmem:[%s5373_s7 + $0x10] sm:$0xff] }
 0xa92   : > { %v4223_v19 = vpop.f32.mrb[31].mxu1  ;;  %v1568_v17 = vld [vmem:[%s5373_s7 + $0x50] sm:$0xff] }
 0xa93   : > { %v1404_v21 = vpop.f32.mrb[32].mxu0  ;;  %v1561_v19 = vld [vmem:[%s5373_s7 + $0x18] sm:$0xff] }
 0xa94   : > { %v4273_v22 = vpack.i.bf16 %v1404_v21, %v1356_v16  ;;  %v4228_v23 = vpop.f32.mrb[33].mxu0  ;;  %v3754_v16 = vcombine.high %v1575_v11, %v1583_v14  ;;  %v4477_v21 = vmov 0   ;;  %v1581_v11 = vld [vmem:[%s5373_s7 + $0xb8] sm:$0xff]  ;;  %v3747_v14 = vcombine.low %v1564_v46, %v1572_v50 }
 0xa95   : > { %v1407_v24 = vpop.f32.mrb[34].mxu0  ;;  %1869 = vmatprep.mubr.bf16.mxu0 %v4477_v21  ;;  %v1569_v23 = vld [vmem:[%s5373_s7 + $0x58] sm:$0xff] }
 0xa96   : > { %4274 = vrot.lane.b32.xlu0 %v4273_v22, %s4476_s26  ;;  %v4229_v25 = vpop.f32.mrb[35].mxu0  ;;  %v3740_v22 = vcombine.high %v1560_v20, %v1568_v17  ;;  %v3739_v24 = vcombine.low %v1560_v20, %v1568_v17  ;;  %v3742_v26 = vcombine.high %v1561_v19, %v1569_v23  ;;  %v3763_v20 = vcombine.low %v1580_v8, %v1588_v10 }
 0xa97   : > { %v3741_v25 = vcombine.low %v1561_v19, %v1569_v23  ;;  %v3765_v17 = vcombine.low %v1581_v11, %v1589_v13  ;;  %v4283_v19 = vld [vmem:[%s5375_s9 + $0x40] sm:$0xff]  }
 0xa98   : > { %1923 = vmatprep.subr.bf16.mxu0 %v3740_v22  ;;  %v4284_v22 = vld [vmem:[%s5375_s9 + $0xc0] sm:$0xff]  }
 0xa99   : > { %v4285_v23 = vld [vmem:[%s5375_s9] sm:$0xff]  }
 0xb08   : > { %v4275_v30 = vpop.permute.xlu0 %4274 }
 0xb09   : > { %v4277_v33 = vunpack.i.h.bf16 %v4275_v30  ;;  %v4276_v34 = vunpack.i.l.bf16 %v4275_v30 }
 0xb0b   : > { %v1441_v37 = vsel %vm1439_vm5, %v1438_v36, %v4277_v33  ;;  %v1440_v38 = vsel %vm1439_vm5, %v1437_v35, %v4276_v34 }
 0xb0c   : > { %v1442_v39 = vpack.c.bf16 %v1441_v37, %v1440_v38  ;;  %v3734_v37 = vld [vmem:[%s5372_s6] ss:$0 sm:$0xff] }
 0xb0e   : > { %4235 = vmatmul.mubr.msk.bf16.vlgmr.msra.gmra.mrb[32].mxu1 %vm473_vm1, %v1442_v39  ;;  %v1576_v39 = vld [vmem:[%s5373_s7 + $0x90] sm:$0xff] }
 0xb0f   : > { %1881 = vmatpush1.bf16.msra.mxu1 %v3737_v6  ;;  %1912 = vmatprep.mubr.bf16.mxu1 %v4477_v21  ;;  %v3748_v6 = vcombine.high %v1564_v46, %v1572_v50 }
 0xb10   : > { %1882 = vmatprep.subr.bf16.mxu1 %v3754_v16  ;;  %v3766_v16 = vcombine.high %v1581_v11, %v1589_v13 }
 0xb13   : > { %1883 = vmatpush1.bf16.msra.mxu1 %v3753_v15  ;;  %v3764_v15 = vcombine.high %v1580_v8, %v1588_v10 }
 0xb14   : > { %1966 = vmatprep.subr.bf16.mxu1 %v3742_v26  ;;  %v4289_v26 = vld [vmem:[%s5375_s9 + $0x8] sm:$0xff]  }
 0xbe1   : > { %v1503_v43 = vpop.f32.mrb[32].mxu1 }
 0xbe2   : > { %v1504_v63 = vadd.f32 %v3729_v40, %v1503_v43  ;;  %v4236_v44 = vpop.f32.mrb[33].mxu1 }
 0xbe3   : > { %v1506_v59 = vpop.f32.mrb[34].mxu1 }
 0xbe4   : > { %v1507_v47 = vadd.f32 %v3729_v40, %v1506_v59  ;;  %v4237_v48 = vpop.f32.mrb[35].mxu1  ;;  %v1510_v49 = vadd.f32 %v1504_v63, %v447_v42  ;;  %v1584_v40 = vld [vmem:[%s5373_s7 + $0xd0] sm:$0xff]  ;;  %v1585_v42 = vld [vmem:[%s5373_s7 + $0xd8] sm:$0xff] }
 0xbe5   : > { %v3758_v59 = vcombine.high %v1577_v41, %v1585_v42  ;;  %v1570_v48 = vld [vmem:[%s5373_s7 + $0x60] sm:$0xff] }
 0xbe6   : > { %v1514_v52 = vsel %vm473_vm1, %v1510_v49, 0.0  ;;  %v1511_v53 = vadd.f32 %v1507_v47, %v448_v45  ;;  %v3756_v45 = vcombine.high %v1576_v39, %v1584_v40  ;;  %v1562_v47 = vld [vmem:[%s5373_s7 + $0x20] sm:$0xff] }
 0xbe7   : > { %1515 = vadd.xlane.f32.xlu1 %v1514_v52  ;;  %v1571_v52 = vld [vmem:[%s5373_s7 + $0x68] sm:$0xff] }
 0xbe8   : > { %v1517_v54 = vsel %vm473_vm1, %v1511_v53, 0.0 }
 0xbe9   : > { %1518 = vadd.xlane.f32.xlu0 %v1517_v54  ;;  %v3757_v54 = vcombine.low %v1577_v41, %v1585_v42  ;;  %v4306_v41 = vld [vmem:[%s5375_s9 + $0xa8] sm:$0xff]   ;;  %v4307_v42 = vld [vmem:[%s5375_s9 + $0x70] sm:$0xff]  }
 0xc74   : > { %v1516_v55 = vpop.xlane.xlu1 %1515 }
 0xc75   : > { %v1521_v56 = vmul.f32 0.03125, %v1516_v55  ;;  %v3744_v55 = vcombine.high %v1562_v47, %v1570_v48 }
 0xc76   : > { %v1519_v57 = vpop.xlane.xlu0 %1518 }
 0xc77   : > { %v1523_v58 = vsub.f32 %v1510_v49, %v1521_v56  ;;  %v1522_v60 = vmul.f32 0.03125, %v1519_v57  ;;  %v1563_v49 = vld [vmem:[%s5373_s7 + $0x28] sm:$0xff]  ;;  %v1578_v57 = vld [vmem:[%s5373_s7 + $0xa0] sm:$0xff] }
 0xc78   : > { %v3746_v56 = vcombine.high %v1563_v49, %v1571_v52 }
 0xc79   : > { %v1524_v61 = vsub.f32 %v1511_v53, %v1522_v60  ;;  %v1525_v62 = vmul.f32 %v1523_v58, %v1523_v58  ;;  %v3755_v53 = vcombine.low %v1576_v39, %v1584_v40  ;;  %v1579_v60 = vld [vmem:[%s5373_s7 + $0xa8] sm:$0xff] }
 0xc7a   : > { %v4304_v39 = vld [vmem:[%s5375_s9 + $0xe8] sm:$0xff]  }
 0xc7b   : > { %v1527_v0 = vsel %vm473_vm1, %v1525_v62, 0.0  ;;  %v1526_v2 = vmul.f32 %v1524_v61, %v1524_v61  ;;  %v3743_v62 = vcombine.low %v1562_v47, %v1570_v48  ;;  %v4305_v40 = vld [vmem:[%s5375_s9 + $0x28] sm:$0xff]   ;;  %v4311_v47 = vld [vmem:[%s5375_s9 + $0x78] sm:$0xff]  }
 0xc7c   : > { %1528 = vadd.xlane.f32.xlu0 %v1527_v0  ;;  %v3745_v0 = vcombine.low %v1563_v49, %v1571_v52  ;;  %v4312_v48 = vld [vmem:[%s5375_s9 + $0xf8] sm:$0xff]  }
 0xc7d   : > { %v1530_v9 = vsel %vm473_vm1, %v1526_v2, 0.0  ;;  %v4313_v49 = vld [vmem:[%s5375_s9 + $0x38] sm:$0xff]  }
 0xc7e   : > { %1531 = vadd.xlane.f32.xlu1 %v1530_v9  ;;  %v4314_v52 = vld [vmem:[%s5375_s9 + $0xb8] sm:$0xff]  }
 0xd09   : > { %v1529_v27 = vpop.xlane.xlu0 %1528 }
 0xd0a   : > { %v1533_v28 = vmul.f32 0.03125, %v1529_v27  ;;  %v4290_v27 = vld [vmem:[%s5375_s9 + $0x88] sm:$0xff]  }
 0xd0b   : > { %v1532_v1 = vpop.xlane.xlu1 %1531 }
 0xd0c   : > { %v1535_v29 = vadd.f32 1e-05, %v1533_v28  ;;  %v1534_v18 = vmul.f32 0.03125, %v1532_v1  ;;  %v4291_v28 = vld [vmem:[%s5375_s9 + $0x50] sm:$0xff]  }
 0xd0d   : > { %v4292_v1 = vld [vmem:[%s5375_s9 + $0xd0] sm:$0xff]  }
 0xd0e   : > { %4444 = vrsqrt.f32 %v1535_v29  ;;  %v1536_v30 = vadd.f32 1e-05, %v1534_v18  ;;  %v4293_v29 = vld [vmem:[%s5375_s9 + $0x10] sm:$0xff]  }
 0xd0f   : > { %v4294_v18 = vld [vmem:[%s5375_s9 + $0x90] sm:$0xff]  }
 0xd10   : > { %4446 = vrsqrt.f32 %v1536_v30  ;;  %v4295_v30 = vld [vmem:[%s5375_s9 + $0x58] sm:$0xff]  }
 0xd18   : > { %v4445_v31 = vpop.eup %4444 }
 0xd19   : > { %v1539_v33 = vmul.f32 %v4445_v31, %v1523_v58  ;;  %v1586_v58 = vld [vmem:[%s5373_s7 + $0xe0] sm:$0xff]  ;;  %v4296_v31 = vld [vmem:[%s5375_s9 + $0xd8] sm:$0xff]  }
 0xd1a   : > { %v4447_v34 = vpop.eup %4446  ;;  %v3760_v2 = vcombine.high %v1578_v57, %v1586_v58  ;;  %v3759_v4 = vcombine.low %v1578_v57, %v1586_v58  ;;  %v4987_v58 = vld [vmem:[%s5374_s8 + $0x8] sm:$0xff] }
 0xd1b   : > { %v1547_v35 = vmul.f32 %v3733_v32, %v1539_v33  ;;  %v1540_v36 = vmul.f32 %v4447_v34, %v1524_v61  ;;  %v1587_v61 = vld [vmem:[%s5373_s7 + $0xe8] sm:$0xff]  ;;  %v4298_v33 = vld [vmem:[%s5375_s9 + $0x98] sm:$0xff]   ;;  %v4299_v34 = vld [vmem:[%s5375_s9 + $0x60] sm:$0xff]  }
 0xd1c   : > { %v3762_v9 = vcombine.high %v1579_v60, %v1587_v61  ;;  %v3761_v5 = vcombine.low %v1579_v60, %v1587_v61 }
 0xd1d   : > { %v1548_v38 = vmul.f32 %v3733_v32, %v1540_v36  ;;  %v4801_v43 = vadd.f32 %v3734_v37, %v1547_v35  ;;  %v4297_v32 = vld [vmem:[%s5375_s9 + $0x18] sm:$0xff]   ;;  %v4300_v35 = vld [vmem:[%s5375_s9 + $0xe0] sm:$0xff]  }
 0xd1e   : > { %v4301_v36 = vld [vmem:[%s5375_s9 + $0x20] sm:$0xff]  }
 0xd1f   : > { %v4803_v63 = vadd.f32 %v3734_v37, %v1548_v38  ;;  %v4302_v37 = vld [vmem:[%s5375_s9 + $0xa0] sm:$0xff]   ;;  %v4303_v38 = vld [vmem:[%s5375_s9 + $0x68] sm:$0xff]  }
 0xd21   : > { %v4807_v44 = vpack.c.bf16 %v4803_v63, %v4801_v43 }
 0xd23   : > { %3767 = vmatmul.mubr.msk.bf16.vlgmr.msra.gmra.mrb[36].mxu0 %vm473_vm1, %v4807_v44  ;;  %3768 = vmatmul.mubr.msk.bf16.vlgmr.msra.gmra.mrb[36].mxu1 %vm473_vm1, %v4807_v44 }
 0xd24   : > { %1924 = vmatpush1.bf16.msra.mxu0 %v3739_v24  ;;  %1967 = vmatpush1.bf16.msra.mxu1 %v3741_v25  ;;  %v4286_v24 = vld [vmem:[%s5375_s9 + $0x80] sm:$0xff]   ;;  %v4287_v25 = vld [vmem:[%s5375_s9 + $0x48] sm:$0xff]  }
 0xd25   : > { %1925 = vmatprep.subr.bf16.mxu0 %v3756_v45  ;;  %1968 = vmatprep.subr.bf16.mxu1 %v3758_v59  ;;  %v4309_v45 = vld [vmem:[%s5375_s9 + $0x30] sm:$0xff]  }
 0xd26   : > { %1955 = vmatprep.mubr.bf16.mxu0 %v4477_v21  ;;  %1998 = vmatprep.mubr.bf16.mxu1 %v4477_v21  ;;  %v4310_v59 = vld [vmem:[%s5375_s9 + $0xb0] sm:$0xff]  }
 0xd28   : > { %1926 = vmatpush1.bf16.msra.mxu0 %v3755_v53  ;;  %1969 = vmatpush1.bf16.msra.mxu1 %v3757_v54  ;;  %v4315_v53 = vld [vmem:[%s5375_s9 + $0x140] sm:$0xff]  }
 0xd29   : > { %2009 = vmatprep.subr.bf16.mxu0 %v3744_v55  ;;  %2052 = vmatprep.subr.bf16.mxu1 %v3746_v56  ;;  %v4316_v54 = vld [vmem:[%s5375_s9 + $0x1c0] sm:$0xff]   ;;  %v1594_v55 = vlaneseq }
 0xd2b   : > { %3769 = vmatmul.mubr.msk.bf16.vlgmr.msra.gmra.mrb[40].mxu0 %vm473_vm1, %v4807_v44  ;;  %3770 = vmatmul.mubr.msk.bf16.vlgmr.msra.gmra.mrb[40].mxu1 %vm473_vm1, %v4807_v44  ;;  %v4981_v56 = vshrl.u32 %v1594_v55, 7 }
 0xd2c   : > { %2010 = vmatpush1.bf16.msra.mxu0 %v3743_v62  ;;  %2053 = vmatpush1.bf16.msra.mxu1 %v3745_v0  ;;  %v1590_v0 = vld [vmem:[%s5374_s8] sm:$0xff] }
 0xd2d   : > { %2011 = vmatprep.subr.bf16.mxu0 %v3760_v2  ;;  %2054 = vmatprep.subr.bf16.mxu1 %v3762_v9  ;;  %v1620_v57 = vsub.s32 6, %v4981_v56  ;;  %v1596_v61 = vsub.s32 0, %v4981_v56  ;;  %v1604_v62 = vsub.s32 2, %v4981_v56  ;;  %v1600_v2 = vsub.s32 1, %v4981_v56 }
 0xd2e   : > { %2041 = vmatprep.mubr.bf16.mxu0 %v4477_v21  ;;  %2084 = vmatprep.mubr.bf16.mxu1 %v4477_v21  ;;  %v1608_v9 = vsub.s32 3, %v4981_v56  ;;  %v1624_v8 = vsub.s32 7, %v4981_v56 }
 0xd2f   : > { %v4990_v60 = vrot.slane %v4987_v58, %v1620_v57  ;;  %v1597_v46 = vrot.slane %v1590_v0, %v1596_v61  ;;  %v1605_v50 = vrot.slane %v1590_v0, %v1604_v62  ;;  %v1601_v51 = vrot.slane %v1590_v0, %v1600_v2 }
 0xd30   : > { %2012 = vmatpush1.bf16.msra.mxu0 %v3759_v4  ;;  %2055 = vmatpush1.bf16.msra.mxu1 %v3761_v5  ;;  %v1609_v3 = vrot.slane %v1590_v0, %v1608_v9  ;;  %v1612_v4 = vsub.s32 4, %v4981_v56 }
 0xd31   : > { %2095 = vmatprep.subr.bf16.mxu0 %v3748_v6  ;;  %2138 = vmatprep.subr.bf16.mxu1 %v3750_v7  ;;  %v1616_v7 = vsub.s32 5, %v4981_v56 }
 0xd33   : > { %3771 = vmatmul.mubr.msk.bf16.vlgmr.msra.gmra.mrb[44].mxu0 %vm473_vm1, %v4807_v44  ;;  %3772 = vmatmul.mubr.msk.bf16.vlgmr.msra.gmra.mrb[44].mxu1 %vm473_vm1, %v4807_v44 }
 0xd34   : > { %2096 = vmatpush1.bf16.msra.mxu0 %v3747_v14  ;;  %2139 = vmatpush1.bf16.msra.mxu1 %v3749_v12 }
 0xd35   : > { %2097 = vmatprep.subr.bf16.mxu0 %v3764_v15  ;;  %2140 = vmatprep.subr.bf16.mxu1 %v3766_v16 }
 0xd36   : > { %2127 = vmatprep.mubr.bf16.mxu0 %v4477_v21  ;;  %2170 = vmatprep.mubr.bf16.mxu1 %v4477_v21  ;;  %v4288_v21 = vld [vmem:[%s5375_s9 + $0xc8] sm:$0xff]  }
 0xd38   : > { %2098 = vmatpush1.bf16.msra.mxu0 %v3763_v20  ;;  %2141 = vmatpush1.bf16.msra.mxu1 %v3765_v17 }
 0xd39   : > { %3950 = vmatprep.subr.bf16.mxu0 %v4283_v19  ;;  %3972 = vmatprep.subr.bf16.mxu1 %v4284_v22 }
 0xd3b   : > { %3773 = vmatmul.mubr.msk.bf16.vlgmr.msra.gmra.mrb[48].mxu0 %vm473_vm1, %v4807_v44  ;;  %3774 = vmatmul.mubr.msk.bf16.vlgmr.msra.gmra.mrb[48].mxu1 %vm473_vm1, %v4807_v44  ;;  %v4308_v44 = vld [vmem:[%s5375_s9 + $0xf0] sm:$0xff]  }
 0xd3c   : > { %3951 = vmatpush3.bf16.msra.mxu0 %v4285_v23  ;;  %3973 = vmatpush3.bf16.msra.mxu1 %v4286_v24  ;;  %v1613_v24 = vrot.slane %v1590_v0, %v1612_v4 }
 0xd3d   : > { %3952 = vmatprep.subr.bf16.mxu0 %v4287_v25  ;;  %3974 = vmatprep.subr.bf16.mxu1 %v4288_v21  ;;  %v1621_v25 = vrot.slane %v1590_v0, %v1620_v57 }
 0xd40   : > { %3953 = vmatpush3.bf16.msra.mxu0 %v4289_v26  ;;  %3975 = vmatpush3.bf16.msra.mxu1 %v4290_v27  ;;  %v1617_v27 = vrot.slane %v1590_v0, %v1616_v7 }
 0xd41   : > { %3954 = vmatprep.subr.bf16.mxu0 %v4291_v28  ;;  %3976 = vmatprep.subr.bf16.mxu1 %v4292_v1  ;;  %v1625_v28 = vrot.slane %v1590_v0, %v1624_v8  ;;  %v1637_v0 = vrot.slane %v4987_v58, %v1604_v62  ;;  %v4322_v62 = vld [vmem:[%s5375_s9 + $0x188] sm:$0xff]  }
 0xd44   : > { %3955 = vmatpush3.bf16.msra.mxu0 %v4293_v29  ;;  %3977 = vmatpush3.bf16.msra.mxu1 %v4294_v18 }
 0xd45   : > { %3956 = vmatprep.subr.bf16.mxu0 %v4295_v30  ;;  %3978 = vmatprep.subr.bf16.mxu1 %v4296_v31 }
 0xd48   : > { %3957 = vmatpush3.bf16.msra.mxu0 %v4297_v32  ;;  %3979 = vmatpush3.bf16.msra.mxu1 %v4298_v33 }
 0xd49   : > { %3958 = vmatprep.subr.bf16.mxu0 %v4299_v34  ;;  %3980 = vmatprep.subr.bf16.mxu1 %v4300_v35 }
 0xd4c   : > { %3959 = vmatpush3.bf16.msra.mxu0 %v4301_v36  ;;  %3981 = vmatpush3.bf16.msra.mxu1 %v4302_v37 }
 0xd4d   : > { %3960 = vmatprep.subr.bf16.mxu0 %v4303_v38  ;;  %3982 = vmatprep.subr.bf16.mxu1 %v4304_v39 }
 0xd50   : > { %3961 = vmatpush3.bf16.msra.mxu0 %v4305_v40  ;;  %3983 = vmatpush3.bf16.msra.mxu1 %v4306_v41  ;;  %v4317_v41 = vld [vmem:[%s5375_s9 + $0x100] sm:$0xff]  }
 0xd51   : > { %3962 = vmatprep.subr.bf16.mxu0 %v4307_v42  ;;  %3984 = vmatprep.subr.bf16.mxu1 %v4308_v44  ;;  %v4318_v42 = vld [vmem:[%s5375_s9 + $0x180] sm:$0xff]  }
 0xd54   : > { %3963 = vmatpush3.bf16.msra.mxu0 %v4309_v45  ;;  %3985 = vmatpush3.bf16.msra.mxu1 %v4310_v59 }
 0xd55   : > { %3964 = vmatprep.subr.bf16.mxu0 %v4311_v47  ;;  %3986 = vmatprep.subr.bf16.mxu1 %v4312_v48  ;;  %v4319_v48 = vld [vmem:[%s5375_s9 + $0x148] sm:$0xff]  }
 0xd58   : > { %3965 = vmatpush3.bf16.msra.mxu0 %v4313_v49  ;;  %3987 = vmatpush3.bf16.msra.mxu1 %v4314_v52  ;;  %v4320_v49 = vld [vmem:[%s5375_s9 + $0x1c8] sm:$0xff]   ;;  %v1629_v52 = vrot.slane %v4987_v58, %v1596_v61 }
 0xd59   : > { %3994 = vmatprep.subr.bf16.mxu0 %v4315_v53  ;;  %4016 = vmatprep.subr.bf16.mxu1 %v4316_v54 }
 0xdf6   : > { %v1871_v5 = vpop.f32.mrb[36].mxu0  ;;  %v1914_v6 = vpop.f32.mrb[36].mxu1 }
 0xdf7   : > { %v1872_v10 = vadd.f32 %v1871_v5, %v1597_v46  ;;  %v1915_v11 = vadd.f32 %v1914_v6, %v1605_v50  ;;  %v1873_v13 = vpop.f32.mrb[37].mxu0  ;;  %v1916_v14 = vpop.f32.mrb[37].mxu1  ;;  %v1633_v5 = vrot.slane %v4987_v58, %v1600_v2 }
 0xdf8   : > { %v1874_v12 = vadd.f32 %v1873_v13, %v1601_v51  ;;  %v1917_v15 = vadd.f32 %v1916_v14, %v1609_v3  ;;  %v1875_v16 = vpop.f32.mrb[38].mxu0  ;;  %v1918_v20 = vpop.f32.mrb[38].mxu1 }
 0xdf9   : > { %v1876_v17 = vadd.f32 %v1875_v16, %v1597_v46  ;;  %v1919_v19 = vadd.f32 %v1918_v20, %v1605_v50  ;;  %v1877_v22 = vpop.f32.mrb[39].mxu0  ;;  %v1920_v23 = vpop.f32.mrb[39].mxu1  ;;  %v2181_v1 = vmax.f32 %v1872_v10, 0.0  ;;  %v2183_v29 = vmax.f32 %v1915_v11, 0.0  ;;  %v4321_v10 = vld [vmem:[%s5375_s9 + $0x108] sm:$0xff]   ;;  %v4324_v16 = vld [vmem:[%s5375_s9 + $0x1d0] sm:$0xff]  }
 0xdfa   : > { %v1878_v21 = vadd.f32 %v1877_v22, %v1601_v51  ;;  %v1921_v26 = vadd.f32 %v1920_v23, %v1609_v3  ;;  %v2182_v31 = vmax.f32 %v1874_v12, 0.0  ;;  %v2184_v32 = vmax.f32 %v1917_v15, 0.0  ;;  %v4323_v15 = vld [vmem:[%s5375_s9 + $0x150] sm:$0xff]  }
 0xdfb   : > { %v2197_v18 = vmax.f32 %v1876_v17, 0.0  ;;  %v2199_v30 = vmax.f32 %v1919_v19, 0.0  ;;  %v1641_v11 = vrot.slane %v4987_v58, %v1608_v9 }
 0xdfc   : > { %v2198_v33 = vmax.f32 %v1878_v21, 0.0  ;;  %v2200_v34 = vmax.f32 %v1921_v26, 0.0 }
 0xdfd   : > { %v2213_v35 = vpack.c.bf16 %v2197_v18, %v2181_v1  ;;  %v2215_v36 = vpack.c.bf16 %v2199_v30, %v2183_v29 }
 0xdfe   : > { %v2214_v37 = vpack.c.bf16 %v2198_v33, %v2182_v31  ;;  %v2216_v38 = vpack.c.bf16 %v2200_v34, %v2184_v32  ;;  %v1957_v39 = vpop.f32.mrb[40].mxu0  ;;  %v2000_v40 = vpop.f32.mrb[40].mxu1  ;;  %v4327_v31 = vld [vmem:[%s5375_s9 + $0x158] sm:$0xff]  }
 0xdff   : > { %v1958_v44 = vadd.f32 %v1957_v39, %v1613_v24  ;;  %v2001_v45 = vadd.f32 %v2000_v40, %v1621_v25  ;;  %v1959_v59 = vpop.f32.mrb[41].mxu0  ;;  %v2002_v47 = vpop.f32.mrb[41].mxu1  ;;  %v4328_v32 = vld [vmem:[%s5375_s9 + $0x1d8] sm:$0xff]  }
 0xe00   : > { %v1960_v53 = vadd.f32 %v1959_v59, %v1617_v27  ;;  %v2003_v54 = vadd.f32 %v2002_v47, %v1625_v28  ;;  %v1961_v55 = vpop.f32.mrb[42].mxu0  ;;  %v2004_v57 = vpop.f32.mrb[42].mxu1  ;;  %3292 = vmatprep.mubr.bf16.mxu0 %v2214_v37  ;;  %3333 = vmatprep.mubr.bf16.mxu1 %v2216_v38  ;;  %v4329_v59 = vld [vmem:[%s5375_s9 + $0x118] sm:$0xff]  }
 0xe01   : > { %v1962_v46 = vadd.f32 %v1961_v55, %v1613_v24  ;;  %v2005_v50 = vadd.f32 %v2004_v57, %v1621_v25  ;;  %v1963_v51 = vpop.f32.mrb[43].mxu0  ;;  %v2006_v3 = vpop.f32.mrb[43].mxu1  ;;  %3293 = vmatmul.mubr.bf16.vlgmr.msra.gmra.mrb[52].mxu0 %v2213_v35  ;;  %3334 = vmatmul.mubr.bf16.vlgmr.msra.gmra.mrb[52].mxu1 %v2215_v36  ;;  %v2185_v13 = vmax.f32 %v1958_v44, 0.0  ;;  %v2187_v14 = vmax.f32 %v2001_v45, 0.0  ;;  %v4330_v47 = vld [vmem:[%s5375_s9 + $0x198] sm:$0xff]  }
 0xe02   : > { %v1964_v6 = vadd.f32 %v1963_v51, %v1617_v27  ;;  %v2007_v61 = vadd.f32 %v2006_v3, %v1625_v28  ;;  %3995 = vmatpush3.bf16.msra.mxu0 %v4317_v41  ;;  %4017 = vmatpush3.bf16.msra.mxu1 %v4318_v42  ;;  %v2186_v20 = vmax.f32 %v1960_v53, 0.0  ;;  %v2188_v17 = vmax.f32 %v2003_v54, 0.0  ;;  %v4325_v27 = vld [vmem:[%s5375_s9 + $0x110] sm:$0xff]   ;;  %v4331_v53 = vld [vmem:[%s5375_s9 + $0x160] sm:$0xff]  }
 0xe03   : > { %v2201_v12 = vmax.f32 %v1962_v46, 0.0  ;;  %v2203_v2 = vmax.f32 %v2005_v50, 0.0  ;;  %3996 = vmatprep.subr.bf16.mxu0 %v4319_v48  ;;  %4018 = vmatprep.subr.bf16.mxu1 %v4320_v49  ;;  %v4326_v28 = vld [vmem:[%s5375_s9 + $0x190] sm:$0xff]   ;;  %v1645_v41 = vrot.slane %v4987_v58, %v1612_v4  ;;  %v1649_v42 = vrot.slane %v4987_v58, %v1616_v7  ;;  %v4332_v54 = vld [vmem:[%s5375_s9 + $0x1e0] sm:$0xff]  }
 0xe04   : > { %v2202_v19 = vmax.f32 %v1964_v6, 0.0  ;;  %v2204_v22 = vmax.f32 %v2007_v61, 0.0  ;;  %v1657_v4 = vrot.slane %v4987_v58, %v1624_v8  ;;  %v4334_v6 = vld [vmem:[%s5375_s9 + $0x1a0] sm:$0xff]  }
 0xe05   : > { %v5044_v23 = vpack.c.bf16 %v2201_v12, %v2185_v13  ;;  %v5046_v9 = vpack.c.bf16 %v2203_v2, %v2187_v14  ;;  %v4335_v13 = vld [vmem:[%s5375_s9 + $0x168] sm:$0xff]  }
 0xe06   : > { %v2218_v24 = vpack.c.bf16 %v2202_v19, %v2186_v20  ;;  %v2220_v25 = vpack.c.bf16 %v2204_v22, %v2188_v17  ;;  %3997 = vmatpush3.bf16.msra.mxu0 %v4321_v10  ;;  %4019 = vmatpush3.bf16.msra.mxu1 %v4322_v62  ;;  %v2043_v21 = vpop.f32.mrb[44].mxu0  ;;  %v2086_v26 = vpop.f32.mrb[44].mxu1  ;;  %v4336_v14 = vld [vmem:[%s5375_s9 + $0x1e8] sm:$0xff]  }
 0xe07   : > { %v2044_v1 = vadd.f32 %v2043_v21, %v1629_v52  ;;  %v2087_v29 = vadd.f32 %v2086_v26, %v1637_v0  ;;  %v2045_v18 = vpop.f32.mrb[45].mxu0  ;;  %v2088_v30 = vpop.f32.mrb[45].mxu1  ;;  %3998 = vmatprep.subr.bf16.mxu0 %v4323_v15  ;;  %4020 = vmatprep.subr.bf16.mxu1 %v4324_v16  ;;  %v4337_v21 = vld [vmem:[%s5375_s9 + $0x128] sm:$0xff]  }
 0xe08   : > { %v2046_v33 = vadd.f32 %v2045_v18, %v1633_v5  ;;  %v2089_v34 = vadd.f32 %v2088_v30, %v1641_v11  ;;  %v2047_v35 = vpop.f32.mrb[46].mxu0  ;;  %v2090_v36 = vpop.f32.mrb[46].mxu1  ;;  %3374 = vmatprep.mubr.bf16.mxu0 %v2218_v24  ;;  %3415 = vmatprep.mubr.bf16.mxu1 %v2220_v25  ;;  %v4338_v26 = vld [vmem:[%s5375_s9 + $0x1a8] sm:$0xff]   ;;  %v4340_v18 = vld [vmem:[%s5375_s9 + $0x1f0] sm:$0xff]  }
 0xe09   : > { %v2048_v37 = vadd.f32 %v2047_v35, %v1629_v52  ;;  %v2091_v38 = vadd.f32 %v2090_v36, %v1637_v0  ;;  %v2049_v39 = vpop.f32.mrb[47].mxu0  ;;  %v2092_v40 = vpop.f32.mrb[47].mxu1  ;;  %v2189_v48 = vmax.f32 %v2044_v1, 0.0  ;;  %v2191_v49 = vmax.f32 %v2087_v29, 0.0 }
 0xe0a   : > { %v2050_v44 = vadd.f32 %v2049_v39, %v1633_v5  ;;  %v2093_v45 = vadd.f32 %v2092_v40, %v1641_v11  ;;  %3999 = vmatpush3.bf16.msra.mxu0 %v4325_v27  ;;  %4021 = vmatpush3.bf16.msra.mxu1 %v4326_v28  ;;  %v2190_v55 = vmax.f32 %v2046_v33, 0.0  ;;  %v2192_v57 = vmax.f32 %v2089_v34, 0.0  ;;  %v4333_v5 = vld [vmem:[%s5375_s9 + $0x120] sm:$0xff]   ;;  %v4342_v39 = vld [vmem:[%s5375_s9 + $0x1b0] sm:$0xff]   ;;  %v4343_v40 = vld [vmem:[%s5375_s9 + $0x178] sm:$0xff]  }
 0xe0b   : > { %v2205_v52 = vmax.f32 %v2048_v37, 0.0  ;;  %v2207_v7 = vmax.f32 %v2091_v38, 0.0  ;;  %4000 = vmatprep.subr.bf16.mxu0 %v4327_v31  ;;  %4022 = vmatprep.subr.bf16.mxu1 %v4328_v32  ;;  %v4341_v38 = vld [vmem:[%s5375_s9 + $0x130] sm:$0xff]  }
 0xe0c   : > { %v2206_v0 = vmax.f32 %v2050_v44, 0.0  ;;  %v2208_v56 = vmax.f32 %v2093_v45, 0.0  ;;  %v4346_v44 = vld [vmem:[%s5375_s9 + $0x1b8] sm:$0xff]   ;;  %v4347_v45 = vld [vmem:[%s5375_s9 + $0x240] sm:$0xff]  }
 0xe0d   : > { %v5081_v46 = vpack.c.bf16 %v2205_v52, %v2189_v48  ;;  %v5083_v58 = vpack.c.bf16 %v2207_v7, %v2191_v49  ;;  %v4351_v48 = vld [vmem:[%s5375_s9 + $0x248] sm:$0xff]  }
 0xe0e   : > { %v5085_v8 = vpack.c.bf16 %v2206_v0, %v2190_v55  ;;  %v5087_v50 = vpack.c.bf16 %v2208_v56, %v2192_v57  ;;  %4001 = vmatpush3.bf16.msra.mxu0 %v4329_v59  ;;  %4023 = vmatpush3.bf16.msra.mxu1 %v4330_v47  ;;  %v2129_v51 = vpop.f32.mrb[48].mxu0  ;;  %v2172_v3 = vpop.f32.mrb[48].mxu1  ;;  %v4348_v59 = vld [vmem:[%s5375_s9 + $0x2c0] sm:$0xff]   ;;  %v4352_v49 = vld [vmem:[%s5375_s9 + $0x2c8] sm:$0xff]   ;;  %v4359_v55 = vld [vmem:[%s5375_s9 + $0x258] sm:$0xff]  }
 0xe0f   : > { %v2130_v61 = vadd.f32 %v2129_v51, %v1645_v41  ;;  %v2173_v10 = vadd.f32 %v2172_v3, %v4990_v60  ;;  %v2131_v62 = vpop.f32.mrb[49].mxu0  ;;  %v2174_v11 = vpop.f32.mrb[49].mxu1  ;;  %4002 = vmatprep.subr.bf16.mxu0 %v4331_v53  ;;  %4024 = vmatprep.subr.bf16.mxu1 %v4332_v54  ;;  %v4349_v47 = vld [vmem:[%s5375_s9 + $0x200] sm:$0xff]   ;;  %v4353_v52 = vld [vmem:[%s5375_s9 + $0x208] sm:$0xff]   ;;  %v4357_v53 = vld [vmem:[%s5375_s9 + $0x210] sm:$0xff]  }
 0xe10   : > { %v2132_v12 = vadd.f32 %v2131_v62, %v1649_v42  ;;  %v2175_v2 = vadd.f32 %v2174_v11, %v1657_v4  ;;  %v2133_v15 = vpop.f32.mrb[50].mxu0  ;;  %v2176_v16 = vpop.f32.mrb[50].mxu1  ;;  %v4354_v7 = vld [vmem:[%s5375_s9 + $0x288] sm:$0xff]   ;;  %v4358_v54 = vld [vmem:[%s5375_s9 + $0x290] sm:$0xff]   ;;  %v4360_v57 = vld [vmem:[%s5375_s9 + $0x2d8] sm:$0xff]  }
 0xe11   : > { %v2134_v20 = vadd.f32 %v2133_v15, %v1645_v41  ;;  %v2177_v17 = vadd.f32 %v2176_v16, %v4990_v60  ;;  %v2135_v19 = vpop.f32.mrb[51].mxu0  ;;  %v2178_v22 = vpop.f32.mrb[51].mxu1  ;;  %v2193_v27 = vmax.f32 %v2130_v61, 0.0  ;;  %v2195_v28 = vmax.f32 %v2173_v10, 0.0  ;;  %v4339_v60 = vld [vmem:[%s5375_s9 + $0x170] sm:$0xff]   ;;  %v4344_v41 = vld [vmem:[%s5375_s9 + $0x1f8] sm:$0xff]  }
 0xe12   : > { %v2136_v24 = vadd.f32 %v2135_v19, %v1649_v42  ;;  %v2179_v25 = vadd.f32 %v2178_v22, %v1657_v4  ;;  %4003 = vmatpush3.bf16.msra.mxu0 %v4333_v5  ;;  %4025 = vmatpush3.bf16.msra.mxu1 %v4334_v6  ;;  %v2194_v30 = vmax.f32 %v2132_v12, 0.0  ;;  %v2196_v31 = vmax.f32 %v2175_v2, 0.0  ;;  %v4345_v42 = vld [vmem:[%s5375_s9 + $0x138] sm:$0xff]   ;;  %v4350_v4 = vld [vmem:[%s5375_s9 + $0x280] sm:$0xff]   ;;  %v4367_v5 = vld [vmem:[%s5375_s9 + $0x268] sm:$0xff]  }
 0xe13   : > { %v2209_v1 = vmax.f32 %v2134_v20, 0.0  ;;  %v2211_v29 = vmax.f32 %v2177_v17, 0.0  ;;  %4004 = vmatprep.subr.bf16.mxu0 %v4335_v13  ;;  %4026 = vmatprep.subr.bf16.mxu1 %v4336_v14  ;;  %v4361_v0 = vld [vmem:[%s5375_s9 + $0x218] sm:$0xff]   ;;  %v4365_v51 = vld [vmem:[%s5375_s9 + $0x220] sm:$0xff]   ;;  %v4368_v6 = vld [vmem:[%s5375_s9 + $0x2e8] sm:$0xff]  }
 0xe14   : > { %v2210_v32 = vmax.f32 %v2136_v24, 0.0  ;;  %v2212_v33 = vmax.f32 %v2179_v25, 0.0  ;;  %v4362_v56 = vld [vmem:[%s5375_s9 + $0x298] sm:$0xff]   ;;  %v4366_v3 = vld [vmem:[%s5375_s9 + $0x2a0] sm:$0xff]   ;;  %v4369_v61 = vld [vmem:[%s5375_s9 + $0x228] sm:$0xff]  }
 0xe15   : > { %v5115_v34 = vpack.c.bf16 %v2209_v1, %v2193_v27  ;;  %v5117_v35 = vpack.c.bf16 %v2211_v29, %v2195_v28  ;;  %v4370_v10 = vld [vmem:[%s5375_s9 + $0x2a8] sm:$0xff]   ;;  %v4371_v62 = vld [vmem:[%s5375_s9 + $0x270] sm:$0xff]   ;;  %v4375_v12 = vld [vmem:[%s5375_s9 + $0x278] sm:$0xff]  }
 0xe16   : > { %v5119_v36 = vpack.c.bf16 %v2210_v32, %v2194_v30  ;;  %v5121_v37 = vpack.c.bf16 %v2212_v33, %v2196_v31  ;;  %4005 = vmatpush3.bf16.msra.mxu0 %v4337_v21  ;;  %4027 = vmatpush3.bf16.msra.mxu1 %v4338_v26  ;;  %v4372_v11 = vld [vmem:[%s5375_s9 + $0x2f0] sm:$0xff]   ;;  %v4376_v2 = vld [vmem:[%s5375_s9 + $0x2f8] sm:$0xff]   ;;  %v4379_v20 = vld [vmem:[%s5375_s9 + $0x340] sm:$0xff]  }
 0xe17   : > { %4006 = vmatprep.subr.bf16.mxu0 %v4339_v60  ;;  %4028 = vmatprep.subr.bf16.mxu1 %v4340_v18  ;;  %v4373_v13 = vld [vmem:[%s5375_s9 + $0x230] sm:$0xff]   ;;  %v4377_v15 = vld [vmem:[%s5375_s9 + $0x238] sm:$0xff]   ;;  %v4380_v17 = vld [vmem:[%s5375_s9 + $0x3c0] sm:$0xff]  }
 0xe18   : > { %v4374_v14 = vld [vmem:[%s5375_s9 + $0x2b0] sm:$0xff]   ;;  %v4378_v16 = vld [vmem:[%s5375_s9 + $0x2b8] sm:$0xff]   ;;  %v4381_v19 = vld [vmem:[%s5375_s9 + $0x300] sm:$0xff]  }
 0xe19   : > { %v4382_v22 = vld [vmem:[%s5375_s9 + $0x380] sm:$0xff]   ;;  %v4383_v24 = vld [vmem:[%s5375_s9 + $0x348] sm:$0xff]   ;;  %v4389_v27 = vld [vmem:[%s5375_s9 + $0x310] sm:$0xff]  }
 0xe1a   : > { %4007 = vmatpush3.bf16.msra.mxu0 %v4341_v38  ;;  %4029 = vmatpush3.bf16.msra.mxu1 %v4342_v39  ;;  %v4384_v25 = vld [vmem:[%s5375_s9 + $0x3c8] sm:$0xff]   ;;  %v4390_v28 = vld [vmem:[%s5375_s9 + $0x390] sm:$0xff]   ;;  %v4391_v1 = vld [vmem:[%s5375_s9 + $0x358] sm:$0xff]  }
 0xe1b   : > { %4008 = vmatprep.subr.bf16.mxu0 %v4343_v40  ;;  %4030 = vmatprep.subr.bf16.mxu1 %v4344_v41  ;;  %v4385_v21 = vld [vmem:[%s5375_s9 + $0x308] sm:$0xff]   ;;  %v4392_v29 = vld [vmem:[%s5375_s9 + $0x3d8] sm:$0xff]   ;;  %v4395_v30 = vld [vmem:[%s5375_s9 + $0x360] sm:$0xff]  }
 0xe1c   : > { %v4386_v26 = vld [vmem:[%s5375_s9 + $0x388] sm:$0xff]   ;;  %v4393_v60 = vld [vmem:[%s5375_s9 + $0x318] sm:$0xff]   ;;  %v4396_v31 = vld [vmem:[%s5375_s9 + $0x3e0] sm:$0xff]  }
 0xe1d   : > { %v4394_v18 = vld [vmem:[%s5375_s9 + $0x398] sm:$0xff]   ;;  %v4397_v32 = vld [vmem:[%s5375_s9 + $0x320] sm:$0xff]   ;;  %v4401_v38 = vld [vmem:[%s5375_s9 + $0x328] sm:$0xff]  }
 0xe1e   : > { %4009 = vmatpush3.bf16.msra.mxu0 %v4345_v42  ;;  %4031 = vmatpush3.bf16.msra.mxu1 %v4346_v44  ;;  %v4398_v33 = vld [vmem:[%s5375_s9 + $0x3a0] sm:$0xff]   ;;  %v4402_v39 = vld [vmem:[%s5375_s9 + $0x3a8] sm:$0xff]   ;;  %v4403_v40 = vld [vmem:[%s5375_s9 + $0x370] sm:$0xff]  }
 0xe1f   : > { %4038 = vmatprep.subr.bf16.mxu0 %v4347_v45  ;;  %4060 = vmatprep.subr.bf16.mxu1 %v4348_v59  ;;  %v4404_v41 = vld [vmem:[%s5375_s9 + $0x3f0] sm:$0xff]   ;;  %v4407_v45 = vld [vmem:[%s5375_s9 + $0x378] sm:$0xff]  }
 0xe20   : > { %v4405_v42 = vld [vmem:[%s5375_s9 + $0x330] sm:$0xff]   ;;  %v4408_v59 = vld [vmem:[%s5375_s9 + $0x3f8] sm:$0xff]  }
 0xe21   : > { %3375 = vmatmul.mubr.bf16.vlgmr.msra.gmra.mrb[56].mxu0 %v5044_v23  ;;  %3416 = vmatmul.mubr.bf16.vlgmr.msra.gmra.mrb[56].mxu1 %v5046_v9  ;;  %v4355_v23 = vld [vmem:[%s5375_s9 + $0x250] sm:$0xff]  }
 0xe22   : > { %4039 = vmatpush3.bf16.msra.mxu0 %v4349_v47  ;;  %3456 = vmatprep.mubr.bf16.mxu0 %v5085_v8  ;;  %v4356_v9 = vld [vmem:[%s5375_s9 + $0x2d0] sm:$0xff]   ;;  %v4363_v8 = vld [vmem:[%s5375_s9 + $0x260] sm:$0xff]   ;;  %v4409_v47 = vld [vmem:[%s5375_s9 + $0x338] sm:$0xff]  }
 0xe23   : > { %4061 = vmatpush3.bf16.msra.mxu1 %v4350_v4  ;;  %3497 = vmatprep.mubr.bf16.mxu1 %v5087_v50  ;;  %v4364_v50 = vld [vmem:[%s5375_s9 + $0x2e0] sm:$0xff]   ;;  %v4406_v44 = vld [vmem:[%s5375_s9 + $0x3b0] sm:$0xff]   ;;  %v4410_v4 = vld [vmem:[%s5375_s9 + $0x3b8] sm:$0xff]  }
 0xe24   : > { %4040 = vmatprep.subr.bf16.mxu0 %v4351_v48  ;;  %4062 = vmatprep.subr.bf16.mxu1 %v4352_v49 }
 0xe26   : > { %4041 = vmatpush3.bf16.msra.mxu0 %v4353_v52  ;;  %v3775_v52 = vld [vmem:[%s5376_s10] ss:$0 sm:$0xff] }
 0xe27   : > { %4063 = vmatpush3.bf16.msra.mxu1 %v4354_v7  ;;  %4042 = vmatprep.subr.bf16.mxu0 %v4355_v23 }
 0xe28   : > { %4064 = vmatprep.subr.bf16.mxu1 %v4356_v9 }
 0xe2a   : > { %4043 = vmatpush3.bf16.msra.mxu0 %v4357_v53 }
 0xe2b   : > { %4065 = vmatpush3.bf16.msra.mxu1 %v4358_v54  ;;  %4044 = vmatprep.subr.bf16.mxu0 %v4359_v55 }
 0xe2c   : > { %4066 = vmatprep.subr.bf16.mxu1 %v4360_v57 }
 0xe2e   : > { %4045 = vmatpush3.bf16.msra.mxu0 %v4361_v0 }
 0xe2f   : > { %4067 = vmatpush3.bf16.msra.mxu1 %v4362_v56  ;;  %4046 = vmatprep.subr.bf16.mxu0 %v4363_v8 }
 0xe30   : > { %4068 = vmatprep.subr.bf16.mxu1 %v4364_v50 }
 0xe32   : > { %4047 = vmatpush3.bf16.msra.mxu0 %v4365_v51 }
 0xe33   : > { %4069 = vmatpush3.bf16.msra.mxu1 %v4366_v3  ;;  %4048 = vmatprep.subr.bf16.mxu0 %v4367_v5 }
 0xe34   : > { %4070 = vmatprep.subr.bf16.mxu1 %v4368_v6 }
 0xe36   : > { %4049 = vmatpush3.bf16.msra.mxu0 %v4369_v61 }
 0xe37   : > { %4071 = vmatpush3.bf16.msra.mxu1 %v4370_v10  ;;  %4050 = vmatprep.subr.bf16.mxu0 %v4371_v62 }
 0xe38   : > { %4072 = vmatprep.subr.bf16.mxu1 %v4372_v11 }
 0xe3a   : > { %4051 = vmatpush3.bf16.msra.mxu0 %v4373_v13 }
 0xe3b   : > { %4073 = vmatpush3.bf16.msra.mxu1 %v4374_v14  ;;  %4052 = vmatprep.subr.bf16.mxu0 %v4375_v12 }
 0xe3c   : > { %4074 = vmatprep.subr.bf16.mxu1 %v4376_v2 }
 0xe3e   : > { %4053 = vmatpush3.bf16.msra.mxu0 %v4377_v15 }
 0xe3f   : > { %4075 = vmatpush3.bf16.msra.mxu1 %v4378_v16  ;;  %4082 = vmatprep.subr.bf16.mxu0 %v4379_v20 }
 0xe40   : > { %4104 = vmatprep.subr.bf16.mxu1 %v4380_v17 }
 0xe41   : > { %3457 = vmatmul.mubr.bf16.vlgmr.msra.gmra.mrb[60].mxu0 %v5081_v46  ;;  %v4387_v46 = vld [vmem:[%s5375_s9 + $0x350] sm:$0xff]  }
 0xe42   : > { %3498 = vmatmul.mubr.bf16.vlgmr.msra.gmra.mrb[60].mxu1 %v5083_v58  ;;  %4083 = vmatpush3.bf16.msra.mxu0 %v4381_v19  ;;  %v4388_v58 = vld [vmem:[%s5375_s9 + $0x3d0] sm:$0xff]  }
 0xe43   : > { %3538 = vmatprep.mubr.bf16.mxu0 %v5119_v36  ;;  %4105 = vmatpush3.bf16.msra.mxu1 %v4382_v22  ;;  %v4399_v36 = vld [vmem:[%s5375_s9 + $0x368] sm:$0xff]  }
 0xe44   : > { %3579 = vmatprep.mubr.bf16.mxu1 %v5121_v37  ;;  %4084 = vmatprep.subr.bf16.mxu0 %v4383_v24  ;;  %v4400_v37 = vld [vmem:[%s5375_s9 + $0x3e8] sm:$0xff]  }
 0xe45   : > { %4106 = vmatprep.subr.bf16.mxu1 %v4384_v25 }
 0xe46   : > { %4085 = vmatpush3.bf16.msra.mxu0 %v4385_v21 }
 0xe47   : > { %4107 = vmatpush3.bf16.msra.mxu1 %v4386_v26  ;;  %4086 = vmatprep.subr.bf16.mxu0 %v4387_v46 }
 0xe48   : > { %4108 = vmatprep.subr.bf16.mxu1 %v4388_v58 }
 0xe4a   : > { %4087 = vmatpush3.bf16.msra.mxu0 %v4389_v27 }
 0xe4b   : > { %4109 = vmatpush3.bf16.msra.mxu1 %v4390_v28  ;;  %4088 = vmatprep.subr.bf16.mxu0 %v4391_v1 }
 0xe4c   : > { %4110 = vmatprep.subr.bf16.mxu1 %v4392_v29 }
 0xe4e   : > { %4089 = vmatpush3.bf16.msra.mxu0 %v4393_v60 }
 0xe4f   : > { %4111 = vmatpush3.bf16.msra.mxu1 %v4394_v18  ;;  %4090 = vmatprep.subr.bf16.mxu0 %v4395_v30 }
 0xe50   : > { %4112 = vmatprep.subr.bf16.mxu1 %v4396_v31 }
 0xe52   : > { %4091 = vmatpush3.bf16.msra.mxu0 %v4397_v32 }
 0xe53   : > { %4113 = vmatpush3.bf16.msra.mxu1 %v4398_v33  ;;  %4092 = vmatprep.subr.bf16.mxu0 %v4399_v36 }
 0xe54   : > { %4114 = vmatprep.subr.bf16.mxu1 %v4400_v37 }
 0xe56   : > { %4093 = vmatpush3.bf16.msra.mxu0 %v4401_v38 }
 0xe57   : > { %4115 = vmatpush3.bf16.msra.mxu1 %v4402_v39  ;;  %4094 = vmatprep.subr.bf16.mxu0 %v4403_v40 }
 0xe58   : > { %4116 = vmatprep.subr.bf16.mxu1 %v4404_v41 }
 0xe5a   : > { %4095 = vmatpush3.bf16.msra.mxu0 %v4405_v42 }
 0xe5b   : > { %4117 = vmatpush3.bf16.msra.mxu1 %v4406_v44  ;;  %4096 = vmatprep.subr.bf16.mxu0 %v4407_v45 }
 0xe5c   : > { %4118 = vmatprep.subr.bf16.mxu1 %v4408_v59 }
 0xe5e   : > { %4097 = vmatpush3.bf16.msra.mxu0 %v4409_v47 }
 0xe5f   : > { %4119 = vmatpush3.bf16.msra.mxu1 %v4410_v4 }
 0xe61   : > { %3539 = vmatmul.mubr.bf16.vlgmr.msra.gmra.mrb[64].mxu0 %v5115_v34 }
 0xe62   : > { %3580 = vmatmul.mubr.bf16.vlgmr.msra.gmra.mrb[64].mxu1 %v5117_v35 }
 0xed4   : > { %v3966_v48 = vpop.f32.mrb[52].mxu0  ;;  %v3988_v49 = vpop.f32.mrb[52].mxu1 }
 0xed5   : > { %v3967_v7 = vpop.f32.mrb[53].mxu0  ;;  %v3989_v23 = vpop.f32.mrb[53].mxu1 }
 0xed6   : > { %v3968_v9 = vadd.f32 %v3967_v7, %v3966_v48  ;;  %v3990_v53 = vadd.f32 %v3989_v23, %v3988_v49  ;;  %v3969_v54 = vpop.f32.mrb[54].mxu0  ;;  %v3991_v55 = vpop.f32.mrb[54].mxu1 }
 0xed7   : > { %v3970_v57 = vpop.f32.mrb[55].mxu0  ;;  %v3992_v0 = vpop.f32.mrb[55].mxu1 }
 0xed8   : > { %v3295_v56 = vadd.f32 %v3968_v9, %v3775_v52  ;;  %v3971_v8 = vadd.f32 %v3970_v57, %v3969_v54  ;;  %v3993_v50 = vadd.f32 %v3992_v0, %v3991_v55 }
 0xeda   : > { %v3336_v34 = vadd.f32 %v3990_v53, %v3295_v56  ;;  %v3298_v51 = vadd.f32 %v3971_v8, %v3775_v52 }
 0xedc   : > { %v3339_v35 = vadd.f32 %v3993_v50, %v3298_v51 }
 0xef4   : > { %v4010_v3 = vpop.f32.mrb[56].mxu0  ;;  %v4032_v5 = vpop.f32.mrb[56].mxu1 }
 0xef5   : > { %v4011_v6 = vpop.f32.mrb[57].mxu0  ;;  %v4033_v61 = vpop.f32.mrb[57].mxu1 }
 0xef6   : > { %v4012_v10 = vadd.f32 %v4011_v6, %v4010_v3  ;;  %v4034_v62 = vadd.f32 %v4033_v61, %v4032_v5  ;;  %v4013_v11 = vpop.f32.mrb[58].mxu0  ;;  %v4035_v13 = vpop.f32.mrb[58].mxu1 }
 0xef7   : > { %v4014_v14 = vpop.f32.mrb[59].mxu0  ;;  %v4036_v12 = vpop.f32.mrb[59].mxu1 }
 0xef8   : > { %v3377_v2 = vadd.f32 %v4012_v10, %v3336_v34  ;;  %v4015_v15 = vadd.f32 %v4014_v14, %v4013_v11  ;;  %v4037_v16 = vadd.f32 %v4036_v12, %v4035_v13  ;;  %v3905_v14 = vld [vmem:[%s5378_s12] ss:$0 sm:$0xff] }
 0xefa   : > { %v3418_v20 = vadd.f32 %v4034_v62, %v3377_v2  ;;  %v3380_v17 = vadd.f32 %v4015_v15, %v3339_v35  ;;  %v3904_v62 = vld [vmem:[%s5377_s11] ss:$0 sm:$0xff] }
 0xefc   : > { %v3421_v19 = vadd.f32 %v4037_v16, %v3380_v17 }
 0xf14   : > { %v4054_v22 = vpop.f32.mrb[60].mxu0 }
 0xf15   : > { %v4076_v24 = vpop.f32.mrb[60].mxu1  ;;  %v4055_v25 = vpop.f32.mrb[61].mxu0 }
 0xf16   : > { %v4056_v21 = vadd.f32 %v4055_v25, %v4054_v22  ;;  %v4077_v26 = vpop.f32.mrb[61].mxu1  ;;  %v4057_v46 = vpop.f32.mrb[62].mxu0 }
 0xf17   : > { %v4078_v58 = vadd.f32 %v4077_v26, %v4076_v24  ;;  %v4079_v27 = vpop.f32.mrb[62].mxu1  ;;  %v4058_v28 = vpop.f32.mrb[63].mxu0 }
 0xf18   : > { %v3459_v1 = vadd.f32 %v4056_v21, %v3418_v20  ;;  %v4059_v29 = vadd.f32 %v4058_v28, %v4057_v46  ;;  %v4080_v60 = vpop.f32.mrb[63].mxu1 }
 0xf19   : > { %v4081_v18 = vadd.f32 %v4080_v60, %v4079_v27 }
 0xf1a   : > { %v3500_v30 = vadd.f32 %v4078_v58, %v3459_v1  ;;  %v3462_v31 = vadd.f32 %v4059_v29, %v3421_v19 }
 0xf1c   : > { %v3503_v32 = vadd.f32 %v4081_v18, %v3462_v31 }
 0xf34   : > { %v4098_v33 = vpop.f32.mrb[64].mxu0 }
 0xf35   : > { %v4120_v36 = vpop.f32.mrb[64].mxu1  ;;  %v4099_v37 = vpop.f32.mrb[65].mxu0 }
 0xf36   : > { %v4100_v38 = vadd.f32 %v4099_v37, %v4098_v33  ;;  %v4121_v39 = vpop.f32.mrb[65].mxu1  ;;  %v4101_v40 = vpop.f32.mrb[66].mxu0 }
 0xf37   : > { %v4122_v41 = vadd.f32 %v4121_v39, %v4120_v36  ;;  %v4123_v42 = vpop.f32.mrb[66].mxu1  ;;  %v4102_v44 = vpop.f32.mrb[67].mxu0 }
 0xf38   : > { %v3541_v45 = vadd.f32 %v4100_v38, %v3500_v30  ;;  %v4103_v59 = vadd.f32 %v4102_v44, %v4101_v40  ;;  %v4124_v47 = vpop.f32.mrb[67].mxu1 }
 0xf39   : > { %v4125_v4 = vadd.f32 %v4124_v47, %v4123_v42 }
 0xf3a   : > { %v3582_v48 = vadd.f32 %v4122_v41, %v3541_v45  ;;  %v3544_v49 = vadd.f32 %v4103_v59, %v3503_v32 }
 0xf3c   : > { %v3585_v52 = vadd.f32 %v4125_v4, %v3544_v49  ;;  %v3588_v7 = vadd.f32 %v3582_v48, %v4801_v43 }
 0xf3e   : > { %v3592_v23 = vsel %vm473_vm1, %v3588_v7, 0.0  ;;  %v3589_v9 = vadd.f32 %v3585_v52, %v4803_v63 }
 0xf3f   : > { %3593 = vadd.xlane.f32.xlu0 %v3592_v23 }
 0xf40   : > { %v3595_v53 = vsel %vm473_vm1, %v3589_v9, 0.0 }
 0xf41   : > { %3596 = vadd.xlane.f32.xlu1 %v3595_v53 }
 0xfcc   : > { %v3594_v54 = vpop.xlane.xlu0 %3593 }
 0xfcd   : > { %v3598_v55 = vmul.f32 0.03125, %v3594_v54 }
 0xfce   : > { %v3597_v57 = vpop.xlane.xlu1 %3596 }
 0xfcf   : > { %v3600_v0 = vsub.f32 %v3588_v7, %v3598_v55  ;;  %v3599_v56 = vmul.f32 0.03125, %v3597_v57 }
 0xfd1   : > { %v3601_v8 = vsub.f32 %v3589_v9, %v3599_v56  ;;  %v3602_v50 = vmul.f32 %v3600_v0, %v3600_v0 }
 0xfd3   : > { %v3604_v34 = vsel %vm473_vm1, %v3602_v50, 0.0  ;;  %v3603_v51 = vmul.f32 %v3601_v8, %v3601_v8 }
 0xfd4   : > { %3605 = vadd.xlane.f32.xlu0 %v3604_v34 }
 0xfd5   : > { %v3607_v43 = vsel %vm473_vm1, %v3603_v51, 0.0 }
 0xfd6   : > { %3608 = vadd.xlane.f32.xlu1 %v3607_v43 }
0x1061   : > { %v3606_v35 = vpop.xlane.xlu0 %3605 }
0x1062   : > { %v3610_v63 = vmul.f32 0.03125, %v3606_v35 }
0x1063   : > { %v3609_v3 = vpop.xlane.xlu1 %3608 }
0x1064   : > { %v3612_v5 = vadd.f32 1e-05, %v3610_v63  ;;  %v3611_v6 = vmul.f32 0.03125, %v3609_v3 }
0x1066   : > { %4448 = vrsqrt.f32 %v3612_v5  ;;  %v3613_v61 = vadd.f32 1e-05, %v3611_v6 }
0x1068   : > { %4450 = vrsqrt.f32 %v3613_v61 }
0x1070   : > { %v4449_v10 = vpop.eup %4448 }
0x1071   : > { %v3616_v11 = vmul.f32 %v4449_v10, %v3600_v0 }
0x1072   : > { %v4451_v13 = vpop.eup %4450 }
0x1073   : > { %v3624_v12 = vmul.f32 %v3904_v62, %v3616_v11  ;;  %v3617_v2 = vmul.f32 %v4451_v13, %v3601_v8 }
0x1075   : > { %v3632_v15 = vadd.f32 %v3905_v14, %v3624_v12  ;;  %v3625_v16 = vmul.f32 %v3904_v62, %v3617_v2 }
0x1077   : > { %v3634_v20 = vpack.c.bf16 %v3632_v15, %v3632_v15  ;;  %v3633_v17 = vadd.f32 %v3905_v14, %v3625_v16 }
0x1079   : > { %3637 = vst.msk [vmem:[%s442_s18] sm:$0xf] %vm3636_vm6, %v3634_v20  ;;  %v3635_v19 = vpack.c.bf16 %v3633_v17, %v3633_v17 }
0x107b   : > { %3638 = vst.msk [vmem:[%s442_s18 + $0x4] sm:$0xf] %vm3636_vm6, %v3635_v19 }
0x107c PF: > { %s23_s25 = sadd.s32 1, %s4459_s25  }
0x107d   : > { %p20_p4 = scmp.ge.s32.totalorder %s23_s25, 4  }
0x107f   :  { %22 = sbr.rel (!%p20_p4) target bundleno = 1 (0x1), region = 102 }

// kernel: patchtst_forward.3
= control target key start
LH: loop header
LB: loop body
LE: loop exit
PB: predicated region body
PF: predicated region fallthrough
CT: control target
= control target key end

     0   :  { %s4667_s18 = smov 0   ;;  %s5497_s0 = inlined_call_operand.vmem [shape: f32[4,8,8], index: 0, kind: input, shape index: {}]   ;;  %s5498_s1 = inlined_call_operand.vmem [shape: bf16[8,32], index: 1, kind: input, shape index: {}]   ;;  %s5499_s2 = inlined_call_operand.vmem [shape: f32[8,32], index: 2, kind: input, shape index: {}]   ;;  %s5500_s3 = inlined_call_operand.vmem [shape: bf16[32,96], index: 3, kind: input, shape index: {}]   ;;  %s5501_s4 = inlined_call_operand.vmem [shape: f32[1,96], index: 4, kind: input, shape index: {}]   ;;  %s5502_s5 = inlined_call_operand.vmem [shape: bf16[32,32], index: 5, kind: input, shape index: {}]   ;;  %s5503_s6 = inlined_call_operand.vmem [shape: f32[1,32], index: 6, kind: input, shape index: {}]   ;;  %s5504_s7 = inlined_call_operand.vmem [shape: f32[1,32], index: 7, kind: input, shape index: {}]   ;;  %s5505_s8 = inlined_call_operand.vmem [shape: f32[1,32], index: 8, kind: input, shape index: {}]   ;;  %s5506_s9 = inlined_call_operand.vmem [shape: bf16[32,2048], index: 9, kind: input, shape index: {}]   ;;  %s5507_s10 = inlined_call_operand.vmem [shape: f32[1,2048], index: 10, kind: input, shape index: {}]   ;;  %s5508_s11 = inlined_call_operand.vmem [shape: bf16[2048,32], index: 11, kind: input, shape index: {}]   ;;  %s5509_s12 = inlined_call_operand.vmem [shape: f32[1,32], index: 12, kind: input, shape index: {}]   ;;  %s5510_s13 = inlined_call_operand.vmem [shape: f32[1,32], index: 13, kind: input, shape index: {}]   ;;  %s5511_s14 = inlined_call_operand.vmem [shape: f32[1,32], index: 14, kind: input, shape index: {}]   ;;  %s5512_s15 = inlined_call_operand.vmem [shape: bf16[4,8,32], index: 15, kind: output, shape index: {}]  }
   0x1 LB: > { %s3799_s19 = sadd.s32 4294967295, %s4568_s18   ;;  %p3803_p0 = scmp.ge.s32.totalorder %s4568_s18, 1  ;;  %s4568_s18 = sphi %s4667_s18, %s25_s18  }
   0x2   : > { %p438_p1 = scmp.lt.s32.totalorder %s4568_s18, 3 }
   0x4   : > { %p439_p2 = pnand %p3803_p0, %p438_p1 }
   0x5   : > { %v502_v0 = vld [vmem:[%s5498_s1] sm:$0xf] (!%p439_p2)  ;;  %vm507_vm0 = vcmask (!%p439_p2), 1043456   ;;  %s3804_s22 = sshll.u32 (!%p439_p2), %s3799_s19, 1  ;;  %v4570_v1 = vmov (!%p439_p2), 0.0   ;;  %vm4571_vm1 = vmmov (!%p439_p2), 0  }
   0x6   : > { %442 = sbr.rel (%p439_p2) target bundleno = 4440 (0x1158), region = 80  ;;  %4232 = vmatprep.subr.bf16.mxu0 (!%p439_p2), %v4570_v1  ;;  %v509_v2 = vsel (!%p439_p2), %vm507_vm0, %v502_v0, 0  ;;  %4234 = vmatprep.mubr.msk.bf16.mxu0 (!%p439_p2), %vm4571_vm1, %v4570_v1  ;;  %p487_p3 = scmp.lt.s32.totalorder (!%p439_p2), %s3804_s22, 3  ;;  %vm503_vm2 = vcmask (!%p439_p2), 64512   ;;  %v4390_v6 = vld [vmem:[%s5500_s3] sm:$0xff] (!%p439_p2)   ;;  %v4391_v7 = vld [vmem:[%s5500_s3 + $0x8] sm:$0xff] (!%p439_p2)  }
   0x7   : > { %4233 = vmatpush3.bf16.msra.mxu0 (!%p439_p2), %v509_v2  ;;  %4238 = vmatprep.subr.bf16.mxu1 (!%p439_p2), %v4570_v1  ;;  %v552_v9 = vld [vmem:[%s5499_s2] sm:$0xff] (!%p439_p2)  ;;  %vm579_vm3 = vcmask (!%p439_p2), 261120   ;;  %s4572_s21 = smov (!%p439_p2), 96   ;;  %s4574_s24 = smov (!%p439_p2), 88   ;;  %vm1540_vm4 = vcmask (!%p439_p2), 130048   ;;  %vm1543_vm5 = vcmask (!%p439_p2), 195584  }
   0x8   : > { %4242 = vmatprep.mubr.msk.bf16.mxu1 (!%p439_p2), %vm4571_vm1, %v4570_v1  ;;  %4246 = vmatprep.subr.bf16.mxu0 (!%p439_p2), %v4570_v1  ;;  %v3809_v16 = vld [vmem:[%s5501_s4] ss:$0 sm:$0xff] (!%p439_p2)  ;;  %s4575_s25 = smov (!%p439_p2), 120   ;;  %s4577_s27 = smov (!%p439_p2), 80   ;;  %vm3740_vm6 = vcmask (!%p439_p2), 257024  }
   0x9   : > { %4239 = vmatpush3.bf16.msra.mxu1 (!%p439_p2), %v4390_v6  ;;  %s4578_s28 = smov (!%p439_p2), 112   ;;  %s4579_s29 = smov (!%p439_p2), 48  }
   0xa   : > { %4240 = vmatprep.subr.bf16.mxu1 (!%p439_p2), %v4570_v1  ;;  %s4580_s30 = smov (!%p439_p2), 72   ;;  %s4581_s16 = smov (!%p439_p2), 104  }
   0xb   : > { %s4582_s17 = smov (!%p439_p2), 40   ;;  %s4583_s19 = smov (!%p439_p2), 8  }
   0xc   : > { %s4584_s20 = smov (!%p439_p2), 16  }
   0xd   : > { %s5514_s22 = smov (!%p487_p3, %s3804_s22), 3  ;;  %4241 = vmatpush3.bf16.msra.mxu1 %v4391_v7 }
   0xe   : > { %s3805_s23 = sshll.u32 %s5514_s22, 3  ;;  %4252 = vmatprep.subr.bf16.mxu1 %v4570_v1 }
   0xf   : > { %s490_s26 = scalar_lea.vmem %s5497_s0, %s3805_s23  ;;  %s4573_s23 = smov 64  }
  0x10   : > { %v499_v3 = vld [vmem:[%s490_s26] sm:$0xff]  ;;  %v500_v4 = vld [vmem:[%s490_s26 + $0x8] sm:$0xff]  ;;  %s4576_s26 = smov 56  }
  0x11   : > { %v501_v5 = vpack.c.bf16 %v500_v4, %v499_v3 }
  0x13   : > { %4235 = vmatmul.mubr.msk.bf16.vlgmr.msra.gmra.mrb[0].mxu0 %vm503_vm2, %v501_v5 }
  0x14   : > { %4248 = vmatprep.mubr.msk.bf16.mxu0 %vm4571_vm1, %v4570_v1 }
  0xe6   : > { %v545_v8 = vpop.f32.mrb[0].mxu0 }
  0xe7   : > { %v4236_v10 = vpop.f32.mrb[1].mxu0  ;;  %v4706_v12 = vadd.f32 %v552_v9, %v545_v8 }
  0xe8   : > { %v548_v11 = vpop.f32.mrb[2].mxu0 }
  0xe9   : > { %v4708_v13 = vadd.f32 %v552_v9, %v548_v11  ;;  %v4237_v14 = vpop.f32.mrb[3].mxu0 }
  0xeb   : > { %v555_v15 = vpack.c.bf16 %v4708_v13, %v4706_v12 }
  0xed   : > { %4243 = vmatmul.mubr.msk.bf16.vlgmr.msra.gmra.mrb[0].mxu1 %vm579_vm3, %v555_v15 }
  0xee   : > { %4254 = vmatprep.mubr.msk.bf16.mxu1 %vm4571_vm1, %v4570_v1 }
 0x1c0   : > { %v617_v17 = vpop.f32.mrb[0].mxu1 }
 0x1c1   : > { %v618_v18 = vadd.f32 %v3809_v16, %v617_v17  ;;  %v4244_v19 = vpop.f32.mrb[1].mxu1 }
 0x1c2   : > { %v620_v20 = vpop.f32.mrb[2].mxu1 }
 0x1c3   : > { %v4718_v21 = vpack.c.bf16 %v618_v18, %v618_v18  ;;  %v621_v22 = vadd.f32 %v3809_v16, %v620_v20  ;;  %v4245_v23 = vpop.f32.mrb[3].mxu1  ;;  %v624_v27 = vmul.f32 0.35355338, %v618_v18 }
 0x1c5   : > { %637 = vrot.lane.b32.xlu0 %v4718_v21, %s4572_s21  ;;  %v4721_v24 = vpack.c.bf16 %v621_v22, %v621_v22  ;;  %v4727_v30 = vpack.c.bf16 %v624_v27, %v624_v27  ;;  %v625_v31 = vmul.f32 0.35355338, %v621_v22 }
 0x1c7   : > { %v4734_v32 = vpack.c.bf16 %v625_v31, %v625_v31 }
 0x1c9   : > { %686 = vrot.lane.b32.xlu0 %v4721_v24, %s4572_s21 }
 0x237   : > { %v638_v25 = vpop.permute.xlu0 %637 }
 0x238   : > { %v643_v26 = vsel %vm503_vm2, %v638_v25, 0 }
 0x239   : > { %4247 = vmatpush3.bf16.xpose.msra.mxu0 %v643_v26 }
 0x23a   : > { %4258 = vmatprep.subr.bf16.mxu0 %v4570_v1 }
 0x23b   : > { %v687_v28 = vpop.permute.xlu0 %686 }
 0x23c   : > { %v692_v29 = vsel %vm503_vm2, %v687_v28, 0 }
 0x23d   : > { %4253 = vmatpush3.bf16.xpose.msra.mxu1 %v692_v29 }
 0x23e   : > { %4264 = vmatprep.subr.bf16.mxu1 %v4570_v1 }
 0x240   : > { %4249 = vmatmul.mubr.msk.bf16.vlgmr.msra.gmra.mrb[4].mxu0 %vm503_vm2, %v4727_v30 }
 0x241   : > { %4260 = vmatprep.mubr.msk.bf16.mxu0 %vm4571_vm1, %v4570_v1 }
 0x244   : > { %4255 = vmatmul.mubr.msk.bf16.vlgmr.msra.gmra.mrb[4].mxu1 %vm503_vm2, %v4734_v32 }
 0x245   : > { %4266 = vmatprep.mubr.msk.bf16.mxu1 %vm4571_vm1, %v4570_v1 }
 0x313   : > { %v679_v33 = vpop.f32.mrb[4].mxu0 }
 0x314   : > { %v4250_v34 = vpop.f32.mrb[5].mxu0  ;;  %v734_v35 = vsel %vm503_vm2, %v679_v33, -inf }
 0x315   : > { %735 = vmax.xlane.f32.xlu1 %v734_v35  ;;  %v682_v36 = vpop.f32.mrb[6].mxu0 }
 0x316   : > { %v4251_v37 = vpop.f32.mrb[7].mxu0 }
 0x317   : > { %v728_v38 = vpop.f32.mrb[4].mxu1 }
 0x318   : > { %v4256_v39 = vpop.f32.mrb[5].mxu1  ;;  %v737_v40 = vsel %vm503_vm2, %v728_v38, -inf }
 0x319   : > { %v731_v41 = vpop.f32.mrb[6].mxu1  ;;  %738 = vmax.xlane.f32.xlu1 %v737_v40 }
 0x31a   : > { %v4257_v42 = vpop.f32.mrb[7].mxu1 }
 0x32a   : > { %758 = vrot.lane.b32.xlu1 %v4718_v21, %s4573_s23 }
 0x32e   : > { %806 = vrot.lane.b32.xlu1 %v4721_v24, %s4573_s23 }
 0x332   : > { %856 = vrot.lane.b32.xlu1 %v4718_v21, %s4574_s24 }
 0x3a2   : > { %v736_v43 = vpop.xlane.xlu1 %735 }
 0x3a3   : > { %v740_v44 = vsub.f32 %v679_v33, %v736_v43 }
 0x3a5   : > { %v742_v45 = vmul.f32 1.442695, %v740_v44 }
 0x3a6   : > { %v739_v46 = vpop.xlane.xlu1 %738 }
 0x3a7   : > { %4522 = vpow2.f32 %v742_v45  ;;  %v741_v47 = vsub.f32 %v728_v38, %v739_v46 }
 0x3a9   : > { %v744_v48 = vmul.f32 1.442695, %v741_v47 }
 0x3aa   : > { %v759_v49 = vpop.permute.xlu1 %758 }
 0x3ab   : > { %4524 = vpow2.f32 %v744_v48  ;;  %v764_v50 = vsel %vm507_vm0, %v759_v49, 0 }
 0x3ac   : > { %4259 = vmatpush3.bf16.msra.mxu0 %v764_v50 }
 0x3ad   : > { %4270 = vmatprep.subr.bf16.mxu0 %v4570_v1 }
 0x3ae   : > { %v807_v51 = vpop.permute.xlu1 %806 }
 0x3af   : > { %v812_v52 = vsel %vm507_vm0, %v807_v51, 0 }
 0x3b0   : > { %4265 = vmatpush3.bf16.msra.mxu1 %v812_v52 }
 0x3b1   : > { %v4523_v53 = vpop.eup %4522  ;;  %4276 = vmatprep.subr.bf16.mxu1 %v4570_v1 }
 0x3b2   : > { %v746_v54 = vsel %vm503_vm2, %v4523_v53, 0.0  ;;  %v857_v57 = vpop.permute.xlu1 %856 }
 0x3b3   : > { %747 = vadd.xlane.f32.xlu0 %v746_v54  ;;  %v862_v0 = vsel %vm503_vm2, %v857_v57, 0 }
 0x3b5   : > { %v4525_v55 = vpop.eup %4524 }
 0x3b6   : > { %v749_v56 = vsel %vm503_vm2, %v4525_v55, 0.0 }
 0x3b7   : > { %750 = vadd.xlane.f32.xlu1 %v749_v56 }
 0x3c8   : > { %906 = vrot.lane.b32.xlu1 %v4721_v24, %s4574_s24 }
 0x3c9   : > { %854 = vrot.lane.b32.xlu0 %v4727_v30, %s4575_s25 }
 0x3cc   : > { %904 = vrot.lane.b32.xlu1 %v4734_v32, %s4575_s25  ;;  %s3807_s25 = sshll.u32 %s5514_s22, 2 }
 0x440   : > { %v748_v58 = vpop.xlane.xlu0 %747 }
 0x441   : > { %4526 = vrcp.f32 %v748_v58 }
 0x444   : > { %v751_v59 = vpop.xlane.xlu1 %750  ;;  %v855_v6 = vpop.permute.xlu0 %854 }
 0x445   : > { %4528 = vrcp.f32 %v751_v59 }
 0x448   : > { %v907_v3 = vpop.permute.xlu1 %906 }
 0x449   : > { %v912_v5 = vsel %vm503_vm2, %v907_v3, 0 }
 0x44b   : > { %v4527_v60 = vpop.eup %4526 }
 0x44c   : > { %v754_v61 = vmul.f32 %v4527_v60, %v4523_v53  ;;  %v905_v7 = vpop.permute.xlu1 %904 }
 0x44e   : > { %v756_v62 = vpack.c.bf16 %v754_v61, %v754_v61 }
 0x44f   : > { %v4529_v63 = vpop.eup %4528 }
 0x450   : > { %v755_v2 = vmul.f32 %v4529_v63, %v4525_v55  ;;  %4261 = vmatmul.mubr.msk.bf16.vlgmr.msra.gmra.mrb[8].mxu0 %vm503_vm2, %v756_v62 }
 0x451   : > { %4271 = vmatpush3.bf16.xpose.msra.mxu0 %v862_v0  ;;  %4272 = vmatprep.mubr.msk.bf16.mxu0 %vm4571_vm1, %v4570_v1 }
 0x452   : > { %v757_v4 = vpack.c.bf16 %v755_v2, %v755_v2  ;;  %4282 = vmatprep.subr.bf16.mxu0 %v4570_v1 }
 0x454   : > { %4267 = vmatmul.mubr.msk.bf16.vlgmr.msra.gmra.mrb[8].mxu1 %vm503_vm2, %v757_v4 }
 0x455   : > { %4277 = vmatpush3.bf16.xpose.msra.mxu1 %v912_v5  ;;  %4278 = vmatprep.mubr.msk.bf16.mxu1 %vm4571_vm1, %v4570_v1 }
 0x456   : > { %4288 = vmatprep.subr.bf16.mxu1 %v4570_v1 }
 0x458   : > { %4273 = vmatmul.mubr.msk.bf16.vlgmr.msra.gmra.mrb[12].mxu0 %vm503_vm2, %v855_v6 }
 0x459   : > { %4284 = vmatprep.mubr.msk.bf16.mxu0 %vm4571_vm1, %v4570_v1 }
 0x45c   : > { %4279 = vmatmul.mubr.msk.bf16.vlgmr.msra.gmra.mrb[12].mxu1 %vm503_vm2, %v905_v7 }
 0x45d   : > { %4290 = vmatprep.mubr.msk.bf16.mxu1 %vm4571_vm1, %v4570_v1 }
 0x523   : > { %v4770_v8 = vpop.f32.mrb[8].mxu0 }
 0x524   : > { %v4262_v9 = vpop.f32.mrb[9].mxu0 }
 0x525   : > { %v803_v10 = vpop.f32.mrb[10].mxu0 }
 0x526   : > { %v4263_v11 = vpop.f32.mrb[11].mxu0 }
 0x527   : > { %v4772_v14 = vpop.f32.mrb[8].mxu1 }
 0x528   : > { %v4268_v15 = vpop.f32.mrb[9].mxu1 }
 0x529   : > { %v851_v16 = vpop.f32.mrb[10].mxu1 }
 0x52a   : > { %v4269_v17 = vpop.f32.mrb[11].mxu1 }
 0x52b   : > { %v898_v18 = vpop.f32.mrb[12].mxu0 }
 0x52c   : > { %v4274_v19 = vpop.f32.mrb[13].mxu0  ;;  %v954_v20 = vsel %vm503_vm2, %v898_v18, -inf }
 0x52d   : > { %955 = vmax.xlane.f32.xlu1 %v954_v20  ;;  %v901_v22 = vpop.f32.mrb[14].mxu0 }
 0x52e   : > { %v4275_v23 = vpop.f32.mrb[15].mxu0 }
 0x52f   : > { %v948_v25 = vpop.f32.mrb[12].mxu1 }
 0x530   : > { %v4280_v26 = vpop.f32.mrb[13].mxu1  ;;  %v957_v27 = vsel %vm503_vm2, %v948_v25, -inf }
 0x531   : > { %958 = vmax.xlane.f32.xlu0 %v957_v27  ;;  %v951_v28 = vpop.f32.mrb[14].mxu1 }
 0x532   : > { %v4281_v29 = vpop.f32.mrb[15].mxu1 }
 0x53e   : > { %978 = vrot.lane.b32.xlu1 %v4718_v21, %s4576_s26 }
 0x542   : > { %1076 = vrot.lane.b32.xlu1 %v4718_v21, %s4577_s27 }
 0x547   : > { %1026 = vrot.lane.b32.xlu0 %v4721_v24, %s4576_s26  ;;  %s4585_s26 = smov 24  }
 0x54b   : > { %1074 = vrot.lane.b32.xlu0 %v4727_v30, %s4578_s28 }
 0x5ba   : > { %v956_v31 = vpop.xlane.xlu1 %955 }
 0x5bb   : > { %v960_v33 = vsub.f32 %v898_v18, %v956_v31 }
 0x5bd   : > { %v962_v34 = vmul.f32 1.442695, %v960_v33 }
 0x5be   : > { %v959_v35 = vpop.xlane.xlu0 %958  ;;  %v979_v36 = vpop.permute.xlu1 %978 }
 0x5bf   : > { %4530 = vpow2.f32 %v962_v34  ;;  %v961_v37 = vsub.f32 %v948_v25, %v959_v35  ;;  %v984_v38 = vsel %vm507_vm0, %v979_v36, 0 }
 0x5c0   : > { %4283 = vmatpush3.bf16.msra.mxu0 %v984_v38 }
 0x5c1   : > { %v964_v39 = vmul.f32 1.442695, %v961_v37  ;;  %4294 = vmatprep.subr.bf16.mxu0 %v4570_v1 }
 0x5c2   : > { %v1027_v40 = vpop.permute.xlu0 %1026  ;;  %v1077_v46 = vpop.permute.xlu1 %1076 }
 0x5c3   : > { %4532 = vpow2.f32 %v964_v39  ;;  %v1032_v41 = vsel %vm507_vm0, %v1027_v40, 0  ;;  %v1082_v53 = vsel %vm503_vm2, %v1077_v46, 0 }
 0x5c4   : > { %4289 = vmatpush3.bf16.msra.mxu1 %v1032_v41 }
 0x5c5   : > { %4300 = vmatprep.subr.bf16.mxu1 %v4570_v1 }
 0x5c6   : > { %v1075_v58 = vpop.permute.xlu0 %1074 }
 0x5c9   : > { %v4531_v42 = vpop.eup %4530 }
 0x5ca   : > { %v966_v43 = vsel %vm503_vm2, %v4531_v42, 0.0 }
 0x5cb   : > { %967 = vadd.xlane.f32.xlu1 %v966_v43 }
 0x5cd   : > { %v4533_v44 = vpop.eup %4532 }
 0x5ce   : > { %v969_v45 = vsel %vm503_vm2, %v4533_v44, 0.0 }
 0x5cf   : > { %970 = vadd.xlane.f32.xlu1 %v969_v45 }
 0x5e0   : > { %1126 = vrot.lane.b32.xlu1 %v4721_v24, %s4577_s27 }
 0x5e4   : > { %1124 = vrot.lane.b32.xlu1 %v4734_v32, %s4578_s28  ;;  %s496_s28 = scalar_lea.vmem %s5512_s15, %s3807_s25 }
 0x658   : > { %v968_v47 = vpop.xlane.xlu1 %967 }
 0x659   : > { %4534 = vrcp.f32 %v968_v47 }
 0x65c   : > { %v971_v48 = vpop.xlane.xlu1 %970 }
 0x65d   : > { %4536 = vrcp.f32 %v971_v48 }
 0x660   : > { %v1127_v55 = vpop.permute.xlu1 %1126 }
 0x661   : > { %v1132_v57 = vsel %vm503_vm2, %v1127_v55, 0 }
 0x663   : > { %v4535_v49 = vpop.eup %4534 }
 0x664   : > { %v974_v50 = vmul.f32 %v4535_v49, %v4531_v42  ;;  %v1125_v59 = vpop.permute.xlu1 %1124 }
 0x666   : > { %v976_v51 = vpack.c.bf16 %v974_v50, %v974_v50 }
 0x667   : > { %v4537_v52 = vpop.eup %4536 }
 0x668   : > { %v975_v54 = vmul.f32 %v4537_v52, %v4533_v44  ;;  %4285 = vmatmul.mubr.msk.bf16.vlgmr.msra.gmra.mrb[16].mxu0 %vm503_vm2, %v976_v51 }
 0x669   : > { %4295 = vmatpush3.bf16.xpose.msra.mxu0 %v1082_v53  ;;  %4296 = vmatprep.mubr.msk.bf16.mxu0 %vm4571_vm1, %v4570_v1 }
 0x66a   : > { %v977_v56 = vpack.c.bf16 %v975_v54, %v975_v54  ;;  %4306 = vmatprep.subr.bf16.mxu0 %v4570_v1 }
 0x66c   : > { %4291 = vmatmul.mubr.msk.bf16.vlgmr.msra.gmra.mrb[16].mxu1 %vm503_vm2, %v977_v56 }
 0x66d   : > { %4301 = vmatpush3.bf16.xpose.msra.mxu1 %v1132_v57  ;;  %4302 = vmatprep.mubr.msk.bf16.mxu1 %vm4571_vm1, %v4570_v1 }
 0x66e   : > { %4312 = vmatprep.subr.bf16.mxu1 %v4570_v1 }
 0x670   : > { %4297 = vmatmul.mubr.msk.bf16.vlgmr.msra.gmra.mrb[20].mxu0 %vm503_vm2, %v1075_v58 }
 0x671   : > { %4308 = vmatprep.mubr.msk.bf16.mxu0 %vm4571_vm1, %v4570_v1 }
 0x674   : > { %4303 = vmatmul.mubr.msk.bf16.vlgmr.msra.gmra.mrb[20].mxu1 %vm503_vm2, %v1125_v59 }
 0x675   : > { %4314 = vmatprep.mubr.msk.bf16.mxu1 %vm4571_vm1, %v4570_v1 }
 0x73b   : > { %v4804_v60 = vpop.f32.mrb[16].mxu0 }
 0x73c   : > { %v4286_v61 = vpop.f32.mrb[17].mxu0 }
 0x73d   : > { %v1023_v62 = vpop.f32.mrb[18].mxu0 }
 0x73e   : > { %v4287_v63 = vpop.f32.mrb[19].mxu0 }
 0x73f   : > { %v4806_v0 = vpop.f32.mrb[16].mxu1 }
 0x740   : > { %v4375_v2 = vpack.i.bf16 %v4806_v0, %v4804_v60  ;;  %v4292_v3 = vpop.f32.mrb[17].mxu1 }
 0x741   : > { %v1071_v4 = vpop.f32.mrb[18].mxu1 }
 0x742   : > { %v4293_v5 = vpop.f32.mrb[19].mxu1 }
 0x743   : > { %v1118_v6 = vpop.f32.mrb[20].mxu0 }
 0x744   : > { %v4298_v7 = vpop.f32.mrb[21].mxu0  ;;  %v1174_v9 = vsel %vm503_vm2, %v1118_v6, -inf }
 0x745   : > { %1175 = vmax.xlane.f32.xlu0 %v1174_v9  ;;  %v1121_v10 = vpop.f32.mrb[22].mxu0 }
 0x746   : > { %v4299_v11 = vpop.f32.mrb[23].mxu0 }
 0x747   : > { %v1168_v15 = vpop.f32.mrb[20].mxu1 }
 0x748   : > { %v4304_v16 = vpop.f32.mrb[21].mxu1  ;;  %v1177_v17 = vsel %vm503_vm2, %v1168_v15, -inf }
 0x749   : > { %1178 = vmax.xlane.f32.xlu1 %v1177_v17  ;;  %v1171_v18 = vpop.f32.mrb[22].mxu1 }
 0x74a   : > { %v4305_v19 = vpop.f32.mrb[23].mxu1 }
 0x75a   : > { %1198 = vrot.lane.b32.xlu1 %v4718_v21, %s4579_s29 }
 0x75e   : > { %1296 = vrot.lane.b32.xlu1 %v4718_v21, %s4580_s30 }
 0x762   : > { %1346 = vrot.lane.b32.xlu1 %v4721_v24, %s4580_s30 }
 0x766   : > { %1344 = vrot.lane.b32.xlu1 %v4734_v32, %s4581_s16 }
 0x7d2   : > { %v1176_v20 = vpop.xlane.xlu0 %1175 }
 0x7d3   : > { %v1180_v22 = vsub.f32 %v1118_v6, %v1176_v20 }
 0x7d5   : > { %v1182_v23 = vmul.f32 1.442695, %v1180_v22 }
 0x7d6   : > { %v1179_v25 = vpop.xlane.xlu1 %1178 }
 0x7d7   : > { %4538 = vpow2.f32 %v1182_v23  ;;  %v1181_v26 = vsub.f32 %v1168_v15, %v1179_v25 }
 0x7d9   : > { %v1184_v27 = vmul.f32 1.442695, %v1181_v26 }
 0x7da   : > { %v1199_v28 = vpop.permute.xlu1 %1198 }
 0x7db   : > { %4540 = vpow2.f32 %v1184_v27  ;;  %v1204_v29 = vsel %vm507_vm0, %v1199_v28, 0 }
 0x7dc   : > { %4307 = vmatpush3.bf16.msra.mxu0 %v1204_v29 }
 0x7dd   : > { %4318 = vmatprep.subr.bf16.mxu0 %v4570_v1 }
 0x7de   : > { %v1297_v40 = vpop.permute.xlu1 %1296 }
 0x7df   : > { %v1302_v44 = vsel %vm503_vm2, %v1297_v40, 0 }
 0x7e1   : > { %v4539_v31 = vpop.eup %4538 }
 0x7e2   : > { %v1186_v33 = vsel %vm503_vm2, %v4539_v31, 0.0 }
 0x7e3   : > { %1187 = vadd.xlane.f32.xlu0 %v1186_v33 }
 0x7e5   : > { %v4541_v34 = vpop.eup %4540 }
 0x7e6   : > { %v1189_v32 = vsel %vm503_vm2, %v4541_v34, 0.0 }
 0x7e7   : > { %1190 = vadd.xlane.f32.xlu0 %v1189_v32  ;;  %v4393_v32 = vld [vmem:[%s5502_s5 + $0x8] sm:$0xff]  }
 0x7fd   : > { %1246 = vrot.lane.b32.xlu0 %v4721_v24, %s4579_s29 }
 0x801   : > { %1294 = vrot.lane.b32.xlu0 %v4727_v30, %s4581_s16  ;;  %v1347_v30 = vpop.permute.xlu1 %1346 }
 0x802   : > { %v1352_v47 = vsel %vm503_vm2, %v1347_v30, 0 }
 0x805   : > { %v1345_v49 = vpop.permute.xlu1 %1344 }
 0x870   : > { %v1188_v35 = vpop.xlane.xlu0 %1187 }
 0x871   : > { %4542 = vrcp.f32 %v1188_v35 }
 0x874   : > { %v1191_v36 = vpop.xlane.xlu0 %1190 }
 0x875   : > { %4544 = vrcp.f32 %v1191_v36 }
 0x878   : > { %v1247_v37 = vpop.permute.xlu0 %1246 }
 0x879   : > { %v1252_v38 = vsel %vm507_vm0, %v1247_v37, 0 }
 0x87a   : > { %4313 = vmatpush3.bf16.msra.mxu1 %v1252_v38 }
 0x87b   : > { %v4543_v39 = vpop.eup %4542  ;;  %4324 = vmatprep.subr.bf16.mxu1 %v4570_v1 }
 0x87c   : > { %v1194_v41 = vmul.f32 %v4543_v39, %v4539_v31  ;;  %v1295_v48 = vpop.permute.xlu0 %1294 }
 0x87e   : > { %v1196_v42 = vpack.c.bf16 %v1194_v41, %v1194_v41 }
 0x87f   : > { %v4545_v43 = vpop.eup %4544 }
 0x880   : > { %v1195_v45 = vmul.f32 %v4545_v43, %v4541_v34  ;;  %4309 = vmatmul.mubr.msk.bf16.vlgmr.msra.gmra.mrb[24].mxu0 %vm503_vm2, %v1196_v42 }
 0x881   : > { %4319 = vmatpush3.bf16.xpose.msra.mxu0 %v1302_v44  ;;  %4320 = vmatprep.mubr.msk.bf16.mxu0 %vm4571_vm1, %v4570_v1 }
 0x882   : > { %v1197_v46 = vpack.c.bf16 %v1195_v45, %v1195_v45  ;;  %4330 = vmatprep.subr.bf16.mxu0 %v4570_v1 }
 0x884   : > { %4315 = vmatmul.mubr.msk.bf16.vlgmr.msra.gmra.mrb[24].mxu1 %vm503_vm2, %v1197_v46 }
 0x885   : > { %4325 = vmatpush3.bf16.xpose.msra.mxu1 %v1352_v47  ;;  %4326 = vmatprep.mubr.msk.bf16.mxu1 %vm4571_vm1, %v4570_v1 }
 0x886   : > { %4336 = vmatprep.subr.bf16.mxu1 %v4570_v1 }
 0x888   : > { %4321 = vmatmul.mubr.msk.bf16.vlgmr.msra.gmra.mrb[28].mxu0 %vm503_vm2, %v1295_v48 }
 0x889   : > { %4332 = vmatprep.mubr.msk.bf16.mxu0 %vm4571_vm1, %v4570_v1 }
 0x88c   : > { %4327 = vmatmul.mubr.msk.bf16.vlgmr.msra.gmra.mrb[28].mxu1 %vm503_vm2, %v1345_v49 }
 0x88d   : > { %4338 = vmatprep.mubr.msk.bf16.mxu1 %vm4571_vm1, %v4570_v1 }
 0x953   : > { %v1240_v50 = vpop.f32.mrb[24].mxu0 }
 0x954   : > { %v4310_v51 = vpop.f32.mrb[25].mxu0 }
 0x955   : > { %v1243_v52 = vpop.f32.mrb[26].mxu0 }
 0x956   : > { %v4311_v53 = vpop.f32.mrb[27].mxu0 }
 0x957   : > { %v1288_v54 = vpop.f32.mrb[24].mxu1 }
 0x958   : > { %v4380_v55 = vpack.i.bf16 %v1288_v54, %v1240_v50  ;;  %v4316_v56 = vpop.f32.mrb[25].mxu1 }
 0x959   : > { %v1291_v57 = vpop.f32.mrb[26].mxu1 }
 0x95a   : > { %v4317_v58 = vpop.f32.mrb[27].mxu1 }
 0x95b   : > { %v1338_v59 = vpop.f32.mrb[28].mxu0  ;;  %v3833_v58 = vld [vmem:[%s5503_s6] ss:$0 sm:$0xff] }
 0x95c   : > { %v4322_v61 = vpop.f32.mrb[29].mxu0  ;;  %v1394_v62 = vsel %vm503_vm2, %v1338_v59, -inf }
 0x95d   : > { %1395 = vmax.xlane.f32.xlu0 %v1394_v62  ;;  %v1341_v63 = vpop.f32.mrb[30].mxu0 }
 0x95e   : > { %v4323_v3 = vpop.f32.mrb[31].mxu0 }
 0x95f   : > { %v1388_v4 = vpop.f32.mrb[28].mxu1 }
 0x960   : > { %v4328_v5 = vpop.f32.mrb[29].mxu1  ;;  %v1397_v6 = vsel %vm503_vm2, %v1388_v4, -inf }
 0x961   : > { %1398 = vmax.xlane.f32.xlu1 %v1397_v6  ;;  %v1391_v7 = vpop.f32.mrb[30].mxu1 }
 0x962   : > { %v4329_v9 = vpop.f32.mrb[31].mxu1 }
 0x972   : > { %1418 = vrot.lane.b32.xlu1 %v4718_v21, %s4582_s17 }
 0x976   : > { %4376 = vrot.lane.b32.xlu1 %v4375_v2, %s4583_s19 }
 0x97a   : > { %4381 = vrot.lane.b32.xlu1 %v4380_v55, %s4584_s20 }
 0x9ea   : > { %v1396_v10 = vpop.xlane.xlu0 %1395 }
 0x9eb   : > { %v1400_v11 = vsub.f32 %v1338_v59, %v1396_v10 }
 0x9ed   : > { %v1402_v15 = vmul.f32 1.442695, %v1400_v11 }
 0x9ee   : > { %v1399_v16 = vpop.xlane.xlu1 %1398 }
 0x9ef   : > { %4546 = vpow2.f32 %v1402_v15  ;;  %v1401_v17 = vsub.f32 %v1388_v4, %v1399_v16 }
 0x9f1   : > { %v1404_v18 = vmul.f32 1.442695, %v1401_v17 }
 0x9f2   : > { %v1419_v19 = vpop.permute.xlu1 %1418 }
 0x9f3   : > { %4548 = vpow2.f32 %v1404_v18  ;;  %v1424_v20 = vsel %vm507_vm0, %v1419_v19, 0 }
 0x9f4   : > { %4331 = vmatpush3.bf16.msra.mxu0 %v1424_v20  ;;  %v1670_v20 = vld [vmem:[%s5506_s9 + $0x40] sm:$0xff] }
 0x9f5   : > { %4342 = vmatprep.subr.bf16.mxu0 %v4570_v1 }
 0x9f6   : > { %v4377_v44 = vpop.permute.xlu1 %4376 }
 0x9f7   : > { %v4379_v30 = vunpack.i.h.bf16 %v4377_v44 }
 0x9f9   : > { %v4547_v21 = vpop.eup %4546  ;;  %v1539_v49 = vsel %vm503_vm2, %v4772_v14, %v4379_v30 }
 0x9fa   : > { %v1406_v60 = vsel %vm503_vm2, %v4547_v21, 0.0  ;;  %v4382_v45 = vpop.permute.xlu1 %4381 }
 0x9fb   : > { %1407 = vadd.xlane.f32.xlu0 %v1406_v60  ;;  %v4384_v46 = vunpack.i.h.bf16 %v4382_v45  ;;  %v4383_v47 = vunpack.i.l.bf16 %v4382_v45 }
 0x9fd   : > { %v4549_v0 = vpop.eup %4548  ;;  %v1542_v53 = vsel %vm1540_vm4, %v1539_v49, %v4384_v46 }
 0x9fe   : > { %v1409_v2 = vsel %vm503_vm2, %v4549_v0, 0.0 }
 0x9ff   : > { %1410 = vadd.xlane.f32.xlu0 %v1409_v2 }
 0xa15   : > { %1466 = vrot.lane.b32.xlu0 %v4721_v24, %s4582_s17  ;;  %v4392_v24 = vld [vmem:[%s5502_s5] sm:$0xff]  }
 0xa88   : > { %v1408_v22 = vpop.xlane.xlu0 %1407 }
 0xa89   : > { %4550 = vrcp.f32 %v1408_v22 }
 0xa8c   : > { %v1411_v23 = vpop.xlane.xlu0 %1410 }
 0xa8d   : > { %4552 = vrcp.f32 %v1411_v23 }
 0xa90   : > { %v1467_v25 = vpop.permute.xlu0 %1466 }
 0xa91   : > { %v1472_v26 = vsel %vm507_vm0, %v1467_v25, 0  ;;  %v1678_v25 = vld [vmem:[%s5506_s9 + $0x80] sm:$0xff] }
 0xa92   : > { %4337 = vmatpush3.bf16.msra.mxu1 %v1472_v26  ;;  %v1686_v26 = vld [vmem:[%s5506_s9 + $0xc0] sm:$0xff] }
 0xa93   : > { %v4551_v27 = vpop.eup %4550 }
 0xa94   : > { %v1414_v28 = vmul.f32 %v4551_v27, %v4547_v21  ;;  %v1663_v21 = vld [vmem:[%s5506_s9 + $0x8] sm:$0xff] }
 0xa95   : > { %v1679_v27 = vld [vmem:[%s5506_s9 + $0x88] sm:$0xff] }
 0xa96   : > { %v1416_v29 = vpack.c.bf16 %v1414_v28, %v1414_v28  ;;  %v3856_v28 = vcombine.high %v1678_v25, %v1686_v26 }
 0xa97   : > { %v4553_v31 = vpop.eup %4552 }
 0xa98   : > { %v1415_v33 = vmul.f32 %v4553_v31, %v4549_v0  ;;  %4333 = vmatmul.mubr.msk.bf16.vlgmr.msra.gmra.mrb[32].mxu0 %vm503_vm2, %v1416_v29  ;;  %v1671_v0 = vld [vmem:[%s5506_s9 + $0x48] sm:$0xff]  ;;  %v3855_v31 = vcombine.low %v1678_v25, %v1686_v26  ;;  %v1684_v25 = vld [vmem:[%s5506_s9 + $0xb0] sm:$0xff] }
 0xa99   : > { %4346 = vmatprep.mubr.msk.bf16.mxu0 %vm4571_vm1, %v4570_v1  ;;  %4343 = vmatpush3.bf16.msra.mxu0 %v4392_v24  ;;  %v3841_v22 = vcombine.low %v1663_v21, %v1671_v0  ;;  %v3842_v23 = vcombine.high %v1663_v21, %v1671_v0  ;;  %v1687_v29 = vld [vmem:[%s5506_s9 + $0xc8] sm:$0xff]  ;;  %v1664_v24 = vld [vmem:[%s5506_s9 + $0x10] sm:$0xff]  ;;  %v1669_v21 = vld [vmem:[%s5506_s9 + $0x38] sm:$0xff] }
 0xa9a   : > { %v1417_v34 = vpack.c.bf16 %v1415_v33, %v1415_v33  ;;  %4344 = vmatprep.subr.bf16.mxu0 %v4570_v1  ;;  %v4378_v1 = vunpack.i.l.bf16 %v4377_v44  ;;  %v3857_v33 = vcombine.low %v1679_v27, %v1687_v29  ;;  %v1692_v26 = vld [vmem:[%s5506_s9 + $0xf0] sm:$0xff] }
 0xa9c   : > { %4339 = vmatmul.mubr.msk.bf16.vlgmr.msra.gmra.mrb[32].mxu1 %vm503_vm2, %v1417_v34  ;;  %v1538_v50 = vsel %vm503_vm2, %v4770_v8, %v4378_v1  ;;  %v3858_v34 = vcombine.high %v1679_v27, %v1687_v29  ;;  %v1685_v27 = vld [vmem:[%s5506_s9 + $0xb8] sm:$0xff] }
 0xa9d   : > { %4345 = vmatpush3.bf16.msra.mxu0 %v4393_v32  ;;  %v1541_v54 = vsel %vm1540_vm4, %v1538_v50, %v4383_v47  ;;  %v1672_v32 = vld [vmem:[%s5506_s9 + $0x50] sm:$0xff]  ;;  %v3837_v47 = vld [vmem:[%s5504_s7] ss:$0 sm:$0xff] }
 0xa9e   : > { %1984 = vmatprep.subr.bf16.mxu0 %v3842_v23 }
 0xb6b   : > { %v1460_v35 = vpop.f32.mrb[32].mxu0 }
 0xb6c   : > { %v4334_v36 = vpop.f32.mrb[33].mxu0 }
 0xb6d   : > { %v1463_v37 = vpop.f32.mrb[34].mxu0  ;;  %v4586_v36 = vmov 0  }
 0xb6e   : > { %v4335_v38 = vpop.f32.mrb[35].mxu0  ;;  %1973 = vmatprep.mubr.bf16.mxu1 %v4586_v36  ;;  %v3844_v37 = vcombine.high %v1664_v24, %v1672_v32 }
 0xb6f   : > { %v1508_v39 = vpop.f32.mrb[32].mxu1  ;;  %v1673_v38 = vld [vmem:[%s5506_s9 + $0x58] sm:$0xff] }
 0xb70   : > { %v4385_v40 = vpack.i.bf16 %v1508_v39, %v1460_v35  ;;  %v4340_v41 = vpop.f32.mrb[33].mxu1  ;;  %v1665_v35 = vld [vmem:[%s5506_s9 + $0x18] sm:$0xff]  ;;  %v3843_v39 = vcombine.low %v1664_v24, %v1672_v32  ;;  %v3867_v24 = vcombine.low %v1684_v25, %v1692_v26 }
 0xb71   : > { %v1511_v42 = vpop.f32.mrb[34].mxu1  ;;  %v3846_v41 = vcombine.high %v1665_v35, %v1673_v38 }
 0xb72   : > { %v4341_v43 = vpop.f32.mrb[35].mxu1  ;;  %4386 = vrot.lane.b32.xlu0 %v4385_v40, %s4585_s26  ;;  %v3845_v40 = vcombine.low %v1665_v35, %v1673_v38  ;;  %v4394_v35 = vld [vmem:[%s5508_s11 + $0x40] sm:$0xff]  }
 0xb73   : > { %v4396_v38 = vld [vmem:[%s5508_s11] sm:$0xff]  }
 0xbe4   : > { %v4387_v48 = vpop.permute.xlu0 %4386 }
 0xbe5   : > { %v4389_v51 = vunpack.i.h.bf16 %v4387_v48  ;;  %v4388_v52 = vunpack.i.l.bf16 %v4387_v48 }
 0xbe7   : > { %v1545_v55 = vsel %vm1543_vm5, %v1542_v53, %v4389_v51  ;;  %v1544_v56 = vsel %vm1543_vm5, %v1541_v54, %v4388_v52  ;;  %v3838_v52 = vld [vmem:[%s5505_s8] ss:$0 sm:$0xff]  ;;  %v1680_v54 = vld [vmem:[%s5506_s9 + $0x90] sm:$0xff] }
 0xbe8   : > { %v1546_v57 = vpack.c.bf16 %v1545_v55, %v1544_v56  ;;  %v1688_v55 = vld [vmem:[%s5506_s9 + $0xd0] sm:$0xff]  ;;  %v1681_v56 = vld [vmem:[%s5506_s9 + $0x98] sm:$0xff] }
 0xbea   : > { %4347 = vmatmul.mubr.msk.bf16.vlgmr.msra.gmra.mrb[36].mxu0 %vm579_vm3, %v1546_v57  ;;  %v1689_v57 = vld [vmem:[%s5506_s9 + $0xd8] sm:$0xff] }
 0xbeb   : > { %1985 = vmatpush1.bf16.msra.mxu0 %v3841_v22  ;;  %2016 = vmatprep.mubr.bf16.mxu0 %v4586_v36 }
 0xbec   : > { %1986 = vmatprep.subr.bf16.mxu0 %v3858_v34 }
 0xbef   : > { %1987 = vmatpush1.bf16.msra.mxu0 %v3857_v33  ;;  %v3868_v33 = vcombine.high %v1684_v25, %v1692_v26 }
 0xbf0   : > { %2070 = vmatprep.subr.bf16.mxu0 %v3846_v41  ;;  %v4400_v41 = vld [vmem:[%s5508_s11 + $0x8] sm:$0xff]  }
 0xcbd   : > { %v1607_v59 = vpop.f32.mrb[36].mxu0 }
 0xcbe   : > { %v1608_v61 = vadd.f32 %v3833_v58, %v1607_v59  ;;  %v4348_v62 = vpop.f32.mrb[37].mxu0 }
 0xcbf   : > { %v1610_v14 = vpop.f32.mrb[38].mxu0  ;;  %v3860_v62 = vcombine.high %v1680_v54, %v1688_v55 }
 0xcc0   : > { %v1611_v63 = vadd.f32 %v3833_v58, %v1610_v14  ;;  %v4349_v3 = vpop.f32.mrb[39].mxu0  ;;  %v1614_v8 = vadd.f32 %v1608_v61, %v4706_v12  ;;  %v3862_v14 = vcombine.high %v1681_v56, %v1689_v57 }
 0xcc1   : > { %v1674_v3 = vld [vmem:[%s5506_s9 + $0x60] sm:$0xff] }
 0xcc2   : > { %v1618_v4 = vsel %vm579_vm3, %v1614_v8, 0.0  ;;  %v1615_v5 = vadd.f32 %v1611_v63, %v4708_v13  ;;  %v1662_v13 = vld [vmem:[%s5506_s9] sm:$0xff] }
 0xcc3   : > { %1619 = vadd.xlane.f32.xlu1 %v1618_v4  ;;  %v3840_v60 = vcombine.high %v1662_v13, %v1670_v20  ;;  %v3839_v2 = vcombine.low %v1662_v13, %v1670_v20  ;;  %v1666_v63 = vld [vmem:[%s5506_s9 + $0x20] sm:$0xff]  ;;  %v1675_v4 = vld [vmem:[%s5506_s9 + $0x68] sm:$0xff]  ;;  %v1668_v13 = vld [vmem:[%s5506_s9 + $0x30] sm:$0xff] }
 0xcc4   : > { %v1621_v6 = vsel %vm579_vm3, %v1615_v5, 0.0  ;;  %v1676_v20 = vld [vmem:[%s5506_s9 + $0x70] sm:$0xff] }
 0xcc5   : > { %1622 = vadd.xlane.f32.xlu0 %v1621_v6  ;;  %1941 = vmatprep.subr.bf16.mxu1 %v3840_v60  ;;  %v3861_v6 = vcombine.low %v1681_v56, %v1689_v57  ;;  %v1677_v60 = vld [vmem:[%s5506_s9 + $0x78] sm:$0xff]  ;;  %v3852_v22 = vcombine.high %v1668_v13, %v1676_v20  ;;  %v3851_v29 = vcombine.low %v1668_v13, %v1676_v20  ;;  %v4417_v56 = vld [vmem:[%s5508_s11 + $0xa8] sm:$0xff]   ;;  %v4418_v57 = vld [vmem:[%s5508_s11 + $0x70] sm:$0xff]  }
 0xcc6   : > { %1942 = vmatpush1.bf16.msra.mxu1 %v3839_v2  ;;  %v3854_v23 = vcombine.high %v1669_v21, %v1677_v60 }
 0xcc7   : > { %1943 = vmatprep.subr.bf16.mxu1 %v3856_v28  ;;  %v1693_v28 = vld [vmem:[%s5506_s9 + $0xf8] sm:$0xff] }
 0xcc8   : > { %v3870_v34 = vcombine.high %v1685_v27, %v1693_v28  ;;  %v3869_v32 = vcombine.low %v1685_v27, %v1693_v28 }
 0xcca   : > { %1944 = vmatpush1.bf16.msra.mxu1 %v3855_v31  ;;  %v3853_v31 = vcombine.low %v1669_v21, %v1677_v60 }
 0xccb   : > { %2027 = vmatprep.subr.bf16.mxu1 %v3844_v37  ;;  %v4395_v37 = vld [vmem:[%s5508_s11 + $0xc0] sm:$0xff]  }
 0xd50   : > { %v1620_v7 = vpop.xlane.xlu1 %1619 }
 0xd51   : > { %v1625_v9 = vmul.f32 0.03125, %v1620_v7  ;;  %v3848_v7 = vcombine.high %v1666_v63, %v1674_v3 }
 0xd52   : > { %v1623_v10 = vpop.xlane.xlu0 %1622 }
 0xd53   : > { %v1627_v11 = vsub.f32 %v1614_v8, %v1625_v9  ;;  %v1626_v15 = vmul.f32 0.03125, %v1623_v10  ;;  %v1667_v8 = vld [vmem:[%s5506_s9 + $0x28] sm:$0xff]  ;;  %v1682_v10 = vld [vmem:[%s5506_s9 + $0xa0] sm:$0xff] }
 0xd54   : > { %v3850_v9 = vcombine.high %v1667_v8, %v1675_v4 }
 0xd55   : > { %v1628_v16 = vsub.f32 %v1615_v5, %v1626_v15  ;;  %v1629_v17 = vmul.f32 %v1627_v11, %v1627_v11  ;;  %v3859_v5 = vcombine.low %v1680_v54, %v1688_v55  ;;  %v1683_v15 = vld [vmem:[%s5506_s9 + $0xa8] sm:$0xff] }
 0xd56   : > { %v4415_v54 = vld [vmem:[%s5508_s11 + $0xe8] sm:$0xff]  }
 0xd57   : > { %v1631_v18 = vsel %vm579_vm3, %v1629_v17, 0.0  ;;  %v1630_v19 = vmul.f32 %v1628_v16, %v1628_v16  ;;  %v3847_v17 = vcombine.low %v1666_v63, %v1674_v3  ;;  %v4416_v55 = vld [vmem:[%s5508_s11 + $0x28] sm:$0xff]   ;;  %v4422_v63 = vld [vmem:[%s5508_s11 + $0x78] sm:$0xff]  }
 0xd58   : > { %1632 = vadd.xlane.f32.xlu0 %v1631_v18  ;;  %v3849_v18 = vcombine.low %v1667_v8, %v1675_v4  ;;  %v4423_v3 = vld [vmem:[%s5508_s11 + $0xf8] sm:$0xff]  }
 0xd59   : > { %v1634_v12 = vsel %vm579_vm3, %v1630_v19, 0.0  ;;  %v4424_v8 = vld [vmem:[%s5508_s11 + $0x38] sm:$0xff]  }
 0xd5a   : > { %1635 = vadd.xlane.f32.xlu1 %v1634_v12  ;;  %v4425_v4 = vld [vmem:[%s5508_s11 + $0xb8] sm:$0xff]  }
 0xde5   : > { %v1633_v42 = vpop.xlane.xlu0 %1632 }
 0xde6   : > { %v1637_v43 = vmul.f32 0.03125, %v1633_v42  ;;  %v4401_v42 = vld [vmem:[%s5508_s11 + $0x88] sm:$0xff]  }
 0xde7   : > { %v1636_v44 = vpop.xlane.xlu1 %1635 }
 0xde8   : > { %v1639_v45 = vadd.f32 1e-05, %v1637_v43  ;;  %v1638_v30 = vmul.f32 0.03125, %v1636_v44  ;;  %v4402_v43 = vld [vmem:[%s5508_s11 + $0x50] sm:$0xff]  }
 0xde9   : > { %v4403_v44 = vld [vmem:[%s5508_s11 + $0xd0] sm:$0xff]  }
 0xdea   : > { %4554 = vrsqrt.f32 %v1639_v45  ;;  %v1640_v1 = vadd.f32 1e-05, %v1638_v30  ;;  %v4404_v45 = vld [vmem:[%s5508_s11 + $0x10] sm:$0xff]  }
 0xdeb   : > { %v4405_v30 = vld [vmem:[%s5508_s11 + $0x90] sm:$0xff]  }
 0xdec   : > { %4556 = vrsqrt.f32 %v1640_v1  ;;  %v4406_v1 = vld [vmem:[%s5508_s11 + $0x58] sm:$0xff]  }
 0xdf4   : > { %v4555_v46 = vpop.eup %4554 }
 0xdf5   : > { %v1643_v48 = vmul.f32 %v4555_v46, %v1627_v11  ;;  %v1690_v11 = vld [vmem:[%s5506_s9 + $0xe0] sm:$0xff]  ;;  %v4407_v46 = vld [vmem:[%s5508_s11 + $0xd8] sm:$0xff]  }
 0xdf6   : > { %v4557_v49 = vpop.eup %4556  ;;  %v3864_v19 = vcombine.high %v1682_v10, %v1690_v11  ;;  %v3863_v0 = vcombine.low %v1682_v10, %v1690_v11  ;;  %v5119_v11 = vld [vmem:[%s5507_s10 + $0x8] sm:$0xff] }
 0xdf7   : > { %v1651_v50 = vmul.f32 %v3837_v47, %v1643_v48  ;;  %v1644_v51 = vmul.f32 %v4557_v49, %v1628_v16  ;;  %v1691_v16 = vld [vmem:[%s5506_s9 + $0xe8] sm:$0xff]  ;;  %v4409_v48 = vld [vmem:[%s5508_s11 + $0x98] sm:$0xff]   ;;  %v4410_v49 = vld [vmem:[%s5508_s11 + $0x60] sm:$0xff]  }
 0xdf8   : > { %v3866_v12 = vcombine.high %v1683_v15, %v1691_v16  ;;  %v3865_v2 = vcombine.low %v1683_v15, %v1691_v16 }
 0xdf9   : > { %v1652_v53 = vmul.f32 %v3837_v47, %v1644_v51  ;;  %v4933_v58 = vadd.f32 %v3838_v52, %v1651_v50  ;;  %v4408_v47 = vld [vmem:[%s5508_s11 + $0x18] sm:$0xff]   ;;  %v4411_v50 = vld [vmem:[%s5508_s11 + $0xe0] sm:$0xff]  }
 0xdfa   : > { %v4412_v51 = vld [vmem:[%s5508_s11 + $0x20] sm:$0xff]  }
 0xdfb   : > { %v4935_v59 = vadd.f32 %v3838_v52, %v1652_v53  ;;  %v4413_v52 = vld [vmem:[%s5508_s11 + $0xa0] sm:$0xff]   ;;  %v4414_v53 = vld [vmem:[%s5508_s11 + $0x68] sm:$0xff]  }
 0xdfd   : > { %v4939_v61 = vpack.c.bf16 %v4935_v59, %v4933_v58 }
 0xdff   : > { %3871 = vmatmul.mubr.msk.bf16.vlgmr.msra.gmra.mrb[36].mxu1 %vm579_vm3, %v4939_v61  ;;  %3872 = vmatmul.mubr.msk.bf16.vlgmr.msra.gmra.mrb[40].mxu0 %vm579_vm3, %v4939_v61 }
 0xe00   : > { %2028 = vmatpush1.bf16.msra.mxu1 %v3843_v39  ;;  %2071 = vmatpush1.bf16.msra.mxu0 %v3845_v40  ;;  %v4397_v39 = vld [vmem:[%s5508_s11 + $0x80] sm:$0xff]   ;;  %v4398_v40 = vld [vmem:[%s5508_s11 + $0x48] sm:$0xff]  }
 0xe01   : > { %2029 = vmatprep.subr.bf16.mxu1 %v3860_v62  ;;  %2072 = vmatprep.subr.bf16.mxu0 %v3862_v14  ;;  %v4420_v62 = vld [vmem:[%s5508_s11 + $0x30] sm:$0xff]  }
 0xe02   : > { %2059 = vmatprep.mubr.bf16.mxu1 %v4586_v36  ;;  %2102 = vmatprep.mubr.bf16.mxu0 %v4586_v36  ;;  %v4421_v14 = vld [vmem:[%s5508_s11 + $0xb0] sm:$0xff]  }
 0xe04   : > { %2030 = vmatpush1.bf16.msra.mxu1 %v3859_v5  ;;  %2073 = vmatpush1.bf16.msra.mxu0 %v3861_v6  ;;  %v4426_v5 = vld [vmem:[%s5508_s11 + $0x140] sm:$0xff]  }
 0xe05   : > { %2113 = vmatprep.subr.bf16.mxu1 %v3848_v7  ;;  %2156 = vmatprep.subr.bf16.mxu0 %v3850_v9  ;;  %v4427_v6 = vld [vmem:[%s5508_s11 + $0x1c0] sm:$0xff]   ;;  %v1698_v7 = vlaneseq }
 0xe07   : > { %3873 = vmatmul.mubr.msk.bf16.vlgmr.msra.gmra.mrb[40].mxu1 %vm579_vm3, %v4939_v61  ;;  %3874 = vmatmul.mubr.msk.bf16.vlgmr.msra.gmra.mrb[44].mxu0 %vm579_vm3, %v4939_v61  ;;  %v5113_v9 = vshrl.u32 %v1698_v7, 7 }
 0xe08   : > { %2114 = vmatpush1.bf16.msra.mxu1 %v3847_v17  ;;  %2157 = vmatpush1.bf16.msra.mxu0 %v3849_v18  ;;  %v1694_v18 = vld [vmem:[%s5507_s10] sm:$0xff] }
 0xe09   : > { %2115 = vmatprep.subr.bf16.mxu1 %v3864_v19  ;;  %2158 = vmatprep.subr.bf16.mxu0 %v3866_v12  ;;  %v1724_v10 = vsub.s32 6, %v5113_v9  ;;  %v1700_v16 = vsub.s32 0, %v5113_v9  ;;  %v1708_v17 = vsub.s32 2, %v5113_v9  ;;  %v1704_v19 = vsub.s32 1, %v5113_v9 }
 0xe0a   : > { %2145 = vmatprep.mubr.bf16.mxu1 %v4586_v36  ;;  %2188 = vmatprep.mubr.bf16.mxu0 %v4586_v36  ;;  %v1712_v12 = vsub.s32 3, %v5113_v9  ;;  %v1728_v25 = vsub.s32 7, %v5113_v9 }
 0xe0b   : > { %v5122_v15 = vrot.slane %v5119_v11, %v1724_v10  ;;  %v1701_v13 = vrot.slane %v1694_v18, %v1700_v16  ;;  %v1709_v20 = vrot.slane %v1694_v18, %v1708_v17  ;;  %v1705_v21 = vrot.slane %v1694_v18, %v1704_v19 }
 0xe0c   : > { %2116 = vmatpush1.bf16.msra.mxu1 %v3863_v0  ;;  %2159 = vmatpush1.bf16.msra.mxu0 %v3865_v2  ;;  %v1713_v60 = vrot.slane %v1694_v18, %v1712_v12  ;;  %v1716_v0 = vsub.s32 4, %v5113_v9 }
 0xe0d   : > { %2199 = vmatprep.subr.bf16.mxu1 %v3852_v22  ;;  %2242 = vmatprep.subr.bf16.mxu0 %v3854_v23  ;;  %v1720_v23 = vsub.s32 5, %v5113_v9 }
 0xe0f   : > { %3875 = vmatmul.mubr.msk.bf16.vlgmr.msra.gmra.mrb[44].mxu1 %vm579_vm3, %v4939_v61  ;;  %3876 = vmatmul.mubr.msk.bf16.vlgmr.msra.gmra.mrb[48].mxu0 %vm579_vm3, %v4939_v61 }
 0xe10   : > { %2200 = vmatpush1.bf16.msra.mxu1 %v3851_v29  ;;  %2243 = vmatpush1.bf16.msra.mxu0 %v3853_v31 }
 0xe11   : > { %2201 = vmatprep.subr.bf16.mxu1 %v3868_v33  ;;  %2244 = vmatprep.subr.bf16.mxu0 %v3870_v34 }
 0xe12   : > { %2231 = vmatprep.mubr.bf16.mxu1 %v4586_v36  ;;  %2274 = vmatprep.mubr.bf16.mxu0 %v4586_v36  ;;  %v4399_v36 = vld [vmem:[%s5508_s11 + $0xc8] sm:$0xff]  }
 0xe14   : > { %2202 = vmatpush1.bf16.msra.mxu1 %v3867_v24  ;;  %2245 = vmatpush1.bf16.msra.mxu0 %v3869_v32 }
 0xe15   : > { %4056 = vmatprep.subr.bf16.mxu1 %v4394_v35  ;;  %4078 = vmatprep.subr.bf16.mxu0 %v4395_v37 }
 0xe17   : > { %3877 = vmatmul.mubr.msk.bf16.vlgmr.msra.gmra.mrb[48].mxu1 %vm579_vm3, %v4939_v61  ;;  %3878 = vmatmul.mubr.msk.bf16.vlgmr.msra.gmra.mrb[52].mxu0 %vm579_vm3, %v4939_v61  ;;  %v4419_v61 = vld [vmem:[%s5508_s11 + $0xf0] sm:$0xff]  }
 0xe18   : > { %4057 = vmatpush3.bf16.msra.mxu1 %v4396_v38  ;;  %4079 = vmatpush3.bf16.msra.mxu0 %v4397_v39  ;;  %v1717_v39 = vrot.slane %v1694_v18, %v1716_v0 }
 0xe19   : > { %4058 = vmatprep.subr.bf16.mxu1 %v4398_v40  ;;  %4080 = vmatprep.subr.bf16.mxu0 %v4399_v36  ;;  %v1725_v40 = vrot.slane %v1694_v18, %v1724_v10 }
 0xe1c   : > { %4059 = vmatpush3.bf16.msra.mxu1 %v4400_v41  ;;  %4081 = vmatpush3.bf16.msra.mxu0 %v4401_v42  ;;  %v1721_v42 = vrot.slane %v1694_v18, %v1720_v23 }
 0xe1d   : > { %4060 = vmatprep.subr.bf16.mxu1 %v4402_v43  ;;  %4082 = vmatprep.subr.bf16.mxu0 %v4403_v44  ;;  %v1729_v43 = vrot.slane %v1694_v18, %v1728_v25  ;;  %v1741_v18 = vrot.slane %v5119_v11, %v1708_v17  ;;  %v4433_v17 = vld [vmem:[%s5508_s11 + $0x188] sm:$0xff]  }
 0xe20   : > { %4061 = vmatpush3.bf16.msra.mxu1 %v4404_v45  ;;  %4083 = vmatpush3.bf16.msra.mxu0 %v4405_v30 }
 0xe21   : > { %4062 = vmatprep.subr.bf16.mxu1 %v4406_v1  ;;  %4084 = vmatprep.subr.bf16.mxu0 %v4407_v46 }
 0xe24   : > { %4063 = vmatpush3.bf16.msra.mxu1 %v4408_v47  ;;  %4085 = vmatpush3.bf16.msra.mxu0 %v4409_v48 }
 0xe25   : > { %4064 = vmatprep.subr.bf16.mxu1 %v4410_v49  ;;  %4086 = vmatprep.subr.bf16.mxu0 %v4411_v50 }
 0xe28   : > { %4065 = vmatpush3.bf16.msra.mxu1 %v4412_v51  ;;  %4087 = vmatpush3.bf16.msra.mxu0 %v4413_v52 }
 0xe29   : > { %4066 = vmatprep.subr.bf16.mxu1 %v4414_v53  ;;  %4088 = vmatprep.subr.bf16.mxu0 %v4415_v54 }
 0xe2c   : > { %4067 = vmatpush3.bf16.msra.mxu1 %v4416_v55  ;;  %4089 = vmatpush3.bf16.msra.mxu0 %v4417_v56  ;;  %v4428_v56 = vld [vmem:[%s5508_s11 + $0x100] sm:$0xff]  }
 0xe2d   : > { %4068 = vmatprep.subr.bf16.mxu1 %v4418_v57  ;;  %4090 = vmatprep.subr.bf16.mxu0 %v4419_v61  ;;  %v4429_v57 = vld [vmem:[%s5508_s11 + $0x180] sm:$0xff]  }
 0xe30   : > { %4069 = vmatpush3.bf16.msra.mxu1 %v4420_v62  ;;  %4091 = vmatpush3.bf16.msra.mxu0 %v4421_v14 }
 0xe31   : > { %4070 = vmatprep.subr.bf16.mxu1 %v4422_v63  ;;  %4092 = vmatprep.subr.bf16.mxu0 %v4423_v3  ;;  %v4430_v3 = vld [vmem:[%s5508_s11 + $0x148] sm:$0xff]  }
 0xe34   : > { %4071 = vmatpush3.bf16.msra.mxu1 %v4424_v8  ;;  %4093 = vmatpush3.bf16.msra.mxu0 %v4425_v4  ;;  %v4431_v8 = vld [vmem:[%s5508_s11 + $0x1c8] sm:$0xff]   ;;  %v1733_v4 = vrot.slane %v5119_v11, %v1700_v16 }
 0xe35   : > { %4100 = vmatprep.subr.bf16.mxu1 %v4426_v5  ;;  %4122 = vmatprep.subr.bf16.mxu0 %v4427_v6 }
 0xed2   : > { %v1975_v2 = vpop.f32.mrb[36].mxu1  ;;  %v2018_v22 = vpop.f32.mrb[40].mxu0 }
 0xed3   : > { %v1976_v26 = vadd.f32 %v1975_v2, %v1701_v13  ;;  %v2019_v27 = vadd.f32 %v2018_v22, %v1709_v20  ;;  %v1977_v28 = vpop.f32.mrb[37].mxu1  ;;  %v2020_v29 = vpop.f32.mrb[41].mxu0  ;;  %v1737_v2 = vrot.slane %v5119_v11, %v1704_v19 }
 0xed4   : > { %v1978_v31 = vadd.f32 %v1977_v28, %v1705_v21  ;;  %v2021_v33 = vadd.f32 %v2020_v29, %v1713_v60  ;;  %v1979_v34 = vpop.f32.mrb[38].mxu1  ;;  %v2022_v24 = vpop.f32.mrb[42].mxu0 }
 0xed5   : > { %v1980_v32 = vadd.f32 %v1979_v34, %v1701_v13  ;;  %v2023_v35 = vadd.f32 %v2022_v24, %v1709_v20  ;;  %v1981_v37 = vpop.f32.mrb[39].mxu1  ;;  %v2024_v38 = vpop.f32.mrb[43].mxu0  ;;  %v2285_v44 = vmax.f32 %v1976_v26, 0.0  ;;  %v2287_v45 = vmax.f32 %v2019_v27, 0.0  ;;  %v4432_v26 = vld [vmem:[%s5508_s11 + $0x108] sm:$0xff]   ;;  %v4435_v34 = vld [vmem:[%s5508_s11 + $0x1d0] sm:$0xff]  }
 0xed6   : > { %v1982_v36 = vadd.f32 %v1981_v37, %v1705_v21  ;;  %v2025_v41 = vadd.f32 %v2024_v38, %v1713_v60  ;;  %v2286_v46 = vmax.f32 %v1978_v31, 0.0  ;;  %v2288_v47 = vmax.f32 %v2021_v33, 0.0  ;;  %v4434_v33 = vld [vmem:[%s5508_s11 + $0x150] sm:$0xff]  }
 0xed7   : > { %v2301_v30 = vmax.f32 %v1980_v32, 0.0  ;;  %v2303_v1 = vmax.f32 %v2023_v35, 0.0  ;;  %v1745_v27 = vrot.slane %v5119_v11, %v1712_v12 }
 0xed8   : > { %v2302_v48 = vmax.f32 %v1982_v36, 0.0  ;;  %v2304_v49 = vmax.f32 %v2025_v41, 0.0 }
 0xed9   : > { %v2317_v50 = vpack.c.bf16 %v2301_v30, %v2285_v44  ;;  %v2319_v51 = vpack.c.bf16 %v2303_v1, %v2287_v45 }
 0xeda   : > { %v2318_v52 = vpack.c.bf16 %v2302_v48, %v2286_v46  ;;  %v2320_v53 = vpack.c.bf16 %v2304_v49, %v2288_v47  ;;  %v2061_v54 = vpop.f32.mrb[40].mxu1  ;;  %v2104_v55 = vpop.f32.mrb[44].mxu0  ;;  %v4438_v46 = vld [vmem:[%s5508_s11 + $0x158] sm:$0xff]  }
 0xedb   : > { %v2062_v61 = vadd.f32 %v2061_v54, %v1717_v39  ;;  %v2105_v62 = vadd.f32 %v2104_v55, %v1725_v40  ;;  %v2063_v14 = vpop.f32.mrb[41].mxu1  ;;  %v2106_v63 = vpop.f32.mrb[45].mxu0  ;;  %v4439_v47 = vld [vmem:[%s5508_s11 + $0x1d8] sm:$0xff]  }
 0xedc   : > { %v2064_v5 = vadd.f32 %v2063_v14, %v1721_v42  ;;  %v2107_v6 = vadd.f32 %v2106_v63, %v1729_v43  ;;  %v2065_v7 = vpop.f32.mrb[42].mxu1  ;;  %v2108_v10 = vpop.f32.mrb[46].mxu0  ;;  %3396 = vmatprep.mubr.bf16.mxu1 %v2318_v52  ;;  %3437 = vmatprep.mubr.bf16.mxu0 %v2320_v53  ;;  %v4440_v14 = vld [vmem:[%s5508_s11 + $0x118] sm:$0xff]  }
 0xedd   : > { %v2066_v13 = vadd.f32 %v2065_v7, %v1717_v39  ;;  %v2109_v20 = vadd.f32 %v2108_v10, %v1725_v40  ;;  %v2067_v21 = vpop.f32.mrb[43].mxu1  ;;  %v2110_v60 = vpop.f32.mrb[47].mxu0  ;;  %3397 = vmatmul.mubr.bf16.vlgmr.msra.gmra.mrb[52].mxu1 %v2317_v50  ;;  %3438 = vmatmul.mubr.bf16.vlgmr.msra.gmra.mrb[56].mxu0 %v2319_v51  ;;  %v2289_v28 = vmax.f32 %v2062_v61, 0.0  ;;  %v2291_v29 = vmax.f32 %v2105_v62, 0.0  ;;  %v4441_v63 = vld [vmem:[%s5508_s11 + $0x198] sm:$0xff]  }
 0xede   : > { %v2068_v22 = vadd.f32 %v2067_v21, %v1721_v42  ;;  %v2111_v16 = vadd.f32 %v2110_v60, %v1729_v43  ;;  %4101 = vmatpush3.bf16.msra.mxu1 %v4428_v56  ;;  %4123 = vmatpush3.bf16.msra.mxu0 %v4429_v57  ;;  %v2290_v24 = vmax.f32 %v2064_v5, 0.0  ;;  %v2292_v32 = vmax.f32 %v2107_v6, 0.0  ;;  %v4436_v42 = vld [vmem:[%s5508_s11 + $0x110] sm:$0xff]   ;;  %v4442_v5 = vld [vmem:[%s5508_s11 + $0x160] sm:$0xff]  }
 0xedf   : > { %v2305_v31 = vmax.f32 %v2066_v13, 0.0  ;;  %v2307_v19 = vmax.f32 %v2109_v20, 0.0  ;;  %4102 = vmatprep.subr.bf16.mxu1 %v4430_v3  ;;  %4124 = vmatprep.subr.bf16.mxu0 %v4431_v8  ;;  %v4437_v43 = vld [vmem:[%s5508_s11 + $0x190] sm:$0xff]   ;;  %v1749_v56 = vrot.slane %v5119_v11, %v1716_v0  ;;  %v1753_v57 = vrot.slane %v5119_v11, %v1720_v23  ;;  %v4443_v6 = vld [vmem:[%s5508_s11 + $0x1e0] sm:$0xff]  }
 0xee0   : > { %v2306_v35 = vmax.f32 %v2068_v22, 0.0  ;;  %v2308_v37 = vmax.f32 %v2111_v16, 0.0  ;;  %v1761_v0 = vrot.slane %v5119_v11, %v1728_v25  ;;  %v4445_v22 = vld [vmem:[%s5508_s11 + $0x1a0] sm:$0xff]  }
 0xee1   : > { %v5176_v38 = vpack.c.bf16 %v2305_v31, %v2289_v28  ;;  %v5178_v12 = vpack.c.bf16 %v2307_v19, %v2291_v29  ;;  %v4446_v28 = vld [vmem:[%s5508_s11 + $0x168] sm:$0xff]  }
 0xee2   : > { %v2322_v39 = vpack.c.bf16 %v2306_v35, %v2290_v24  ;;  %v2324_v40 = vpack.c.bf16 %v2308_v37, %v2292_v32  ;;  %4103 = vmatpush3.bf16.msra.mxu1 %v4432_v26  ;;  %4125 = vmatpush3.bf16.msra.mxu0 %v4433_v17  ;;  %v2147_v36 = vpop.f32.mrb[44].mxu1  ;;  %v2190_v41 = vpop.f32.mrb[48].mxu0  ;;  %v4447_v29 = vld [vmem:[%s5508_s11 + $0x1e8] sm:$0xff]  }
 0xee3   : > { %v2148_v44 = vadd.f32 %v2147_v36, %v1733_v4  ;;  %v2191_v45 = vadd.f32 %v2190_v41, %v1741_v18  ;;  %v2149_v30 = vpop.f32.mrb[45].mxu1  ;;  %v2192_v1 = vpop.f32.mrb[49].mxu0  ;;  %4104 = vmatprep.subr.bf16.mxu1 %v4434_v33  ;;  %4126 = vmatprep.subr.bf16.mxu0 %v4435_v34  ;;  %v4448_v36 = vld [vmem:[%s5508_s11 + $0x128] sm:$0xff]  }
 0xee4   : > { %v2150_v48 = vadd.f32 %v2149_v30, %v1737_v2  ;;  %v2193_v49 = vadd.f32 %v2192_v1, %v1745_v27  ;;  %v2151_v50 = vpop.f32.mrb[46].mxu1  ;;  %v2194_v51 = vpop.f32.mrb[50].mxu0  ;;  %3478 = vmatprep.mubr.bf16.mxu1 %v2322_v39  ;;  %3519 = vmatprep.mubr.bf16.mxu0 %v2324_v40  ;;  %v4449_v41 = vld [vmem:[%s5508_s11 + $0x1a8] sm:$0xff]   ;;  %v4451_v30 = vld [vmem:[%s5508_s11 + $0x1f0] sm:$0xff]  }
 0xee5   : > { %v2152_v52 = vadd.f32 %v2151_v50, %v1733_v4  ;;  %v2195_v53 = vadd.f32 %v2194_v51, %v1741_v18  ;;  %v2153_v54 = vpop.f32.mrb[47].mxu1  ;;  %v2196_v55 = vpop.f32.mrb[51].mxu0  ;;  %v2293_v3 = vmax.f32 %v2148_v44, 0.0  ;;  %v2295_v8 = vmax.f32 %v2191_v45, 0.0 }
 0xee6   : > { %v2154_v61 = vadd.f32 %v2153_v54, %v1737_v2  ;;  %v2197_v62 = vadd.f32 %v2196_v55, %v1745_v27  ;;  %4105 = vmatpush3.bf16.msra.mxu1 %v4436_v42  ;;  %4127 = vmatpush3.bf16.msra.mxu0 %v4437_v43  ;;  %v2294_v7 = vmax.f32 %v2150_v48, 0.0  ;;  %v2296_v10 = vmax.f32 %v2193_v49, 0.0  ;;  %v4444_v2 = vld [vmem:[%s5508_s11 + $0x120] sm:$0xff]   ;;  %v4453_v54 = vld [vmem:[%s5508_s11 + $0x1b0] sm:$0xff]   ;;  %v4454_v55 = vld [vmem:[%s5508_s11 + $0x178] sm:$0xff]  }
 0xee7   : > { %v2309_v4 = vmax.f32 %v2152_v52, 0.0  ;;  %v2311_v23 = vmax.f32 %v2195_v53, 0.0  ;;  %4106 = vmatprep.subr.bf16.mxu1 %v4438_v46  ;;  %4128 = vmatprep.subr.bf16.mxu0 %v4439_v47  ;;  %v4452_v53 = vld [vmem:[%s5508_s11 + $0x130] sm:$0xff]  }
 0xee8   : > { %v2310_v18 = vmax.f32 %v2154_v61, 0.0  ;;  %v2312_v9 = vmax.f32 %v2197_v62, 0.0  ;;  %v4457_v61 = vld [vmem:[%s5508_s11 + $0x1b8] sm:$0xff]   ;;  %v4458_v62 = vld [vmem:[%s5508_s11 + $0x240] sm:$0xff]  }
 0xee9   : > { %v5213_v13 = vpack.c.bf16 %v2309_v4, %v2293_v3  ;;  %v5215_v11 = vpack.c.bf16 %v2311_v23, %v2295_v8  ;;  %v4462_v3 = vld [vmem:[%s5508_s11 + $0x248] sm:$0xff]  }
 0xeea   : > { %v5217_v25 = vpack.c.bf16 %v2310_v18, %v2294_v7  ;;  %v5219_v20 = vpack.c.bf16 %v2312_v9, %v2296_v10  ;;  %4107 = vmatpush3.bf16.msra.mxu1 %v4440_v14  ;;  %4129 = vmatpush3.bf16.msra.mxu0 %v4441_v63  ;;  %v2233_v21 = vpop.f32.mrb[48].mxu1  ;;  %v2276_v60 = vpop.f32.mrb[52].mxu0  ;;  %v4459_v14 = vld [vmem:[%s5508_s11 + $0x2c0] sm:$0xff]   ;;  %v4463_v8 = vld [vmem:[%s5508_s11 + $0x2c8] sm:$0xff]   ;;  %v4470_v7 = vld [vmem:[%s5508_s11 + $0x258] sm:$0xff]  }
 0xeeb   : > { %v2234_v16 = vadd.f32 %v2233_v21, %v1749_v56  ;;  %v2277_v26 = vadd.f32 %v2276_v60, %v5122_v15  ;;  %v2235_v17 = vpop.f32.mrb[49].mxu1  ;;  %v2278_v27 = vpop.f32.mrb[53].mxu0  ;;  %4108 = vmatprep.subr.bf16.mxu1 %v4442_v5  ;;  %4130 = vmatprep.subr.bf16.mxu0 %v4443_v6  ;;  %v4460_v63 = vld [vmem:[%s5508_s11 + $0x200] sm:$0xff]   ;;  %v4464_v4 = vld [vmem:[%s5508_s11 + $0x208] sm:$0xff]   ;;  %v4468_v5 = vld [vmem:[%s5508_s11 + $0x210] sm:$0xff]  }
 0xeec   : > { %v2236_v31 = vadd.f32 %v2235_v17, %v1753_v57  ;;  %v2279_v19 = vadd.f32 %v2278_v27, %v1761_v0  ;;  %v2237_v33 = vpop.f32.mrb[50].mxu1  ;;  %v2280_v34 = vpop.f32.mrb[54].mxu0  ;;  %v4465_v23 = vld [vmem:[%s5508_s11 + $0x288] sm:$0xff]   ;;  %v4469_v6 = vld [vmem:[%s5508_s11 + $0x290] sm:$0xff]   ;;  %v4471_v10 = vld [vmem:[%s5508_s11 + $0x2d8] sm:$0xff]  }
 0xeed   : > { %v2238_v24 = vadd.f32 %v2237_v33, %v1749_v56  ;;  %v2281_v32 = vadd.f32 %v2280_v34, %v5122_v15  ;;  %v2239_v35 = vpop.f32.mrb[51].mxu1  ;;  %v2282_v37 = vpop.f32.mrb[55].mxu0  ;;  %v2297_v42 = vmax.f32 %v2234_v16, 0.0  ;;  %v2299_v43 = vmax.f32 %v2277_v26, 0.0  ;;  %v4450_v15 = vld [vmem:[%s5508_s11 + $0x170] sm:$0xff]   ;;  %v4455_v56 = vld [vmem:[%s5508_s11 + $0x1f8] sm:$0xff]  }
 0xeee   : > { %v2240_v39 = vadd.f32 %v2239_v35, %v1753_v57  ;;  %v2283_v40 = vadd.f32 %v2282_v37, %v1761_v0  ;;  %4109 = vmatpush3.bf16.msra.mxu1 %v4444_v2  ;;  %4131 = vmatpush3.bf16.msra.mxu0 %v4445_v22  ;;  %v2298_v1 = vmax.f32 %v2236_v31, 0.0  ;;  %v2300_v46 = vmax.f32 %v2279_v19, 0.0  ;;  %v4456_v57 = vld [vmem:[%s5508_s11 + $0x138] sm:$0xff]   ;;  %v4461_v0 = vld [vmem:[%s5508_s11 + $0x280] sm:$0xff]   ;;  %v4478_v2 = vld [vmem:[%s5508_s11 + $0x268] sm:$0xff]  }
 0xeef   : > { %v2313_v44 = vmax.f32 %v2238_v24, 0.0  ;;  %v2315_v45 = vmax.f32 %v2281_v32, 0.0  ;;  %4110 = vmatprep.subr.bf16.mxu1 %v4446_v28  ;;  %4132 = vmatprep.subr.bf16.mxu0 %v4447_v29  ;;  %v4472_v18 = vld [vmem:[%s5508_s11 + $0x218] sm:$0xff]   ;;  %v4476_v21 = vld [vmem:[%s5508_s11 + $0x220] sm:$0xff]   ;;  %v4479_v22 = vld [vmem:[%s5508_s11 + $0x2e8] sm:$0xff]  }
 0xef0   : > { %v2314_v47 = vmax.f32 %v2240_v39, 0.0  ;;  %v2316_v48 = vmax.f32 %v2283_v40, 0.0  ;;  %v4473_v9 = vld [vmem:[%s5508_s11 + $0x298] sm:$0xff]   ;;  %v4477_v60 = vld [vmem:[%s5508_s11 + $0x2a0] sm:$0xff]   ;;  %v4480_v16 = vld [vmem:[%s5508_s11 + $0x228] sm:$0xff]  }
 0xef1   : > { %v5247_v49 = vpack.c.bf16 %v2313_v44, %v2297_v42  ;;  %v5249_v50 = vpack.c.bf16 %v2315_v45, %v2299_v43  ;;  %v4481_v26 = vld [vmem:[%s5508_s11 + $0x2a8] sm:$0xff]   ;;  %v4482_v17 = vld [vmem:[%s5508_s11 + $0x270] sm:$0xff]   ;;  %v4486_v31 = vld [vmem:[%s5508_s11 + $0x278] sm:$0xff]  }
 0xef2   : > { %v5251_v51 = vpack.c.bf16 %v2314_v47, %v2298_v1  ;;  %v5253_v52 = vpack.c.bf16 %v2316_v48, %v2300_v46  ;;  %4111 = vmatpush3.bf16.msra.mxu1 %v4448_v36  ;;  %4133 = vmatpush3.bf16.msra.mxu0 %v4449_v41  ;;  %v4483_v27 = vld [vmem:[%s5508_s11 + $0x2f0] sm:$0xff]   ;;  %v4487_v19 = vld [vmem:[%s5508_s11 + $0x2f8] sm:$0xff]   ;;  %v4490_v24 = vld [vmem:[%s5508_s11 + $0x340] sm:$0xff]  }
 0xef3   : > { %4112 = vmatprep.subr.bf16.mxu1 %v4450_v15  ;;  %4134 = vmatprep.subr.bf16.mxu0 %v4451_v30  ;;  %v4484_v28 = vld [vmem:[%s5508_s11 + $0x230] sm:$0xff]   ;;  %v4488_v33 = vld [vmem:[%s5508_s11 + $0x238] sm:$0xff]   ;;  %v4491_v32 = vld [vmem:[%s5508_s11 + $0x3c0] sm:$0xff]  }
 0xef4   : > { %v4485_v29 = vld [vmem:[%s5508_s11 + $0x2b0] sm:$0xff]   ;;  %v4489_v34 = vld [vmem:[%s5508_s11 + $0x2b8] sm:$0xff]   ;;  %v4492_v35 = vld [vmem:[%s5508_s11 + $0x300] sm:$0xff]  }
 0xef5   : > { %v4493_v37 = vld [vmem:[%s5508_s11 + $0x380] sm:$0xff]   ;;  %v4494_v39 = vld [vmem:[%s5508_s11 + $0x348] sm:$0xff]   ;;  %v4500_v42 = vld [vmem:[%s5508_s11 + $0x310] sm:$0xff]  }
 0xef6   : > { %4113 = vmatpush3.bf16.msra.mxu1 %v4452_v53  ;;  %4135 = vmatpush3.bf16.msra.mxu0 %v4453_v54  ;;  %v4495_v40 = vld [vmem:[%s5508_s11 + $0x3c8] sm:$0xff]   ;;  %v4501_v43 = vld [vmem:[%s5508_s11 + $0x390] sm:$0xff]   ;;  %v4502_v44 = vld [vmem:[%s5508_s11 + $0x358] sm:$0xff]  }
 0xef7   : > { %4114 = vmatprep.subr.bf16.mxu1 %v4454_v55  ;;  %4136 = vmatprep.subr.bf16.mxu0 %v4455_v56  ;;  %v4496_v36 = vld [vmem:[%s5508_s11 + $0x308] sm:$0xff]   ;;  %v4503_v45 = vld [vmem:[%s5508_s11 + $0x3d8] sm:$0xff]   ;;  %v4506_v1 = vld [vmem:[%s5508_s11 + $0x360] sm:$0xff]  }
 0xef8   : > { %v4497_v41 = vld [vmem:[%s5508_s11 + $0x388] sm:$0xff]   ;;  %v4504_v15 = vld [vmem:[%s5508_s11 + $0x318] sm:$0xff]   ;;  %v4507_v46 = vld [vmem:[%s5508_s11 + $0x3e0] sm:$0xff]  }
 0xef9   : > { %v4505_v30 = vld [vmem:[%s5508_s11 + $0x398] sm:$0xff]   ;;  %v4508_v47 = vld [vmem:[%s5508_s11 + $0x320] sm:$0xff]   ;;  %v4512_v53 = vld [vmem:[%s5508_s11 + $0x328] sm:$0xff]  }
 0xefa   : > { %4115 = vmatpush3.bf16.msra.mxu1 %v4456_v57  ;;  %4137 = vmatpush3.bf16.msra.mxu0 %v4457_v61  ;;  %v4509_v48 = vld [vmem:[%s5508_s11 + $0x3a0] sm:$0xff]   ;;  %v4513_v54 = vld [vmem:[%s5508_s11 + $0x3a8] sm:$0xff]   ;;  %v4514_v55 = vld [vmem:[%s5508_s11 + $0x370] sm:$0xff]  }
 0xefb   : > { %4144 = vmatprep.subr.bf16.mxu1 %v4458_v62  ;;  %4166 = vmatprep.subr.bf16.mxu0 %v4459_v14  ;;  %v4515_v56 = vld [vmem:[%s5508_s11 + $0x3f0] sm:$0xff]   ;;  %v4518_v62 = vld [vmem:[%s5508_s11 + $0x378] sm:$0xff]  }
 0xefc   : > { %v4516_v57 = vld [vmem:[%s5508_s11 + $0x330] sm:$0xff]   ;;  %v4519_v14 = vld [vmem:[%s5508_s11 + $0x3f8] sm:$0xff]  }
 0xefd   : > { %3479 = vmatmul.mubr.bf16.vlgmr.msra.gmra.mrb[56].mxu1 %v5176_v38  ;;  %3520 = vmatmul.mubr.bf16.vlgmr.msra.gmra.mrb[60].mxu0 %v5178_v12  ;;  %v4466_v38 = vld [vmem:[%s5508_s11 + $0x250] sm:$0xff]  }
 0xefe   : > { %4145 = vmatpush3.bf16.msra.mxu1 %v4460_v63  ;;  %3560 = vmatprep.mubr.bf16.mxu1 %v5217_v25  ;;  %v4467_v12 = vld [vmem:[%s5508_s11 + $0x2d0] sm:$0xff]   ;;  %v4474_v25 = vld [vmem:[%s5508_s11 + $0x260] sm:$0xff]   ;;  %v4520_v63 = vld [vmem:[%s5508_s11 + $0x338] sm:$0xff]  }
 0xeff   : > { %4167 = vmatpush3.bf16.msra.mxu0 %v4461_v0  ;;  %3601 = vmatprep.mubr.bf16.mxu0 %v5219_v20  ;;  %v4475_v20 = vld [vmem:[%s5508_s11 + $0x2e0] sm:$0xff]   ;;  %v4517_v61 = vld [vmem:[%s5508_s11 + $0x3b0] sm:$0xff]   ;;  %v4521_v0 = vld [vmem:[%s5508_s11 + $0x3b8] sm:$0xff]  }
 0xf00   : > { %4146 = vmatprep.subr.bf16.mxu1 %v4462_v3  ;;  %4168 = vmatprep.subr.bf16.mxu0 %v4463_v8 }
 0xf02   : > { %4147 = vmatpush3.bf16.msra.mxu1 %v4464_v4  ;;  %v3879_v4 = vld [vmem:[%s5509_s12] ss:$0 sm:$0xff] }
 0xf03   : > { %4169 = vmatpush3.bf16.msra.mxu0 %v4465_v23  ;;  %4148 = vmatprep.subr.bf16.mxu1 %v4466_v38 }
 0xf04   : > { %4170 = vmatprep.subr.bf16.mxu0 %v4467_v12 }
 0xf06   : > { %4149 = vmatpush3.bf16.msra.mxu1 %v4468_v5 }
 0xf07   : > { %4171 = vmatpush3.bf16.msra.mxu0 %v4469_v6  ;;  %4150 = vmatprep.subr.bf16.mxu1 %v4470_v7 }
 0xf08   : > { %4172 = vmatprep.subr.bf16.mxu0 %v4471_v10 }
 0xf0a   : > { %4151 = vmatpush3.bf16.msra.mxu1 %v4472_v18 }
 0xf0b   : > { %4173 = vmatpush3.bf16.msra.mxu0 %v4473_v9  ;;  %4152 = vmatprep.subr.bf16.mxu1 %v4474_v25 }
 0xf0c   : > { %4174 = vmatprep.subr.bf16.mxu0 %v4475_v20 }
 0xf0e   : > { %4153 = vmatpush3.bf16.msra.mxu1 %v4476_v21 }
 0xf0f   : > { %4175 = vmatpush3.bf16.msra.mxu0 %v4477_v60  ;;  %4154 = vmatprep.subr.bf16.mxu1 %v4478_v2 }
 0xf10   : > { %4176 = vmatprep.subr.bf16.mxu0 %v4479_v22 }
 0xf12   : > { %4155 = vmatpush3.bf16.msra.mxu1 %v4480_v16 }
 0xf13   : > { %4177 = vmatpush3.bf16.msra.mxu0 %v4481_v26  ;;  %4156 = vmatprep.subr.bf16.mxu1 %v4482_v17 }
 0xf14   : > { %4178 = vmatprep.subr.bf16.mxu0 %v4483_v27 }
 0xf16   : > { %4157 = vmatpush3.bf16.msra.mxu1 %v4484_v28 }
 0xf17   : > { %4179 = vmatpush3.bf16.msra.mxu0 %v4485_v29  ;;  %4158 = vmatprep.subr.bf16.mxu1 %v4486_v31 }
 0xf18   : > { %4180 = vmatprep.subr.bf16.mxu0 %v4487_v19 }
 0xf1a   : > { %4159 = vmatpush3.bf16.msra.mxu1 %v4488_v33 }
 0xf1b   : > { %4181 = vmatpush3.bf16.msra.mxu0 %v4489_v34  ;;  %4188 = vmatprep.subr.bf16.mxu1 %v4490_v24 }
 0xf1c   : > { %4210 = vmatprep.subr.bf16.mxu0 %v4491_v32 }
 0xf1d   : > { %3561 = vmatmul.mubr.bf16.vlgmr.msra.gmra.mrb[60].mxu1 %v5213_v13  ;;  %v4498_v13 = vld [vmem:[%s5508_s11 + $0x350] sm:$0xff]  }
 0xf1e   : > { %3602 = vmatmul.mubr.bf16.vlgmr.msra.gmra.mrb[64].mxu0 %v5215_v11  ;;  %4189 = vmatpush3.bf16.msra.mxu1 %v4492_v35  ;;  %v4499_v11 = vld [vmem:[%s5508_s11 + $0x3d0] sm:$0xff]  }
 0xf1f   : > { %3642 = vmatprep.mubr.bf16.mxu1 %v5251_v51  ;;  %4211 = vmatpush3.bf16.msra.mxu0 %v4493_v37  ;;  %v4510_v51 = vld [vmem:[%s5508_s11 + $0x368] sm:$0xff]  }
 0xf20   : > { %3683 = vmatprep.mubr.bf16.mxu0 %v5253_v52  ;;  %4190 = vmatprep.subr.bf16.mxu1 %v4494_v39  ;;  %v4511_v52 = vld [vmem:[%s5508_s11 + $0x3e8] sm:$0xff]  }
 0xf21   : > { %4212 = vmatprep.subr.bf16.mxu0 %v4495_v40 }
 0xf22   : > { %4191 = vmatpush3.bf16.msra.mxu1 %v4496_v36 }
 0xf23   : > { %4213 = vmatpush3.bf16.msra.mxu0 %v4497_v41  ;;  %4192 = vmatprep.subr.bf16.mxu1 %v4498_v13 }
 0xf24   : > { %4214 = vmatprep.subr.bf16.mxu0 %v4499_v11 }
 0xf26   : > { %4193 = vmatpush3.bf16.msra.mxu1 %v4500_v42 }
 0xf27   : > { %4215 = vmatpush3.bf16.msra.mxu0 %v4501_v43  ;;  %4194 = vmatprep.subr.bf16.mxu1 %v4502_v44 }
 0xf28   : > { %4216 = vmatprep.subr.bf16.mxu0 %v4503_v45 }
 0xf2a   : > { %4195 = vmatpush3.bf16.msra.mxu1 %v4504_v15 }
 0xf2b   : > { %4217 = vmatpush3.bf16.msra.mxu0 %v4505_v30  ;;  %4196 = vmatprep.subr.bf16.mxu1 %v4506_v1 }
 0xf2c   : > { %4218 = vmatprep.subr.bf16.mxu0 %v4507_v46 }
 0xf2e   : > { %4197 = vmatpush3.bf16.msra.mxu1 %v4508_v47 }
 0xf2f   : > { %4219 = vmatpush3.bf16.msra.mxu0 %v4509_v48  ;;  %4198 = vmatprep.subr.bf16.mxu1 %v4510_v51 }
 0xf30   : > { %4220 = vmatprep.subr.bf16.mxu0 %v4511_v52 }
 0xf32   : > { %4199 = vmatpush3.bf16.msra.mxu1 %v4512_v53 }
 0xf33   : > { %4221 = vmatpush3.bf16.msra.mxu0 %v4513_v54  ;;  %4200 = vmatprep.subr.bf16.mxu1 %v4514_v55 }
 0xf34   : > { %4222 = vmatprep.subr.bf16.mxu0 %v4515_v56 }
 0xf36   : > { %4201 = vmatpush3.bf16.msra.mxu1 %v4516_v57 }
 0xf37   : > { %4223 = vmatpush3.bf16.msra.mxu0 %v4517_v61  ;;  %4202 = vmatprep.subr.bf16.mxu1 %v4518_v62 }
 0xf38   : > { %4224 = vmatprep.subr.bf16.mxu0 %v4519_v14 }
 0xf3a   : > { %4203 = vmatpush3.bf16.msra.mxu1 %v4520_v63 }
 0xf3b   : > { %4225 = vmatpush3.bf16.msra.mxu0 %v4521_v0 }
 0xf3d   : > { %3643 = vmatmul.mubr.bf16.vlgmr.msra.gmra.mrb[64].mxu1 %v5247_v49 }
 0xf3e   : > { %3684 = vmatmul.mubr.bf16.vlgmr.msra.gmra.mrb[68].mxu0 %v5249_v50 }
 0xfb0   : > { %v4072_v3 = vpop.f32.mrb[52].mxu1  ;;  %v4094_v8 = vpop.f32.mrb[56].mxu0 }
 0xfb1   : > { %v4073_v23 = vpop.f32.mrb[53].mxu1  ;;  %v4095_v38 = vpop.f32.mrb[57].mxu0 }
 0xfb2   : > { %v4074_v12 = vadd.f32 %v4073_v23, %v4072_v3  ;;  %v4096_v5 = vadd.f32 %v4095_v38, %v4094_v8  ;;  %v4075_v6 = vpop.f32.mrb[54].mxu1  ;;  %v4097_v7 = vpop.f32.mrb[58].mxu0 }
 0xfb3   : > { %v4076_v10 = vpop.f32.mrb[55].mxu1  ;;  %v4098_v18 = vpop.f32.mrb[59].mxu0 }
 0xfb4   : > { %v3399_v9 = vadd.f32 %v4074_v12, %v3879_v4  ;;  %v4077_v25 = vadd.f32 %v4076_v10, %v4075_v6  ;;  %v4099_v20 = vadd.f32 %v4098_v18, %v4097_v7 }
 0xfb6   : > { %v3440_v49 = vadd.f32 %v4096_v5, %v3399_v9  ;;  %v3402_v21 = vadd.f32 %v4077_v25, %v3879_v4 }
 0xfb8   : > { %v3443_v50 = vadd.f32 %v4099_v20, %v3402_v21 }
 0xfd0   : > { %v4116_v60 = vpop.f32.mrb[56].mxu1  ;;  %v4138_v2 = vpop.f32.mrb[60].mxu0 }
 0xfd1   : > { %v4117_v22 = vpop.f32.mrb[57].mxu1  ;;  %v4139_v16 = vpop.f32.mrb[61].mxu0 }
 0xfd2   : > { %v4118_v26 = vadd.f32 %v4117_v22, %v4116_v60  ;;  %v4140_v17 = vadd.f32 %v4139_v16, %v4138_v2  ;;  %v4119_v27 = vpop.f32.mrb[58].mxu1  ;;  %v4141_v28 = vpop.f32.mrb[62].mxu0 }
 0xfd3   : > { %v4120_v29 = vpop.f32.mrb[59].mxu1  ;;  %v4142_v31 = vpop.f32.mrb[63].mxu0 }
 0xfd4   : > { %v3481_v19 = vadd.f32 %v4118_v26, %v3440_v49  ;;  %v4121_v33 = vadd.f32 %v4120_v29, %v4119_v27  ;;  %v4143_v34 = vadd.f32 %v4142_v31, %v4141_v28  ;;  %v4009_v29 = vld [vmem:[%s5511_s14] ss:$0 sm:$0xff] }
 0xfd6   : > { %v3522_v24 = vadd.f32 %v4140_v17, %v3481_v19  ;;  %v3484_v32 = vadd.f32 %v4121_v33, %v3443_v50  ;;  %v4008_v17 = vld [vmem:[%s5510_s13] ss:$0 sm:$0xff] }
 0xfd8   : > { %v3525_v35 = vadd.f32 %v4143_v34, %v3484_v32 }
 0xff0   : > { %v4160_v37 = vpop.f32.mrb[60].mxu1 }
 0xff1   : > { %v4182_v39 = vpop.f32.mrb[64].mxu0  ;;  %v4161_v40 = vpop.f32.mrb[61].mxu1 }
 0xff2   : > { %v4162_v36 = vadd.f32 %v4161_v40, %v4160_v37  ;;  %v4183_v41 = vpop.f32.mrb[65].mxu0  ;;  %v4163_v13 = vpop.f32.mrb[62].mxu1 }
 0xff3   : > { %v4184_v11 = vadd.f32 %v4183_v41, %v4182_v39  ;;  %v4185_v42 = vpop.f32.mrb[66].mxu0  ;;  %v4164_v43 = vpop.f32.mrb[63].mxu1 }
 0xff4   : > { %v3563_v44 = vadd.f32 %v4162_v36, %v3522_v24  ;;  %v4165_v45 = vadd.f32 %v4164_v43, %v4163_v13  ;;  %v4186_v15 = vpop.f32.mrb[67].mxu0 }
 0xff5   : > { %v4187_v30 = vadd.f32 %v4186_v15, %v4185_v42 }
 0xff6   : > { %v3604_v1 = vadd.f32 %v4184_v11, %v3563_v44  ;;  %v3566_v46 = vadd.f32 %v4165_v45, %v3525_v35 }
 0xff8   : > { %v3607_v47 = vadd.f32 %v4187_v30, %v3566_v46 }
0x1010   : > { %v4204_v48 = vpop.f32.mrb[64].mxu1 }
0x1011   : > { %v4226_v51 = vpop.f32.mrb[68].mxu0  ;;  %v4205_v52 = vpop.f32.mrb[65].mxu1 }
0x1012   : > { %v4206_v53 = vadd.f32 %v4205_v52, %v4204_v48  ;;  %v4227_v54 = vpop.f32.mrb[69].mxu0  ;;  %v4207_v55 = vpop.f32.mrb[66].mxu1 }
0x1013   : > { %v4228_v56 = vadd.f32 %v4227_v54, %v4226_v51  ;;  %v4229_v57 = vpop.f32.mrb[70].mxu0  ;;  %v4208_v61 = vpop.f32.mrb[67].mxu1 }
0x1014   : > { %v3645_v62 = vadd.f32 %v4206_v53, %v3604_v1  ;;  %v4209_v14 = vadd.f32 %v4208_v61, %v4207_v55  ;;  %v4230_v63 = vpop.f32.mrb[71].mxu0 }
0x1015   : > { %v4231_v0 = vadd.f32 %v4230_v63, %v4229_v57 }
0x1016   : > { %v3686_v3 = vadd.f32 %v4228_v56, %v3645_v62  ;;  %v3648_v8 = vadd.f32 %v4209_v14, %v3607_v47 }
0x1018   : > { %v3689_v4 = vadd.f32 %v4231_v0, %v3648_v8  ;;  %v3692_v23 = vadd.f32 %v3686_v3, %v4933_v58 }
0x101a   : > { %v3696_v38 = vsel %vm579_vm3, %v3692_v23, 0.0  ;;  %v3693_v12 = vadd.f32 %v3689_v4, %v4935_v59 }
0x101b   : > { %3697 = vadd.xlane.f32.xlu0 %v3696_v38 }
0x101c   : > { %v3699_v5 = vsel %vm579_vm3, %v3693_v12, 0.0 }
0x101d   : > { %3700 = vadd.xlane.f32.xlu1 %v3699_v5 }
0x10a8   : > { %v3698_v6 = vpop.xlane.xlu0 %3697 }
0x10a9   : > { %v3702_v7 = vmul.f32 0.03125, %v3698_v6 }
0x10aa   : > { %v3701_v10 = vpop.xlane.xlu1 %3700 }
0x10ab   : > { %v3704_v18 = vsub.f32 %v3692_v23, %v3702_v7  ;;  %v3703_v9 = vmul.f32 0.03125, %v3701_v10 }
0x10ad   : > { %v3705_v25 = vsub.f32 %v3693_v12, %v3703_v9  ;;  %v3706_v20 = vmul.f32 %v3704_v18, %v3704_v18 }
0x10af   : > { %v3708_v49 = vsel %vm579_vm3, %v3706_v20, 0.0  ;;  %v3707_v21 = vmul.f32 %v3705_v25, %v3705_v25 }
0x10b0   : > { %3709 = vadd.xlane.f32.xlu0 %v3708_v49 }
0x10b1   : > { %v3711_v58 = vsel %vm579_vm3, %v3707_v21, 0.0 }
0x10b2   : > { %3712 = vadd.xlane.f32.xlu1 %v3711_v58 }
0x113d   : > { %v3710_v59 = vpop.xlane.xlu0 %3709 }
0x113e   : > { %v3714_v50 = vmul.f32 0.03125, %v3710_v59 }
0x113f   : > { %v3713_v60 = vpop.xlane.xlu1 %3712 }
0x1140   : > { %v3716_v2 = vadd.f32 1e-05, %v3714_v50  ;;  %v3715_v22 = vmul.f32 0.03125, %v3713_v60 }
0x1142   : > { %4558 = vrsqrt.f32 %v3716_v2  ;;  %v3717_v16 = vadd.f32 1e-05, %v3715_v22 }
0x1144   : > { %4560 = vrsqrt.f32 %v3717_v16 }
0x114c   : > { %v4559_v26 = vpop.eup %4558 }
0x114d   : > { %v3720_v27 = vmul.f32 %v4559_v26, %v3704_v18 }
0x114e   : > { %v4561_v28 = vpop.eup %4560 }
0x114f   : > { %v3728_v31 = vmul.f32 %v4008_v17, %v3720_v27  ;;  %v3721_v19 = vmul.f32 %v4561_v28, %v3705_v25 }
0x1151   : > { %v3736_v33 = vadd.f32 %v4009_v29, %v3728_v31  ;;  %v3729_v34 = vmul.f32 %v4008_v17, %v3721_v19 }
0x1153   : > { %v3738_v24 = vpack.c.bf16 %v3736_v33, %v3736_v33  ;;  %v3737_v32 = vadd.f32 %v4009_v29, %v3729_v34 }
0x1155   : > { %3741 = vst.msk [vmem:[%s496_s28] sm:$0xf] %vm3740_vm6, %v3738_v24  ;;  %v3739_v35 = vpack.c.bf16 %v3737_v32, %v3737_v32 }
0x1157   : > { %3742 = vst.msk [vmem:[%s496_s28 + $0x4] sm:$0xf] %vm3740_vm6, %v3739_v35 }
0x1158 PF: > { %s25_s18 = sadd.s32 1, %s4568_s18  }
0x1159   : > { %p22_p4 = scmp.ge.s32.totalorder %s25_s18, 4  }
0x115b   :  { %24 = sbr.rel (!%p22_p4) target bundleno = 1 (0x1), region = 110 }

</bundles_post_ra>
